<compile_context>
chip_gen: v7x
topology: tpu7x:2x2x1
jax: 0.10.0
libtpu: 0.0.40
codegen_flags: <defaults>
</compile_context>

<pallas_src>
import functools

import jax
import jax.numpy as jnp
from jax.experimental import pallas as pl
from jax.experimental.pallas import tpu as pltpu

HID_SIZE = 64
CONV_CH = HID_SIZE // 2   # 32
K = 3                     # conv kernel size (stride 1)


def _vmem():
    return pl.BlockSpec(memory_space=pltpu.MemorySpace.VMEM)


# ---------------- fused Pallas kernel ----------------

def fused_actor_kernel(x_ref, patch_ref, wbd_ref, w64_ref, w128_ref, b_ref, out_ref):
    """x:[B,OBSP] f32, patch:[B,P*CKK] bf16, wbd:[P*CKK,P*32] bf16,
    w64:[P*32+256,64] bf16, w128:[OBSP+64,128] f32, b:[1,P*32+640] f32,
    out:[B,2A] f32."""
    bf16 = jnp.bfloat16
    relu = lambda v: jnp.maximum(v, 0.0)
    dot = lambda a, b: jnp.dot(a, b, preferred_element_type=jnp.float32)

    NPC = wbd_ref.shape[1]       # P * CONV_CH
    OBSP = x_ref.shape[1]        # obs_dim padded to a sublane multiple
    A2 = out_ref.shape[1]
    A = A2 // 2

    # Conv2d(stride=1) + ReLU over ALL spatial positions as one block-diagonal
    # matmul (x/255 is folded into the weight). Output cols ordered (pos, ch).
    conv = relu(dot(patch_ref[...], wbd_ref[...]) + b_ref[:, 0:NPC])           # [B, P*32]

    # nn.Flatten + Linear(F -> 64) + ReLU: fc1 rows were permuted at init to
    # the same (pos, ch) order, so this is one contiguous matmul (no reshape).
    h = relu(dot(conv.astype(bf16), w64_ref[0:NPC, :])
             + b_ref[:, NPC:NPC + 64])                                         # [B, 64]

    # Linear(64 -> 64) + ReLU
    h = relu(dot(h.astype(bf16), w64_ref[NPC:NPC + 64, :])
             + b_ref[:, NPC + 128:NPC + 192])                                  # [B, 64]

    # torch.cat((x, cnn_out), -1) @ mu1_w  ==  x @ mu1_wx + h @ mu1_wh
    o = relu(dot(x_ref[...].astype(bf16), w128_ref[0:OBSP, :].astype(bf16))
             + dot(h.astype(bf16), w128_ref[OBSP:OBSP + HID_SIZE, :].astype(bf16))
             + b_ref[:, NPC + 256:NPC + 384])                                  # [B, 128]
    o = relu(dot(o.astype(bf16), w64_ref[NPC + 64:NPC + 192, :])
             + b_ref[:, NPC + 384:NPC + 448])                                  # [B, 64]
    logits = (dot(o.astype(bf16), w64_ref[NPC + 192:NPC + 256, :])
              + b_ref[:, NPC + 512:NPC + 576])[:, 0:A2]                        # [B, 2A]

    # Two independent softmaxes (action | task halves) with a lane-segment
    # mask; one full-width store instead of two masked sub-slice stores.
    lane = jax.lax.broadcasted_iota(jnp.int32, logits.shape, 1)
    is_a = lane < A
    m_a = jnp.max(jnp.where(is_a, logits, -jnp.inf), axis=-1, keepdims=True)
    m_t = jnp.max(jnp.where(is_a, -jnp.inf, logits), axis=-1, keepdims=True)
    e = jnp.exp(logits - jnp.where(is_a, m_a, m_t))
    s_a = jnp.sum(jnp.where(is_a, e, 0.0), axis=-1, keepdims=True)
    s_t = jnp.sum(jnp.where(is_a, 0.0, e), axis=-1, keepdims=True)
    out_ref[...] = e / jnp.where(is_a, s_a, s_t)


# ---------------- init / packing / wrapper ----------------

def init_params(key, obs_dim, act_dim, task_shape):
    # TODO(synk): PyTorch uses orthogonal init with ReLU gain (and default
    # Kaiming-uniform for self.mu); plain scaled-normal init is used here, so
    # values won't match a torch ModelActor checkpoint, only the forward math.
    C, S1, S2 = task_shape
    OH, OW = S1 - K + 1, S2 - K + 1
    F = CONV_CH * OH * OW
    ks = jax.random.split(key, 6)

    def lin(k, fi, fo):
        w = jax.random.normal(k, (fi, fo), jnp.float32) / jnp.sqrt(float(fi))
        return w, jnp.zeros((1, fo), jnp.float32)

    conv_w, conv_b = lin(ks[0], C * K * K, CONV_CH)   # rows (c, di, dj) = torch w.reshape(32,-1).T
    conv_w = conv_w * (1.0 / 255.0)                   # fold x/255 into the conv weight
    fc1_w, fc1_b = lin(ks[1], F, HID_SIZE)            # rows (ch, oh, ow) = torch NCHW flatten
    fc2_w, fc2_b = lin(ks[2], HID_SIZE, HID_SIZE)
    mu1_w, mu1_b = lin(ks[3], obs_dim + HID_SIZE, HID_SIZE * 2)
    mu2_w, mu2_b = lin(ks[4], HID_SIZE * 2, HID_SIZE)
    mu3_w, mu3_b = lin(ks[5], HID_SIZE, act_dim * 2)
    return dict(conv_w=conv_w, conv_b=conv_b, fc1_w=fc1_w, fc1_b=fc1_b,
                fc2_w=fc2_w, fc2_b=fc2_b, mu1_w=mu1_w, mu1_b=mu1_b,
                mu2_w=mu2_w, mu2_b=mu2_b, mu3_w=mu3_w, mu3_b=mu3_b)


def quantize_matmul_weights(p):
    # The kernel feeds every weight to the MXU as bf16; round them once here
    # (f32 container) so the plain-JAX reference sees the exact same weights.
    q = dict(p)
    for k in ("conv_w", "fc1_w", "fc2_w", "mu1_w", "mu2_w", "mu3_w"):
        q[k] = p[k].astype(jnp.bfloat16).astype(jnp.float32)
    return q


def pack_params(p, obs_dim, act_dim, task_shape):
    """Pack the 12 logical arrays into 4 kernel buffers (fewer, larger DMAs)."""
    C, S1, S2 = task_shape
    OH, OW = S1 - K + 1, S2 - K + 1
    P = OH * OW
    NPC = P * CONV_CH
    obs_pad = -(-obs_dim // 8) * 8

    # 1) Block-diagonal conv weight kron(I_P, conv_w): one matmul does the
    #    whole conv; output columns are ordered (position, channel).
    w_bd = jnp.kron(jnp.eye(P, dtype=jnp.float32), p["conv_w"]).astype(jnp.bfloat16)

    # 2) Width-64 weights stacked along rows (all row offsets are multiples of
    #    16, so the packed-bf16 slices inside the kernel stay tile aligned).
    fc1_perm = (p["fc1_w"].reshape(CONV_CH, P, HID_SIZE)
                          .transpose(1, 0, 2)
                          .reshape(NPC, HID_SIZE))                 # rows (pos, ch)
    mu3_pad = jnp.zeros((HID_SIZE, HID_SIZE), jnp.float32).at[:, :2 * act_dim].set(p["mu3_w"])
    w64 = jnp.concatenate([fc1_perm, p["fc2_w"], p["mu2_w"], mu3_pad],
                          axis=0).astype(jnp.bfloat16)             # [NPC+256, 64]

    # 3) mu1 weight with the x/h split point padded to a sublane boundary
    #    (stored f32, cast to bf16 in-kernel; it is only ~36 KB).
    wx = jnp.zeros((obs_pad, 2 * HID_SIZE), jnp.float32).at[:obs_dim].set(p["mu1_w"][:obs_dim])
    w128 = jnp.concatenate([wx, p["mu1_w"][obs_dim:]], axis=0)     # [obs_pad+64, 128]

    # 4) All biases lane-packed into one row at 128-aligned offsets.
    def pad128(v):
        return jnp.pad(v, ((0, 0), (0, 128 - v.shape[1])))
    mu3_b64 = jnp.pad(p["mu3_b"], ((0, 0), (0, HID_SIZE - 2 * act_dim)))
    biases = jnp.concatenate(
        [jnp.tile(p["conv_b"], (1, P)), pad128(p["fc1_b"]), pad128(p["fc2_b"]),
         p["mu1_b"], pad128(p["mu2_b"]), pad128(mu3_b64)], axis=1)  # [1, NPC+640]

    return dict(w_bd=w_bd, w64=w64, w128=w128, biases=biases)


def im2col_bmajor(task):
    # task: [B, C, S1, S2] (NCHW). Returns [B, P*C*K*K] with columns ordered
    # (p=(oh,ow), c, di, dj) to match the block-diagonal conv weight. Pure
    # layout work on a tiny tensor; XLA fuses it into the kernel's input.
    B, C, S1, S2 = task.shape
    OH, OW = S1 - K + 1, S2 - K + 1
    cols = [task[:, :, di:di + OH, dj:dj + OW]       # each [B, C, OH, OW]
            for di in range(K) for dj in range(K)]
    p = jnp.stack(cols, axis=2)                      # [B, C, K*K, OH, OW]
    p = p.transpose(0, 3, 4, 1, 2)                   # [B, OH, OW, C, K*K]
    return p.reshape(B, OH * OW * C * K * K)


@functools.partial(jax.jit, static_argnames=("act_dim",))
def model_actor_forward(x, task, packed, *, act_dim):
    B = x.shape[0]
    obs_pad = packed["w128"].shape[0] - HID_SIZE
    if x.shape[1] < obs_pad:
        x = jnp.pad(x, ((0, 0), (0, obs_pad - x.shape[1])))
    patches = im2col_bmajor(task).astype(jnp.bfloat16)

    out = pl.pallas_call(
        fused_actor_kernel,
        out_shape=jax.ShapeDtypeStruct((B, 2 * act_dim), jnp.float32),
        in_specs=[_vmem()] * 6,
        out_specs=_vmem(),
    )(x, patches, packed["w_bd"], packed["w64"], packed["w128"], packed["biases"])

    # TODO(synk): torch.distributions.Categorical objects (sampling/log_prob)
    # and the in-forward print() have no Pallas equivalent; we return the
    # probability tensors only.
    return out[:, :act_dim], out[:, act_dim:]


# ---------------- plain-JAX reference (torch semantics) ----------------

def reference_forward(x, task, p):
    hi = jax.lax.Precision.HIGHEST
    C = task.shape[1]
    # conv_w already contains the 1/255 scale, so apply it to the raw task.
    w_oihw = jnp.transpose(p["conv_w"], (1, 0)).reshape(CONV_CH, C, K, K)
    conv = jax.lax.conv_general_dilated(
        task, w_oihw, window_strides=(1, 1), padding="VALID",
        dimension_numbers=("NCHW", "OIHW", "NCHW"), precision=hi)
    conv = jnp.maximum(conv + p["conv_b"].reshape(1, CONV_CH, 1, 1), 0.0)
    feat = conv.reshape(conv.shape[0], -1)                          # NCHW flatten

    h = jnp.maximum(jnp.dot(feat, p["fc1_w"], precision=hi) + p["fc1_b"], 0.0)
    h = jnp.maximum(jnp.dot(h, p["fc2_w"], precision=hi) + p["fc2_b"], 0.0)
    z = jnp.concatenate([x, h], axis=-1)
    o = jnp.maximum(jnp.dot(z, p["mu1_w"], precision=hi) + p["mu1_b"], 0.0)
    o = jnp.maximum(jnp.dot(o, p["mu2_w"], precision=hi) + p["mu2_b"], 0.0)
    out = jnp.dot(o, p["mu3_w"], precision=hi) + p["mu3_b"]
    A = out.shape[-1] // 2
    return (jax.nn.softmax(out[:, :A], axis=-1),
            jax.nn.softmax(out[:, A:], axis=-1))


if __name__ == "__main__":
    B, OBS_DIM, ACT_DIM = 16, 8, 4
    TASK_SHAPE = (4, 8, 8)   # (channel, width, height)

    root = jax.random.PRNGKey(0)
    k_p, k_x, k_t = jax.random.split(root, 3)

    params = quantize_matmul_weights(init_params(k_p, OBS_DIM, ACT_DIM, TASK_SHAPE))
    packed = pack_params(params, OBS_DIM, ACT_DIM, TASK_SHAPE)

    x = jax.random.uniform(k_x, (B, OBS_DIM), jnp.float32)
    task = jax.random.uniform(k_t, (B,) + TASK_SHAPE, jnp.float32) * 255.0

    action_pro, task_pro = model_actor_forward(x, task, packed, act_dim=ACT_DIM)
    jax.block_until_ready((action_pro, task_pro))

    assert action_pro.shape == (B, ACT_DIM) and task_pro.shape == (B, ACT_DIM)
    assert bool(jnp.all(jnp.isfinite(action_pro))) and bool(jnp.all(jnp.isfinite(task_pro)))
    # Exact-division softmax -> rows sum to 1 to f32 precision.
    assert bool(jnp.allclose(action_pro.sum(-1), 1.0, atol=1e-4))
    assert bool(jnp.allclose(task_pro.sum(-1), 1.0, atol=1e-4))

    # The reference uses the same bf16-rounded weights but full-f32 math; the
    # remaining difference is the kernel's bf16 activation casts at dot inputs.
    ref_a, ref_t = reference_forward(x, task, params)
    assert bool(jnp.allclose(action_pro, ref_a, atol=2e-2))
    assert bool(jnp.allclose(task_pro, ref_t, atol=2e-2))

    print("KERNEL_OK")
</pallas_src>

<mosaic_0001>
module attributes {stable_mosaic.version = 11 : i64} {
  func.func @fused_actor_kernel(%arg0: memref<16x8xf32, #tpu.memory_space<vmem>>, %arg1: memref<16x1296xbf16, #tpu.memory_space<vmem>>, %arg2: memref<1296x1152xbf16, #tpu.memory_space<vmem>>, %arg3: memref<1408x64xbf16, #tpu.memory_space<vmem>>, %arg4: memref<72x128xf32, #tpu.memory_space<vmem>>, %arg5: memref<1x1792xf32, #tpu.memory_space<vmem>>, %arg6: memref<16x8xf32, #tpu.memory_space<vmem>>) attributes {dimension_semantics = [], scalar_prefetch = 0 : i64, scratch_operands = 0 : i64, tpu.core_type = #tpu.core_type<tc>} {
    %c0 = arith.constant 0 : index
    %c0_0 = arith.constant 0 : index
    %0 = vector.load %arg1[%c0, %c0_0] : memref<16x1296xbf16, #tpu.memory_space<vmem>>, vector<16x1296xbf16>
    %c0_1 = arith.constant 0 : index
    %c0_2 = arith.constant 0 : index
    %1 = vector.load %arg2[%c0_1, %c0_2] : memref<1296x1152xbf16, #tpu.memory_space<vmem>>, vector<1296x1152xbf16>
    %cst = arith.constant dense<0.000000e+00> : vector<16x1152xf32>
    %2 = tpu.matmul %0, %1, %cst {dimension_numbers = #tpu.dot_dimension_numbers<[1], [0], [0], [1], [0, 0, 1, 1], [], []>} : vector<16x1296xbf16>, vector<1296x1152xbf16>, vector<16x1152xf32> -> vector<16x1152xf32>
    %c0_3 = arith.constant 0 : index
    %c0_4 = arith.constant 0 : index
    %3 = vector.load %arg5[%c0_3, %c0_4] : memref<1x1792xf32, #tpu.memory_space<vmem>>, vector<1x1152xf32>
    %4 = vector.broadcast %3 : vector<1x1152xf32> to vector<16x1152xf32>
    %5 = arith.addf %2, %4 : vector<16x1152xf32>
    %cst_5 = arith.constant 0.000000e+00 : f32
    %6 = vector.broadcast %cst_5 : f32 to vector<16x1152xf32>
    %7 = arith.maximumf %5, %6 : vector<16x1152xf32>
    %8 = arith.truncf %7 : vector<16x1152xf32> to vector<16x1152xbf16>
    %c0_6 = arith.constant 0 : index
    %c0_7 = arith.constant 0 : index
    %9 = vector.load %arg3[%c0_6, %c0_7] : memref<1408x64xbf16, #tpu.memory_space<vmem>>, vector<1152x64xbf16>
    %cst_8 = arith.constant dense<0.000000e+00> : vector<16x64xf32>
    %10 = tpu.matmul %8, %9, %cst_8 {dimension_numbers = #tpu.dot_dimension_numbers<[1], [0], [0], [1], [0, 0, 1, 1], [], []>} : vector<16x1152xbf16>, vector<1152x64xbf16>, vector<16x64xf32> -> vector<16x64xf32>
    %c0_9 = arith.constant 0 : index
    %c1152 = arith.constant 1152 : index
    %11 = vector.load %arg5[%c0_9, %c1152] : memref<1x1792xf32, #tpu.memory_space<vmem>>, vector<1x64xf32>
    %12 = vector.broadcast %11 : vector<1x64xf32> to vector<16x64xf32>
    %13 = arith.addf %10, %12 : vector<16x64xf32>
    %cst_10 = arith.constant 0.000000e+00 : f32
    %14 = vector.broadcast %cst_10 : f32 to vector<16x64xf32>
    %15 = arith.maximumf %13, %14 : vector<16x64xf32>
    %16 = arith.truncf %15 : vector<16x64xf32> to vector<16x64xbf16>
    %c1152_11 = arith.constant 1152 : index
    %c0_12 = arith.constant 0 : index
    %17 = vector.load %arg3[%c1152_11, %c0_12] : memref<1408x64xbf16, #tpu.memory_space<vmem>>, vector<64x64xbf16>
    %cst_13 = arith.constant dense<0.000000e+00> : vector<16x64xf32>
    %18 = tpu.matmul %16, %17, %cst_13 {dimension_numbers = #tpu.dot_dimension_numbers<[1], [0], [0], [1], [0, 0, 1, 1], [], []>} : vector<16x64xbf16>, vector<64x64xbf16>, vector<16x64xf32> -> vector<16x64xf32>
    %c0_14 = arith.constant 0 : index
    %c1280 = arith.constant 1280 : index
    %19 = vector.load %arg5[%c0_14, %c1280] : memref<1x1792xf32, #tpu.memory_space<vmem>>, vector<1x64xf32>
    %20 = vector.broadcast %19 : vector<1x64xf32> to vector<16x64xf32>
    %21 = arith.addf %18, %20 : vector<16x64xf32>
    %cst_15 = arith.constant 0.000000e+00 : f32
    %22 = vector.broadcast %cst_15 : f32 to vector<16x64xf32>
    %23 = arith.maximumf %21, %22 : vector<16x64xf32>
    %c0_16 = arith.constant 0 : index
    %c0_17 = arith.constant 0 : index
    %24 = vector.load %arg0[%c0_16, %c0_17] : memref<16x8xf32, #tpu.memory_space<vmem>>, vector<16x8xf32>
    %25 = arith.truncf %24 : vector<16x8xf32> to vector<16x8xbf16>
    %c0_18 = arith.constant 0 : index
    %c0_19 = arith.constant 0 : index
    %26 = vector.load %arg4[%c0_18, %c0_19] : memref<72x128xf32, #tpu.memory_space<vmem>>, vector<8x128xf32>
    %27 = arith.truncf %26 : vector<8x128xf32> to vector<8x128xbf16>
    %cst_20 = arith.constant dense<0.000000e+00> : vector<16x128xf32>
    %28 = tpu.matmul %25, %27, %cst_20 {dimension_numbers = #tpu.dot_dimension_numbers<[1], [0], [0], [1], [0, 0, 1, 1], [], []>} : vector<16x8xbf16>, vector<8x128xbf16>, vector<16x128xf32> -> vector<16x128xf32>
    %29 = arith.truncf %23 : vector<16x64xf32> to vector<16x64xbf16>
    %c8 = arith.constant 8 : index
    %c0_21 = arith.constant 0 : index
    %30 = vector.load %arg4[%c8, %c0_21] : memref<72x128xf32, #tpu.memory_space<vmem>>, vector<64x128xf32>
    %31 = arith.truncf %30 : vector<64x128xf32> to vector<64x128xbf16>
    %cst_22 = arith.constant dense<0.000000e+00> : vector<16x128xf32>
    %32 = tpu.matmul %29, %31, %cst_22 {dimension_numbers = #tpu.dot_dimension_numbers<[1], [0], [0], [1], [0, 0, 1, 1], [], []>} : vector<16x64xbf16>, vector<64x128xbf16>, vector<16x128xf32> -> vector<16x128xf32>
    %33 = arith.addf %28, %32 : vector<16x128xf32>
    %c0_23 = arith.constant 0 : index
    %c1408 = arith.constant 1408 : index
    %34 = vector.load %arg5[%c0_23, %c1408] : memref<1x1792xf32, #tpu.memory_space<vmem>>, vector<1x128xf32>
    %35 = vector.broadcast %34 : vector<1x128xf32> to vector<16x128xf32>
    %36 = arith.addf %33, %35 : vector<16x128xf32>
    %cst_24 = arith.constant 0.000000e+00 : f32
    %37 = vector.broadcast %cst_24 : f32 to vector<16x128xf32>
    %38 = arith.maximumf %36, %37 : vector<16x128xf32>
    %39 = arith.truncf %38 : vector<16x128xf32> to vector<16x128xbf16>
    %c1216 = arith.constant 1216 : index
    %c0_25 = arith.constant 0 : index
    %40 = vector.load %arg3[%c1216, %c0_25] : memref<1408x64xbf16, #tpu.memory_space<vmem>>, vector<128x64xbf16>
    %cst_26 = arith.constant dense<0.000000e+00> : vector<16x64xf32>
    %41 = tpu.matmul %39, %40, %cst_26 {dimension_numbers = #tpu.dot_dimension_numbers<[1], [0], [0], [1], [0, 0, 1, 1], [], []>} : vector<16x128xbf16>, vector<128x64xbf16>, vector<16x64xf32> -> vector<16x64xf32>
    %c0_27 = arith.constant 0 : index
    %c1536 = arith.constant 1536 : index
    %42 = vector.load %arg5[%c0_27, %c1536] : memref<1x1792xf32, #tpu.memory_space<vmem>>, vector<1x64xf32>
    %43 = vector.broadcast %42 : vector<1x64xf32> to vector<16x64xf32>
    %44 = arith.addf %41, %43 : vector<16x64xf32>
    %cst_28 = arith.constant 0.000000e+00 : f32
    %45 = vector.broadcast %cst_28 : f32 to vector<16x64xf32>
    %46 = arith.maximumf %44, %45 : vector<16x64xf32>
    %47 = arith.truncf %46 : vector<16x64xf32> to vector<16x64xbf16>
    %c1344 = arith.constant 1344 : index
    %c0_29 = arith.constant 0 : index
    %48 = vector.load %arg3[%c1344, %c0_29] : memref<1408x64xbf16, #tpu.memory_space<vmem>>, vector<64x64xbf16>
    %cst_30 = arith.constant dense<0.000000e+00> : vector<16x64xf32>
    %49 = tpu.matmul %47, %48, %cst_30 {dimension_numbers = #tpu.dot_dimension_numbers<[1], [0], [0], [1], [0, 0, 1, 1], [], []>} : vector<16x64xbf16>, vector<64x64xbf16>, vector<16x64xf32> -> vector<16x64xf32>
    %c0_31 = arith.constant 0 : index
    %c1664 = arith.constant 1664 : index
    %50 = vector.load %arg5[%c0_31, %c1664] : memref<1x1792xf32, #tpu.memory_space<vmem>>, vector<1x64xf32>
    %51 = vector.broadcast %50 : vector<1x64xf32> to vector<16x64xf32>
    %52 = arith.addf %49, %51 : vector<16x64xf32>
    %53 = vector.extract_strided_slice %52 {offsets = [0, 0], sizes = [16, 8], strides = [1, 1]} : vector<16x64xf32> to vector<16x8xf32>
    %54 = tpu.iota {dimensions = array<i32: 1>} : vector<16x8xi32>
    %c4_i32 = arith.constant 4 : i32
    %55 = vector.broadcast %c4_i32 : i32 to vector<16x8xi32>
    %56 = arith.cmpi slt, %54, %55 : vector<16x8xi32>
    %cst_32 = arith.constant 0xFF800000 : f32
    %57 = vector.broadcast %cst_32 : f32 to vector<16x8xf32>
    %58 = arith.select %56, %53, %57 : vector<16x8xi1>, vector<16x8xf32>
    %cst_33 = arith.constant dense<0xFF800000> : vector<16xf32>
    %59 = vector.multi_reduction <maximumf>, %58, %cst_33 [1] : vector<16x8xf32> to vector<16xf32>
    %60 = vector.shape_cast %59 : vector<16xf32> to vector<16x1xf32>
    %cst_34 = arith.constant 0xFF800000 : f32
    %61 = vector.broadcast %cst_34 : f32 to vector<16x8xf32>
    %62 = arith.select %56, %61, %53 : vector<16x8xi1>, vector<16x8xf32>
    %cst_35 = arith.constant dense<0xFF800000> : vector<16xf32>
    %63 = vector.multi_reduction <maximumf>, %62, %cst_35 [1] : vector<16x8xf32> to vector<16xf32>
    %64 = vector.shape_cast %63 : vector<16xf32> to vector<16x1xf32>
    %65 = vector.shape_cast %60 : vector<16x1xf32> to vector<16x1xf32>
    %66 = vector.broadcast %65 : vector<16x1xf32> to vector<16x8xf32>
    %67 = vector.shape_cast %64 : vector<16x1xf32> to vector<16x1xf32>
    %68 = vector.broadcast %67 : vector<16x1xf32> to vector<16x8xf32>
    %69 = arith.select %56, %66, %68 : vector<16x8xi1>, vector<16x8xf32>
    %70 = arith.subf %53, %69 : vector<16x8xf32>
    %71 = math.exp %70 : vector<16x8xf32>
    %cst_36 = arith.constant 0.000000e+00 : f32
    %72 = vector.broadcast %cst_36 : f32 to vector<16x8xf32>
    %73 = arith.select %56, %71, %72 : vector<16x8xi1>, vector<16x8xf32>
    %cst_37 = arith.constant dense<0.000000e+00> : vector<16xf32>
    %74 = vector.multi_reduction <add>, %73, %cst_37 [1] : vector<16x8xf32> to vector<16xf32>
    %75 = vector.shape_cast %74 : vector<16xf32> to vector<16x1xf32>
    %cst_38 = arith.constant 0.000000e+00 : f32
    %76 = vector.broadcast %cst_38 : f32 to vector<16x8xf32>
    %77 = arith.select %56, %76, %71 : vector<16x8xi1>, vector<16x8xf32>
    %cst_39 = arith.constant dense<0.000000e+00> : vector<16xf32>
    %78 = vector.multi_reduction <add>, %77, %cst_39 [1] : vector<16x8xf32> to vector<16xf32>
    %79 = vector.shape_cast %78 : vector<16xf32> to vector<16x1xf32>
    %80 = vector.shape_cast %75 : vector<16x1xf32> to vector<16x1xf32>
    %81 = vector.broadcast %80 : vector<16x1xf32> to vector<16x8xf32>
    %82 = vector.shape_cast %79 : vector<16x1xf32> to vector<16x1xf32>
    %83 = vector.broadcast %82 : vector<16x1xf32> to vector<16x8xf32>
    %84 = arith.select %56, %81, %83 : vector<16x8xi1>, vector<16x8xf32>
    %85 = arith.divf %71, %84 : vector<16x8xf32>
    %c0_40 = arith.constant 0 : index
    %c0_41 = arith.constant 0 : index
    %86 = vector.load %arg6[%c0_40, %c0_41] : memref<16x8xf32, #tpu.memory_space<vmem>>, vector<16x8xf32>
    tpu.vector_store %arg6[%c0_40, %c0_41], %85 {strides = array<i32>} : memref<16x8xf32, #tpu.memory_space<vmem>>, vector<16x8xf32>,
    return
  }
}

</mosaic_0001>

<bundles_post_ra>
// kernel: model_actor_forward.1
= control target key start
LH: loop header
LB: loop body
LE: loop exit
PB: predicated region body
PF: predicated region fallthrough
CT: control target
= control target key end

     0   :  { %v9688_v1 = vmov 0   ;;  %vm4676_vm0 = vcmask 130048   ;;  %vm9690_vm1 = vmmov 0   ;;  %vm6815_vm2 = vcmask 523264   ;;  %s12471_s2 = inlined_call_operand.vmem [shape: bf16[1296,1152], index: 2, kind: input, shape index: {}]   ;;  %s12472_s1 = inlined_call_operand.vmem [shape: bf16[16,1296], index: 1, kind: input, shape index: {}]   ;;  %s12473_s5 = inlined_call_operand.vmem [shape: f32[1,1792], index: 5, kind: input, shape index: {}]   ;;  %s12474_s3 = inlined_call_operand.vmem [shape: bf16[1408,64], index: 3, kind: input, shape index: {}]   ;;  %s12475_s4 = inlined_call_operand.vmem [shape: f32[72,128], index: 4, kind: input, shape index: {}]   ;;  %s12476_s0 = inlined_call_operand.vmem [shape: f32[16,8], index: 0, kind: input, shape index: {}]   ;;  %s12477_s6 = inlined_call_operand.vmem [shape: f32[16,8], index: 6, kind: output, shape index: {}]  }
   0x1   :  { %v8503_v0 = vld [vmem:[%s12471_s2 + $0x4] ss:$36 sps:$4 sm:$0xff]   ;;  %4927 = vmatprep.mubr.bf16.mxu1 %v9688_v1  ;;  %v8509_v5 = vld [vmem:[%s12471_s2 + $0x4c] ss:$36 sps:$4 sm:$0xff]   ;;  %v8516_v10 = vld [vmem:[%s12471_s2 + $0x94] ss:$36 sps:$4 sm:$0xff]  }
   0x2   :  { %v8505_v2 = vld [vmem:[%s12471_s2 + $0x1684] ss:$36 sps:$4 sm:$0xff]   ;;  %4680 = vmatprep.subr.bf16.mxu0 %v8503_v0  ;;  %v8513_v7 = vld [vmem:[%s12471_s2 + $0xc] ss:$36 sps:$4 sm:$0xff]   ;;  %v8520_v12 = vld [vmem:[%s12471_s2 + $0x54] ss:$36 sps:$4 sm:$0xff]  }
   0x3   :  { %v8507_v3 = vld [vmem:[%s12471_s2] ss:$36 sps:$4 sm:$0xff]   ;;  %4895 = vmatprep.subr.bf16.mxu1 %v8505_v2  ;;  %v8511_v6 = vld [vmem:[%s12471_s2 + $0x8] ss:$36 sps:$4 sm:$0xff]   ;;  %v8518_v11 = vld [vmem:[%s12471_s2 + $0x50] ss:$36 sps:$4 sm:$0xff]  }
   0x4   :  { %v8508_v4 = vld [vmem:[%s12471_s2 + $0x1680] ss:$36 sps:$4 sm:$0xff]   ;;  %4681 = vmatpush1.bf16.msra.mxu0 %v8507_v3  ;;  %v8514_v8 = vld [vmem:[%s12471_s2 + $0x48] ss:$36 sps:$4 sm:$0xff]   ;;  %v8521_v13 = vld [vmem:[%s12471_s2 + $0x90] ss:$36 sps:$4 sm:$0xff]  }
   0x5   :  { %4896 = vmatpush1.bf16.msra.mxu1 %v8508_v4  ;;  %4682 = vmatprep.subr.bf16.mxu0 %v8509_v5  ;;  %v8515_v9 = vld [vmem:[%s12472_s1 + $0x28] ss:$44 sps:$4 sm:$0xff]   ;;  %v8522_v14 = vld [vmem:[%s12471_s2 + $0xdc] ss:$36 sps:$4 sm:$0xff]   ;;  %v8534_v22 = vld [vmem:[%s12471_s2 + $0x16c] ss:$36 sps:$4 sm:$0xff]  }
   0x6   :  { %4938 = vmatprep.subr.bf16.mxu1 %v8513_v7  ;;  %v8526_v15 = vld [vmem:[%s12471_s2 + $0x9c] ss:$36 sps:$4 sm:$0xff]   ;;  %v8528_v18 = vld [vmem:[%s12471_s2 + $0x124] ss:$36 sps:$4 sm:$0xff]   ;;  %v8538_v23 = vld [vmem:[%s12471_s2 + $0x12c] ss:$36 sps:$4 sm:$0xff]  }
   0x7   :  { %v8527_v16 = vld [vmem:[%s12471_s2 + $0xd8] ss:$36 sps:$4 sm:$0xff]   ;;  %v8532_v19 = vld [vmem:[%s12471_s2 + $0xe4] ss:$36 sps:$4 sm:$0xff]   ;;  %v8542_v28 = vld [vmem:[%s12471_s2 + $0x170] ss:$36 sps:$4 sm:$0xff]  }
   0x8   :  { %4683 = vmatpush1.bf16.msra.mxu0 %v8514_v8  ;;  %7979 = vmatmul.mubr.msk.bf16.vlgmr.msra.gmra.mrb[0].mxu1 %vm4676_vm0, %v8515_v9  ;;  %v8524_v17 = vld [vmem:[%s12471_s2 + $0x98] ss:$36 sps:$4 sm:$0xff]   ;;  %v8530_v20 = vld [vmem:[%s12471_s2 + $0xe0] ss:$36 sps:$4 sm:$0xff]   ;;  %v8539_v24 = vld [vmem:[%s12471_s2 + $0x168] ss:$36 sps:$4 sm:$0xff]  }
   0x9   :  { %4939 = vmatpush1.bf16.msra.mxu1 %v8511_v6  ;;  %4684 = vmatprep.subr.bf16.mxu0 %v8516_v10  ;;  %v8533_v21 = vld [vmem:[%s12471_s2 + $0x120] ss:$36 sps:$4 sm:$0xff]   ;;  %v8536_v25 = vld [vmem:[%s12471_s2 + $0x128] ss:$36 sps:$4 sm:$0xff]   ;;  %v8540_v26 = vld [vmem:[%s12471_s2 + $0x1b4] ss:$36 sps:$4 sm:$0xff]  }
   0xa   :  { %4940 = vmatprep.subr.bf16.mxu1 %v8520_v12  ;;  %v8544_v27 = vld [vmem:[%s12471_s2 + $0x174] ss:$36 sps:$4 sm:$0xff]   ;;  %v8546_v30 = vld [vmem:[%s12471_s2 + $0x1fc] ss:$36 sps:$4 sm:$0xff]   ;;  %v8552_v34 = vld [vmem:[%s12471_s2 + $0x244] ss:$36 sps:$4 sm:$0xff]  }
   0xb   :  { %v8545_v29 = vld [vmem:[%s12471_s2 + $0x1b0] ss:$36 sps:$4 sm:$0xff]   ;;  %v8550_v31 = vld [vmem:[%s12471_s2 + $0x1bc] ss:$36 sps:$4 sm:$0xff]   ;;  %v8556_v35 = vld [vmem:[%s12471_s2 + $0x204] ss:$36 sps:$4 sm:$0xff]  }
   0xc   :  { %4685 = vmatpush1.bf16.msra.mxu0 %v8521_v13  ;;  %v8551_v32 = vld [vmem:[%s12471_s2 + $0x1f8] ss:$36 sps:$4 sm:$0xff]   ;;  %v8554_v36 = vld [vmem:[%s12471_s2 + $0x200] ss:$36 sps:$4 sm:$0xff]   ;;  %v8558_v38 = vld [vmem:[%s12471_s2 + $0x28c] ss:$36 sps:$4 sm:$0xff]  }
   0xd   :  { %4941 = vmatpush1.bf16.msra.mxu1 %v8518_v11  ;;  %4686 = vmatprep.subr.bf16.mxu0 %v8522_v14  ;;  %v8548_v33 = vld [vmem:[%s12471_s2 + $0x1b8] ss:$36 sps:$4 sm:$0xff]   ;;  %v8557_v37 = vld [vmem:[%s12471_s2 + $0x240] ss:$36 sps:$4 sm:$0xff]   ;;  %v8562_v39 = vld [vmem:[%s12471_s2 + $0x24c] ss:$36 sps:$4 sm:$0xff]  }
   0xe   :  { %4942 = vmatprep.subr.bf16.mxu1 %v8526_v15  ;;  %v8563_v40 = vld [vmem:[%s12471_s2 + $0x288] ss:$36 sps:$4 sm:$0xff]   ;;  %v8564_v42 = vld [vmem:[%s12471_s2 + $0x2d4] ss:$36 sps:$4 sm:$0xff]   ;;  %v8570_v46 = vld [vmem:[%s12471_s2 + $0x31c] ss:$36 sps:$4 sm:$0xff]  }
   0xf   :  { %v8560_v41 = vld [vmem:[%s12471_s2 + $0x248] ss:$36 sps:$4 sm:$0xff]   ;;  %v8568_v43 = vld [vmem:[%s12471_s2 + $0x294] ss:$36 sps:$4 sm:$0xff]   ;;  %v8574_v47 = vld [vmem:[%s12471_s2 + $0x2dc] ss:$36 sps:$4 sm:$0xff]  }
  0x10   :  { %4687 = vmatpush1.bf16.msra.mxu0 %v8527_v16  ;;  %v8566_v44 = vld [vmem:[%s12471_s2 + $0x290] ss:$36 sps:$4 sm:$0xff]   ;;  %v8575_v48 = vld [vmem:[%s12471_s2 + $0x318] ss:$36 sps:$4 sm:$0xff]   ;;  %v8576_v51 = vld [vmem:[%s12471_s2 + $0x364] ss:$36 sps:$4 sm:$0xff]  }
  0x11   :  { %4943 = vmatpush1.bf16.msra.mxu1 %v8524_v17  ;;  %4688 = vmatprep.subr.bf16.mxu0 %v8528_v18  ;;  %v8569_v45 = vld [vmem:[%s12471_s2 + $0x2d0] ss:$36 sps:$4 sm:$0xff]   ;;  %v8572_v50 = vld [vmem:[%s12471_s2 + $0x2d8] ss:$36 sps:$4 sm:$0xff]   ;;  %v8580_v52 = vld [vmem:[%s12471_s2 + $0x324] ss:$36 sps:$4 sm:$0xff]  }
  0x12   :  { %4944 = vmatprep.subr.bf16.mxu1 %v8532_v19  ;;  %v8600_v49 = vld [vmem:[%s12472_s1 + $0x4] ss:$44 sps:$4 sm:$0xff]   ;;  %v8584_v57 = vld [vmem:[%s12471_s2 + $0x368] ss:$36 sps:$4 sm:$0xff]   ;;  %v8588_v59 = vld [vmem:[%s12471_s2 + $0x3f4] ss:$36 sps:$4 sm:$0xff]  }
  0x13   :  { %4712 = vmatprep.mubr.bf16.mxu0 %v8600_v49  ;;  %4970 = vmatprep.mubr.bf16.mxu1 %v8600_v49  ;;  %v8578_v53 = vld [vmem:[%s12471_s2 + $0x320] ss:$36 sps:$4 sm:$0xff]   ;;  %v8582_v55 = vld [vmem:[%s12471_s2 + $0x3ac] ss:$36 sps:$4 sm:$0xff]   ;;  %v8592_v60 = vld [vmem:[%s12471_s2 + $0x3b4] ss:$36 sps:$4 sm:$0xff]  }
  0x14   :  { %4689 = vmatpush1.bf16.msra.mxu0 %v8533_v21  ;;  %v8581_v54 = vld [vmem:[%s12471_s2 + $0x360] ss:$36 sps:$4 sm:$0xff]   ;;  %v8586_v56 = vld [vmem:[%s12471_s2 + $0x36c] ss:$36 sps:$4 sm:$0xff]   ;;  %v8596_v2 = vld [vmem:[%s12471_s2 + $0x3f8] ss:$36 sps:$4 sm:$0xff]  }
  0x15   :  { %4945 = vmatpush1.bf16.msra.mxu1 %v8530_v20  ;;  %4690 = vmatprep.subr.bf16.mxu0 %v8534_v22  ;;  %v8587_v58 = vld [vmem:[%s12471_s2 + $0x3a8] ss:$36 sps:$4 sm:$0xff]   ;;  %v8590_v61 = vld [vmem:[%s12471_s2 + $0x3b0] ss:$36 sps:$4 sm:$0xff]   ;;  %v8594_v63 = vld [vmem:[%s12471_s2 + $0x43c] ss:$36 sps:$4 sm:$0xff]  }
  0x16   :  { %4946 = vmatprep.subr.bf16.mxu1 %v8538_v23  ;;  %v8593_v62 = vld [vmem:[%s12471_s2 + $0x3f0] ss:$36 sps:$4 sm:$0xff]   ;;  %v8598_v0 = vld [vmem:[%s12471_s2 + $0x3fc] ss:$36 sps:$4 sm:$0xff]   ;;  %v8604_v4 = vld [vmem:[%s12471_s2 + $0x484] ss:$36 sps:$4 sm:$0xff]  }
  0x17   :  { %v8599_v3 = vld [vmem:[%s12471_s2 + $0x438] ss:$36 sps:$4 sm:$0xff]   ;;  %v8607_v5 = vld [vmem:[%s12471_s2 + $0x444] ss:$36 sps:$4 sm:$0xff]   ;;  %v8608_v6 = vld [vmem:[%s12472_s1] ss:$44 sps:$4 sm:$0xff]  }
  0x18   :  { %4691 = vmatpush1.bf16.msra.mxu0 %v8539_v24  ;;  %v8602_v7 = vld [vmem:[%s12471_s2 + $0x480] ss:$36 sps:$4 sm:$0xff]   ;;  %v8611_v9 = vld [vmem:[%s12471_s2 + $0x4cc] ss:$36 sps:$4 sm:$0xff]   ;;  %v8617_v13 = vld [vmem:[%s12471_s2 + $0x514] ss:$36 sps:$4 sm:$0xff]  }
  0x19   :  { %4947 = vmatpush1.bf16.msra.mxu1 %v8536_v25  ;;  %4692 = vmatprep.subr.bf16.mxu0 %v8540_v26  ;;  %v8605_v8 = vld [vmem:[%s12471_s2 + $0x440] ss:$36 sps:$4 sm:$0xff]   ;;  %v8614_v10 = vld [vmem:[%s12471_s2 + $0x48c] ss:$36 sps:$4 sm:$0xff]   ;;  %v8620_v14 = vld [vmem:[%s12471_s2 + $0x4d4] ss:$36 sps:$4 sm:$0xff]  }
  0x1a   :  { %4948 = vmatprep.subr.bf16.mxu1 %v8544_v27  ;;  %v8609_v11 = vld [vmem:[%s12471_s2 + $0x4c8] ss:$36 sps:$4 sm:$0xff]   ;;  %v8615_v15 = vld [vmem:[%s12471_s2 + $0x510] ss:$36 sps:$4 sm:$0xff]   ;;  %v8623_v17 = vld [vmem:[%s12471_s2 + $0x55c] ss:$36 sps:$4 sm:$0xff]  }
  0x1b   :  { %v8612_v12 = vld [vmem:[%s12471_s2 + $0x488] ss:$36 sps:$4 sm:$0xff]   ;;  %v8618_v16 = vld [vmem:[%s12471_s2 + $0x4d0] ss:$36 sps:$4 sm:$0xff]   ;;  %v8626_v18 = vld [vmem:[%s12471_s2 + $0x51c] ss:$36 sps:$4 sm:$0xff]  }
  0x1c   :  { %4693 = vmatpush1.bf16.msra.mxu0 %v8545_v29  ;;  %v8621_v19 = vld [vmem:[%s12471_s2 + $0x558] ss:$36 sps:$4 sm:$0xff]   ;;  %v8629_v21 = vld [vmem:[%s12471_s2 + $0x5a4] ss:$36 sps:$4 sm:$0xff]   ;;  %v8635_v25 = vld [vmem:[%s12471_s2 + $0x5ec] ss:$36 sps:$4 sm:$0xff]  }
  0x1d   :  { %4949 = vmatpush1.bf16.msra.mxu1 %v8542_v28  ;;  %4694 = vmatprep.subr.bf16.mxu0 %v8546_v30  ;;  %v8624_v20 = vld [vmem:[%s12471_s2 + $0x518] ss:$36 sps:$4 sm:$0xff]   ;;  %v8632_v22 = vld [vmem:[%s12471_s2 + $0x564] ss:$36 sps:$4 sm:$0xff]   ;;  %v8638_v26 = vld [vmem:[%s12471_s2 + $0x5ac] ss:$36 sps:$4 sm:$0xff]  }
  0x1e   :  { %4950 = vmatprep.subr.bf16.mxu1 %v8550_v31  ;;  %v8627_v23 = vld [vmem:[%s12471_s2 + $0x5a0] ss:$36 sps:$4 sm:$0xff]   ;;  %v8633_v27 = vld [vmem:[%s12471_s2 + $0x5e8] ss:$36 sps:$4 sm:$0xff]   ;;  %v8641_v29 = vld [vmem:[%s12471_s2 + $0x634] ss:$36 sps:$4 sm:$0xff]  }
  0x1f   :  { %v8630_v24 = vld [vmem:[%s12471_s2 + $0x560] ss:$36 sps:$4 sm:$0xff]   ;;  %v8636_v28 = vld [vmem:[%s12471_s2 + $0x5a8] ss:$36 sps:$4 sm:$0xff]   ;;  %v8644_v30 = vld [vmem:[%s12471_s2 + $0x5f4] ss:$36 sps:$4 sm:$0xff]  }
  0x20   :  { %4695 = vmatpush1.bf16.msra.mxu0 %v8551_v32  ;;  %v8639_v31 = vld [vmem:[%s12471_s2 + $0x630] ss:$36 sps:$4 sm:$0xff]   ;;  %v8699_v32 = vld [vmem:[%s12472_s1 + $0xc] ss:$44 sps:$4 sm:$0xff]   ;;  %vm6928_vm3 = vcmask 1043456   ;;  %vm6924_vm4 = vcmask 64512  }
  0x21   :  { %4951 = vmatpush1.bf16.msra.mxu1 %v8548_v33  ;;  %4696 = vmatprep.subr.bf16.mxu0 %v8552_v34  ;;  %v8642_v33 = vld [vmem:[%s12471_s2 + $0x5f0] ss:$36 sps:$4 sm:$0xff]   ;;  %v8647_v34 = vld [vmem:[%s12471_s2 + $0x67c] ss:$36 sps:$4 sm:$0xff]  }
  0x22   :  { %4952 = vmatprep.subr.bf16.mxu1 %v8556_v35  ;;  %v8650_v35 = vld [vmem:[%s12471_s2 + $0x63c] ss:$36 sps:$4 sm:$0xff]   ;;  %v8666_v49 = vld [vmem:[%s12471_s2 + $0x710] ss:$36 sps:$4 sm:$0xff]  }
  0x24   :  { %4697 = vmatpush1.bf16.msra.mxu0 %v8557_v37  ;;  %v8648_v37 = vld [vmem:[%s12471_s2 + $0x638] ss:$36 sps:$4 sm:$0xff]  }
  0x25   :  { %4953 = vmatpush1.bf16.msra.mxu1 %v8554_v36  ;;  %4698 = vmatprep.subr.bf16.mxu0 %v8558_v38  ;;  %v8645_v36 = vld [vmem:[%s12471_s2 + $0x678] ss:$36 sps:$4 sm:$0xff]   ;;  %v8653_v38 = vld [vmem:[%s12471_s2 + $0x6c4] ss:$36 sps:$4 sm:$0xff]  }
  0x26   :  { %4954 = vmatprep.subr.bf16.mxu1 %v8562_v39  ;;  %v8656_v39 = vld [vmem:[%s12471_s2 + $0x684] ss:$36 sps:$4 sm:$0xff]  }
  0x28   :  { %4699 = vmatpush1.bf16.msra.mxu0 %v8563_v40  ;;  %v8651_v40 = vld [vmem:[%s12471_s2 + $0x6c0] ss:$36 sps:$4 sm:$0xff]  }
  0x29   :  { %4955 = vmatpush1.bf16.msra.mxu1 %v8560_v41  ;;  %4700 = vmatprep.subr.bf16.mxu0 %v8564_v42  ;;  %v8654_v41 = vld [vmem:[%s12471_s2 + $0x680] ss:$36 sps:$4 sm:$0xff]   ;;  %v8659_v42 = vld [vmem:[%s12471_s2 + $0x70c] ss:$36 sps:$4 sm:$0xff]  }
  0x2a   :  { %4956 = vmatprep.subr.bf16.mxu1 %v8568_v43  ;;  %v8662_v43 = vld [vmem:[%s12471_s2 + $0x6cc] ss:$36 sps:$4 sm:$0xff]  }
  0x2c   :  { %4701 = vmatpush1.bf16.msra.mxu0 %v8569_v45  ;;  %v8660_v45 = vld [vmem:[%s12471_s2 + $0x6c8] ss:$36 sps:$4 sm:$0xff]  }
  0x2d   :  { %4957 = vmatpush1.bf16.msra.mxu1 %v8566_v44  ;;  %4702 = vmatprep.subr.bf16.mxu0 %v8570_v46  ;;  %v8657_v44 = vld [vmem:[%s12471_s2 + $0x708] ss:$36 sps:$4 sm:$0xff]   ;;  %v8665_v46 = vld [vmem:[%s12471_s2 + $0x754] ss:$36 sps:$4 sm:$0xff]  }
  0x2e   :  { %4958 = vmatprep.subr.bf16.mxu1 %v8574_v47  ;;  %v8668_v47 = vld [vmem:[%s12471_s2 + $0x714] ss:$36 sps:$4 sm:$0xff]  }
  0x30   :  { %4703 = vmatpush1.bf16.msra.mxu0 %v8575_v48  ;;  %v8663_v48 = vld [vmem:[%s12471_s2 + $0x750] ss:$36 sps:$4 sm:$0xff]  }
  0x31   :  { %4959 = vmatpush1.bf16.msra.mxu1 %v8572_v50  ;;  %4704 = vmatprep.subr.bf16.mxu0 %v8576_v51  ;;  %v8671_v50 = vld [vmem:[%s12471_s2 + $0x79c] ss:$36 sps:$4 sm:$0xff]  }
  0x32   :  { %4960 = vmatprep.subr.bf16.mxu1 %v8580_v52  ;;  %v8674_v51 = vld [vmem:[%s12471_s2 + $0x75c] ss:$36 sps:$4 sm:$0xff]  }
  0x33   :  { %v8669_v52 = vld [vmem:[%s12471_s2 + $0x798] ss:$36 sps:$4 sm:$0xff]  }
  0x34   :  { %4705 = vmatpush1.bf16.msra.mxu0 %v8581_v54  ;;  %v8677_v54 = vld [vmem:[%s12471_s2 + $0x7e4] ss:$36 sps:$4 sm:$0xff]  }
  0x35   :  { %4961 = vmatpush1.bf16.msra.mxu1 %v8578_v53  ;;  %4706 = vmatprep.subr.bf16.mxu0 %v8582_v55  ;;  %v8672_v53 = vld [vmem:[%s12471_s2 + $0x758] ss:$36 sps:$4 sm:$0xff]   ;;  %v8680_v55 = vld [vmem:[%s12471_s2 + $0x7a4] ss:$36 sps:$4 sm:$0xff]  }
  0x36   :  { %4962 = vmatprep.subr.bf16.mxu1 %v8586_v56  ;;  %v8675_v56 = vld [vmem:[%s12471_s2 + $0x7e0] ss:$36 sps:$4 sm:$0xff]  }
  0x38   :  { %4707 = vmatpush1.bf16.msra.mxu0 %v8587_v58  ;;  %v8683_v58 = vld [vmem:[%s12471_s2 + $0x82c] ss:$36 sps:$4 sm:$0xff]  }
  0x39   :  { %4963 = vmatpush1.bf16.msra.mxu1 %v8584_v57  ;;  %4708 = vmatprep.subr.bf16.mxu0 %v8588_v59  ;;  %v8678_v57 = vld [vmem:[%s12471_s2 + $0x7a0] ss:$36 sps:$4 sm:$0xff]   ;;  %v8686_v59 = vld [vmem:[%s12471_s2 + $0x7ec] ss:$36 sps:$4 sm:$0xff]  }
  0x3a   :  { %4964 = vmatprep.subr.bf16.mxu1 %v8592_v60  ;;  %v8681_v60 = vld [vmem:[%s12471_s2 + $0x828] ss:$36 sps:$4 sm:$0xff]  }
  0x3c   :  { %4709 = vmatpush1.bf16.msra.mxu0 %v8593_v62  ;;  %v8689_v62 = vld [vmem:[%s12471_s2 + $0x874] ss:$36 sps:$4 sm:$0xff]  }
  0x3d   :  { %4965 = vmatpush1.bf16.msra.mxu1 %v8590_v61  ;;  %4710 = vmatprep.subr.bf16.mxu0 %v8594_v63  ;;  %v8684_v61 = vld [vmem:[%s12471_s2 + $0x7e8] ss:$36 sps:$4 sm:$0xff]   ;;  %v8692_v63 = vld [vmem:[%s12471_s2 + $0x834] ss:$36 sps:$4 sm:$0xff]  }
  0x3e   :  { %4966 = vmatprep.subr.bf16.mxu1 %v8598_v0  ;;  %v8687_v0 = vld [vmem:[%s12471_s2 + $0x870] ss:$36 sps:$4 sm:$0xff]  }
  0x40   :  { %4711 = vmatpush1.bf16.msra.mxu0 %v8599_v3  ;;  %v8695_v3 = vld [vmem:[%s12471_s2 + $0x8bc] ss:$36 sps:$4 sm:$0xff]  }
  0x41   :  { %4967 = vmatpush1.bf16.msra.mxu1 %v8596_v2  ;;  %4723 = vmatprep.subr.bf16.mxu0 %v8604_v4  ;;  %v8690_v2 = vld [vmem:[%s12471_s2 + $0x830] ss:$36 sps:$4 sm:$0xff]   ;;  %v8698_v4 = vld [vmem:[%s12471_s2 + $0x87c] ss:$36 sps:$4 sm:$0xff]  }
  0x42   :  { %4968 = vmatprep.subr.bf16.mxu1 %v8607_v5  ;;  %v8693_v5 = vld [vmem:[%s12471_s2 + $0x8b8] ss:$36 sps:$4 sm:$0xff]  }
  0x43   :  { %4713 = vmatmul.mubr.bf16.vlgmr.msra.gmra.mrb[0].mxu0 %v8608_v6 }
  0x44   :  { %4724 = vmatpush1.bf16.msra.mxu0 %v8602_v7  ;;  %4755 = vmatprep.mubr.bf16.mxu0 %v8699_v32  ;;  %v8703_v7 = vld [vmem:[%s12471_s2 + $0x904] ss:$36 sps:$4 sm:$0xff]  }
  0x45   :  { %4969 = vmatpush1.bf16.msra.mxu1 %v8605_v8  ;;  %4725 = vmatprep.subr.bf16.mxu0 %v8611_v9  ;;  %v8706_v8 = vld [vmem:[%s12471_s2 + $0x8c4] ss:$36 sps:$4 sm:$0xff]  }
  0x46   :  { %4981 = vmatprep.subr.bf16.mxu1 %v8614_v10  ;;  %v8707_v9 = vld [vmem:[%s12472_s1 + $0x8] ss:$44 sps:$4 sm:$0xff]   ;;  %v8701_v10 = vld [vmem:[%s12471_s2 + $0x900] ss:$36 sps:$4 sm:$0xff]  }
  0x48   :  { %4726 = vmatpush1.bf16.msra.mxu0 %v8609_v11  ;;  %4971 = vmatmul.mubr.bf16.vlgmr.msra.gmra.mrb[4].mxu1 %v8608_v6  ;;  %v8696_v6 = vld [vmem:[%s12471_s2 + $0x878] ss:$36 sps:$4 sm:$0xff]   ;;  %v8704_v11 = vld [vmem:[%s12471_s2 + $0x8c0] ss:$36 sps:$4 sm:$0xff]  }
  0x49   :  { %4982 = vmatpush1.bf16.msra.mxu1 %v8612_v12  ;;  %4727 = vmatprep.subr.bf16.mxu0 %v8617_v13  ;;  %v8710_v12 = vld [vmem:[%s12471_s2 + $0x94c] ss:$36 sps:$4 sm:$0xff]  }
  0x4a   :  { %4983 = vmatprep.subr.bf16.mxu1 %v8620_v14  ;;  %5013 = vmatprep.mubr.bf16.mxu1 %v8699_v32  ;;  %v8713_v13 = vld [vmem:[%s12471_s2 + $0x90c] ss:$36 sps:$4 sm:$0xff]  }
  0x4b   :  { %v8708_v14 = vld [vmem:[%s12471_s2 + $0x948] ss:$36 sps:$4 sm:$0xff]  }
  0x4c   :  { %4728 = vmatpush1.bf16.msra.mxu0 %v8615_v15  ;;  %v8798_v15 = vld [vmem:[%s12472_s1 + $0x14] ss:$44 sps:$4 sm:$0xff]   ;;  %v8735_v32 = vld [vmem:[%s12471_s2 + $0xa28] ss:$36 sps:$4 sm:$0xff]  }
  0x4d   :  { %4984 = vmatpush1.bf16.msra.mxu1 %v8618_v16  ;;  %4729 = vmatprep.subr.bf16.mxu0 %v8623_v17  ;;  %v8711_v16 = vld [vmem:[%s12471_s2 + $0x908] ss:$36 sps:$4 sm:$0xff]   ;;  %v8716_v17 = vld [vmem:[%s12471_s2 + $0x994] ss:$36 sps:$4 sm:$0xff]  }
  0x4e   :  { %4985 = vmatprep.subr.bf16.mxu1 %v8626_v18  ;;  %v8719_v18 = vld [vmem:[%s12471_s2 + $0x954] ss:$36 sps:$4 sm:$0xff]  }
  0x50   :  { %4730 = vmatpush1.bf16.msra.mxu0 %v8621_v19  ;;  %v8714_v19 = vld [vmem:[%s12471_s2 + $0x990] ss:$36 sps:$4 sm:$0xff]  }
  0x51   :  { %4986 = vmatpush1.bf16.msra.mxu1 %v8624_v20  ;;  %4731 = vmatprep.subr.bf16.mxu0 %v8629_v21  ;;  %v8717_v20 = vld [vmem:[%s12471_s2 + $0x950] ss:$36 sps:$4 sm:$0xff]   ;;  %v8722_v21 = vld [vmem:[%s12471_s2 + $0x9dc] ss:$36 sps:$4 sm:$0xff]  }
  0x52   :  { %4987 = vmatprep.subr.bf16.mxu1 %v8632_v22  ;;  %v8725_v22 = vld [vmem:[%s12471_s2 + $0x99c] ss:$36 sps:$4 sm:$0xff]  }
  0x54   :  { %4732 = vmatpush1.bf16.msra.mxu0 %v8627_v23  ;;  %v8720_v23 = vld [vmem:[%s12471_s2 + $0x9d8] ss:$36 sps:$4 sm:$0xff]  }
  0x55   :  { %4988 = vmatpush1.bf16.msra.mxu1 %v8630_v24  ;;  %4733 = vmatprep.subr.bf16.mxu0 %v8635_v25  ;;  %v8723_v24 = vld [vmem:[%s12471_s2 + $0x998] ss:$36 sps:$4 sm:$0xff]   ;;  %v8728_v25 = vld [vmem:[%s12471_s2 + $0xa24] ss:$36 sps:$4 sm:$0xff]  }
  0x56   :  { %4989 = vmatprep.subr.bf16.mxu1 %v8638_v26  ;;  %v8731_v26 = vld [vmem:[%s12471_s2 + $0x9e4] ss:$36 sps:$4 sm:$0xff]  }
  0x58   :  { %4734 = vmatpush1.bf16.msra.mxu0 %v8633_v27  ;;  %v8726_v27 = vld [vmem:[%s12471_s2 + $0xa20] ss:$36 sps:$4 sm:$0xff]  }
  0x59   :  { %4990 = vmatpush1.bf16.msra.mxu1 %v8636_v28  ;;  %4735 = vmatprep.subr.bf16.mxu0 %v8641_v29  ;;  %v8729_v28 = vld [vmem:[%s12471_s2 + $0x9e0] ss:$36 sps:$4 sm:$0xff]   ;;  %v8734_v29 = vld [vmem:[%s12471_s2 + $0xa6c] ss:$36 sps:$4 sm:$0xff]  }
  0x5a   :  { %4991 = vmatprep.subr.bf16.mxu1 %v8644_v30  ;;  %v8737_v30 = vld [vmem:[%s12471_s2 + $0xa2c] ss:$36 sps:$4 sm:$0xff]  }
  0x5c   :  { %4736 = vmatpush1.bf16.msra.mxu0 %v8639_v31  ;;  %v8732_v31 = vld [vmem:[%s12471_s2 + $0xa68] ss:$36 sps:$4 sm:$0xff]  }
  0x5d   :  { %4992 = vmatpush1.bf16.msra.mxu1 %v8642_v33  ;;  %4737 = vmatprep.subr.bf16.mxu0 %v8647_v34  ;;  %v8740_v33 = vld [vmem:[%s12471_s2 + $0xab4] ss:$36 sps:$4 sm:$0xff]  }
  0x5e   :  { %4993 = vmatprep.subr.bf16.mxu1 %v8650_v35  ;;  %v8743_v34 = vld [vmem:[%s12471_s2 + $0xa74] ss:$36 sps:$4 sm:$0xff]  }
  0x5f   :  { %v8738_v35 = vld [vmem:[%s12471_s2 + $0xab0] ss:$36 sps:$4 sm:$0xff]  }
  0x60   :  { %4738 = vmatpush1.bf16.msra.mxu0 %v8645_v36  ;;  %v8741_v36 = vld [vmem:[%s12471_s2 + $0xa70] ss:$36 sps:$4 sm:$0xff]  }
  0x61   :  { %4994 = vmatpush1.bf16.msra.mxu1 %v8648_v37  ;;  %4739 = vmatprep.subr.bf16.mxu0 %v8653_v38  ;;  %v8746_v37 = vld [vmem:[%s12471_s2 + $0xafc] ss:$36 sps:$4 sm:$0xff]  }
  0x62   :  { %4995 = vmatprep.subr.bf16.mxu1 %v8656_v39  ;;  %v8749_v38 = vld [vmem:[%s12471_s2 + $0xabc] ss:$36 sps:$4 sm:$0xff]  }
  0x63   :  { %v8744_v39 = vld [vmem:[%s12471_s2 + $0xaf8] ss:$36 sps:$4 sm:$0xff]  }
  0x64   :  { %4740 = vmatpush1.bf16.msra.mxu0 %v8651_v40  ;;  %v8747_v40 = vld [vmem:[%s12471_s2 + $0xab8] ss:$36 sps:$4 sm:$0xff]  }
  0x65   :  { %4996 = vmatpush1.bf16.msra.mxu1 %v8654_v41  ;;  %4741 = vmatprep.subr.bf16.mxu0 %v8659_v42  ;;  %v8752_v41 = vld [vmem:[%s12471_s2 + $0xb44] ss:$36 sps:$4 sm:$0xff]  }
  0x66   :  { %4997 = vmatprep.subr.bf16.mxu1 %v8662_v43  ;;  %v8755_v42 = vld [vmem:[%s12471_s2 + $0xb04] ss:$36 sps:$4 sm:$0xff]  }
  0x67   :  { %v8750_v43 = vld [vmem:[%s12471_s2 + $0xb40] ss:$36 sps:$4 sm:$0xff]  }
  0x68   :  { %4742 = vmatpush1.bf16.msra.mxu0 %v8657_v44  ;;  %v8753_v44 = vld [vmem:[%s12471_s2 + $0xb00] ss:$36 sps:$4 sm:$0xff]  }
  0x69   :  { %4998 = vmatpush1.bf16.msra.mxu1 %v8660_v45  ;;  %4743 = vmatprep.subr.bf16.mxu0 %v8665_v46  ;;  %v8758_v45 = vld [vmem:[%s12471_s2 + $0xb8c] ss:$36 sps:$4 sm:$0xff]  }
  0x6a   :  { %4999 = vmatprep.subr.bf16.mxu1 %v8668_v47  ;;  %v8761_v46 = vld [vmem:[%s12471_s2 + $0xb4c] ss:$36 sps:$4 sm:$0xff]  }
  0x6b   :  { %v8756_v47 = vld [vmem:[%s12471_s2 + $0xb88] ss:$36 sps:$4 sm:$0xff]  }
  0x6c   :  { %4744 = vmatpush1.bf16.msra.mxu0 %v8663_v48  ;;  %v8759_v48 = vld [vmem:[%s12471_s2 + $0xb48] ss:$36 sps:$4 sm:$0xff]  }
  0x6d   :  { %5000 = vmatpush1.bf16.msra.mxu1 %v8666_v49  ;;  %4745 = vmatprep.subr.bf16.mxu0 %v8671_v50  ;;  %v8764_v49 = vld [vmem:[%s12471_s2 + $0xbd4] ss:$36 sps:$4 sm:$0xff]  }
  0x6e   :  { %5001 = vmatprep.subr.bf16.mxu1 %v8674_v51  ;;  %v8767_v50 = vld [vmem:[%s12471_s2 + $0xb94] ss:$36 sps:$4 sm:$0xff]  }
  0x6f   :  { %v8762_v51 = vld [vmem:[%s12471_s2 + $0xbd0] ss:$36 sps:$4 sm:$0xff]  }
  0x70   :  { %4746 = vmatpush1.bf16.msra.mxu0 %v8669_v52  ;;  %v8765_v52 = vld [vmem:[%s12471_s2 + $0xb90] ss:$36 sps:$4 sm:$0xff]  }
  0x71   :  { %5002 = vmatpush1.bf16.msra.mxu1 %v8672_v53  ;;  %4747 = vmatprep.subr.bf16.mxu0 %v8677_v54  ;;  %v8770_v53 = vld [vmem:[%s12471_s2 + $0xc1c] ss:$36 sps:$4 sm:$0xff]  }
  0x72   :  { %5003 = vmatprep.subr.bf16.mxu1 %v8680_v55  ;;  %v8773_v54 = vld [vmem:[%s12471_s2 + $0xbdc] ss:$36 sps:$4 sm:$0xff]  }
  0x73   :  { %v8768_v55 = vld [vmem:[%s12471_s2 + $0xc18] ss:$36 sps:$4 sm:$0xff]  }
  0x74   :  { %4748 = vmatpush1.bf16.msra.mxu0 %v8675_v56  ;;  %v8771_v56 = vld [vmem:[%s12471_s2 + $0xbd8] ss:$36 sps:$4 sm:$0xff]  }
  0x75   :  { %5004 = vmatpush1.bf16.msra.mxu1 %v8678_v57  ;;  %4749 = vmatprep.subr.bf16.mxu0 %v8683_v58  ;;  %v8776_v57 = vld [vmem:[%s12471_s2 + $0xc64] ss:$36 sps:$4 sm:$0xff]  }
  0x76   :  { %5005 = vmatprep.subr.bf16.mxu1 %v8686_v59  ;;  %v8779_v58 = vld [vmem:[%s12471_s2 + $0xc24] ss:$36 sps:$4 sm:$0xff]  }
  0x77   :  { %v8774_v59 = vld [vmem:[%s12471_s2 + $0xc60] ss:$36 sps:$4 sm:$0xff]  }
  0x78   :  { %4750 = vmatpush1.bf16.msra.mxu0 %v8681_v60  ;;  %v8777_v60 = vld [vmem:[%s12471_s2 + $0xc20] ss:$36 sps:$4 sm:$0xff]  }
  0x79   :  { %5006 = vmatpush1.bf16.msra.mxu1 %v8684_v61  ;;  %4751 = vmatprep.subr.bf16.mxu0 %v8689_v62  ;;  %v8782_v61 = vld [vmem:[%s12471_s2 + $0xcac] ss:$36 sps:$4 sm:$0xff]  }
  0x7a   :  { %5007 = vmatprep.subr.bf16.mxu1 %v8692_v63  ;;  %v8785_v62 = vld [vmem:[%s12471_s2 + $0xc6c] ss:$36 sps:$4 sm:$0xff]  }
  0x7b   :  { %v8780_v63 = vld [vmem:[%s12471_s2 + $0xca8] ss:$36 sps:$4 sm:$0xff]  }
  0x7c   :  { %4752 = vmatpush1.bf16.msra.mxu0 %v8687_v0  ;;  %v8783_v0 = vld [vmem:[%s12471_s2 + $0xc68] ss:$36 sps:$4 sm:$0xff]  }
  0x7d   :  { %5008 = vmatpush1.bf16.msra.mxu1 %v8690_v2  ;;  %4753 = vmatprep.subr.bf16.mxu0 %v8695_v3  ;;  %v8788_v2 = vld [vmem:[%s12471_s2 + $0xcf4] ss:$36 sps:$4 sm:$0xff]  }
  0x7e   :  { %5009 = vmatprep.subr.bf16.mxu1 %v8698_v4  ;;  %v8791_v3 = vld [vmem:[%s12471_s2 + $0xcb4] ss:$36 sps:$4 sm:$0xff]  }
  0x7f   :  { %v8786_v4 = vld [vmem:[%s12471_s2 + $0xcf0] ss:$36 sps:$4 sm:$0xff]  }
  0x80   :  { %4754 = vmatpush1.bf16.msra.mxu0 %v8693_v5  ;;  %v8789_v5 = vld [vmem:[%s12471_s2 + $0xcb0] ss:$36 sps:$4 sm:$0xff]  }
  0x81   :  { %5010 = vmatpush1.bf16.msra.mxu1 %v8696_v6  ;;  %4766 = vmatprep.subr.bf16.mxu0 %v8703_v7  ;;  %v8794_v6 = vld [vmem:[%s12471_s2 + $0xd3c] ss:$36 sps:$4 sm:$0xff]  }
  0x82   :  { %5011 = vmatprep.subr.bf16.mxu1 %v8706_v8  ;;  %v8797_v7 = vld [vmem:[%s12471_s2 + $0xcfc] ss:$36 sps:$4 sm:$0xff]  }
  0x83   :  { %4756 = vmatmul.mubr.bf16.vlgmr.msra.gmra.mrb[0].mxu0 %v8707_v9  ;;  %v8792_v8 = vld [vmem:[%s12471_s2 + $0xd38] ss:$36 sps:$4 sm:$0xff]  }
  0x84   :  { %4767 = vmatpush1.bf16.msra.mxu0 %v8701_v10  ;;  %4798 = vmatprep.mubr.bf16.mxu0 %v8798_v15  ;;  %v8802_v10 = vld [vmem:[%s12471_s2 + $0xd84] ss:$36 sps:$4 sm:$0xff]  }
  0x85   :  { %5012 = vmatpush1.bf16.msra.mxu1 %v8704_v11  ;;  %4768 = vmatprep.subr.bf16.mxu0 %v8710_v12  ;;  %v8805_v11 = vld [vmem:[%s12471_s2 + $0xd44] ss:$36 sps:$4 sm:$0xff]  }
  0x86   :  { %5024 = vmatprep.subr.bf16.mxu1 %v8713_v13  ;;  %v8800_v12 = vld [vmem:[%s12471_s2 + $0xd80] ss:$36 sps:$4 sm:$0xff]   ;;  %v8806_v13 = vld [vmem:[%s12472_s1 + $0x10] ss:$44 sps:$4 sm:$0xff]  }
  0x88   :  { %4769 = vmatpush1.bf16.msra.mxu0 %v8708_v14  ;;  %5014 = vmatmul.mubr.bf16.vlgmr.msra.gmra.mrb[4].mxu1 %v8707_v9  ;;  %v8795_v9 = vld [vmem:[%s12471_s2 + $0xcf8] ss:$36 sps:$4 sm:$0xff]   ;;  %v8803_v14 = vld [vmem:[%s12471_s2 + $0xd40] ss:$36 sps:$4 sm:$0xff]  }
  0x89   :  { %5025 = vmatpush1.bf16.msra.mxu1 %v8711_v16  ;;  %4770 = vmatprep.subr.bf16.mxu0 %v8716_v17  ;;  %v8809_v16 = vld [vmem:[%s12471_s2 + $0xdcc] ss:$36 sps:$4 sm:$0xff]  }
  0x8a   :  { %5026 = vmatprep.subr.bf16.mxu1 %v8719_v18  ;;  %5056 = vmatprep.mubr.bf16.mxu1 %v8798_v15  ;;  %v8897_v15 = vld [vmem:[%s12472_s1 + $0x1c] ss:$44 sps:$4 sm:$0xff]   ;;  %v8812_v17 = vld [vmem:[%s12471_s2 + $0xd8c] ss:$36 sps:$4 sm:$0xff]  }
  0x8b   :  { %v8807_v18 = vld [vmem:[%s12471_s2 + $0xdc8] ss:$36 sps:$4 sm:$0xff]  }
  0x8c   :  { %4771 = vmatpush1.bf16.msra.mxu0 %v8714_v19  ;;  %v8810_v19 = vld [vmem:[%s12471_s2 + $0xd88] ss:$36 sps:$4 sm:$0xff]  }
  0x8d   :  { %5027 = vmatpush1.bf16.msra.mxu1 %v8717_v20  ;;  %4772 = vmatprep.subr.bf16.mxu0 %v8722_v21  ;;  %v8815_v20 = vld [vmem:[%s12471_s2 + $0xe14] ss:$36 sps:$4 sm:$0xff]  }
  0x8e   :  { %5028 = vmatprep.subr.bf16.mxu1 %v8725_v22  ;;  %v8818_v21 = vld [vmem:[%s12471_s2 + $0xdd4] ss:$36 sps:$4 sm:$0xff]  }
  0x8f   :  { %v8813_v22 = vld [vmem:[%s12471_s2 + $0xe10] ss:$36 sps:$4 sm:$0xff]  }
  0x90   :  { %4773 = vmatpush1.bf16.msra.mxu0 %v8720_v23  ;;  %v8816_v23 = vld [vmem:[%s12471_s2 + $0xdd0] ss:$36 sps:$4 sm:$0xff]  }
  0x91   :  { %5029 = vmatpush1.bf16.msra.mxu1 %v8723_v24  ;;  %4774 = vmatprep.subr.bf16.mxu0 %v8728_v25  ;;  %v8821_v24 = vld [vmem:[%s12471_s2 + $0xe5c] ss:$36 sps:$4 sm:$0xff]  }
  0x92   :  { %5030 = vmatprep.subr.bf16.mxu1 %v8731_v26  ;;  %v8824_v25 = vld [vmem:[%s12471_s2 + $0xe1c] ss:$36 sps:$4 sm:$0xff]  }
  0x93   :  { %v8819_v26 = vld [vmem:[%s12471_s2 + $0xe58] ss:$36 sps:$4 sm:$0xff]  }
  0x94   :  { %4775 = vmatpush1.bf16.msra.mxu0 %v8726_v27  ;;  %v8822_v27 = vld [vmem:[%s12471_s2 + $0xe18] ss:$36 sps:$4 sm:$0xff]  }
  0x95   :  { %5031 = vmatpush1.bf16.msra.mxu1 %v8729_v28  ;;  %4776 = vmatprep.subr.bf16.mxu0 %v8734_v29  ;;  %v8827_v28 = vld [vmem:[%s12471_s2 + $0xea4] ss:$36 sps:$4 sm:$0xff]  }
  0x96   :  { %5032 = vmatprep.subr.bf16.mxu1 %v8737_v30  ;;  %v8830_v29 = vld [vmem:[%s12471_s2 + $0xe64] ss:$36 sps:$4 sm:$0xff]  }
  0x97   :  { %v8825_v30 = vld [vmem:[%s12471_s2 + $0xea0] ss:$36 sps:$4 sm:$0xff]  }
  0x98   :  { %4777 = vmatpush1.bf16.msra.mxu0 %v8732_v31  ;;  %v8828_v31 = vld [vmem:[%s12471_s2 + $0xe60] ss:$36 sps:$4 sm:$0xff]  }
  0x99   :  { %5033 = vmatpush1.bf16.msra.mxu1 %v8735_v32  ;;  %4778 = vmatprep.subr.bf16.mxu0 %v8740_v33  ;;  %v8833_v32 = vld [vmem:[%s12471_s2 + $0xeec] ss:$36 sps:$4 sm:$0xff]  }
  0x9a   :  { %5034 = vmatprep.subr.bf16.mxu1 %v8743_v34  ;;  %v8836_v33 = vld [vmem:[%s12471_s2 + $0xeac] ss:$36 sps:$4 sm:$0xff]  }
  0x9b   :  { %v8831_v34 = vld [vmem:[%s12471_s2 + $0xee8] ss:$36 sps:$4 sm:$0xff]  }
  0x9c   :  { %4779 = vmatpush1.bf16.msra.mxu0 %v8738_v35  ;;  %v8834_v35 = vld [vmem:[%s12471_s2 + $0xea8] ss:$36 sps:$4 sm:$0xff]  }
  0x9d   :  { %5035 = vmatpush1.bf16.msra.mxu1 %v8741_v36  ;;  %4780 = vmatprep.subr.bf16.mxu0 %v8746_v37  ;;  %v8839_v36 = vld [vmem:[%s12471_s2 + $0xf34] ss:$36 sps:$4 sm:$0xff]  }
  0x9e   :  { %5036 = vmatprep.subr.bf16.mxu1 %v8749_v38  ;;  %v8842_v37 = vld [vmem:[%s12471_s2 + $0xef4] ss:$36 sps:$4 sm:$0xff]  }
  0x9f   :  { %v8837_v38 = vld [vmem:[%s12471_s2 + $0xf30] ss:$36 sps:$4 sm:$0xff]  }
  0xa0   :  { %4781 = vmatpush1.bf16.msra.mxu0 %v8744_v39  ;;  %v8840_v39 = vld [vmem:[%s12471_s2 + $0xef0] ss:$36 sps:$4 sm:$0xff]  }
  0xa1   :  { %5037 = vmatpush1.bf16.msra.mxu1 %v8747_v40  ;;  %4782 = vmatprep.subr.bf16.mxu0 %v8752_v41  ;;  %v8845_v40 = vld [vmem:[%s12471_s2 + $0xf7c] ss:$36 sps:$4 sm:$0xff]  }
  0xa2   :  { %5038 = vmatprep.subr.bf16.mxu1 %v8755_v42  ;;  %v8848_v41 = vld [vmem:[%s12471_s2 + $0xf3c] ss:$36 sps:$4 sm:$0xff]  }
  0xa4   :  { %4783 = vmatpush1.bf16.msra.mxu0 %v8750_v43  ;;  %v8843_v43 = vld [vmem:[%s12471_s2 + $0xf78] ss:$36 sps:$4 sm:$0xff]  }
  0xa5   :  { %5039 = vmatpush1.bf16.msra.mxu1 %v8753_v44  ;;  %4784 = vmatprep.subr.bf16.mxu0 %v8758_v45  ;;  %v8846_v44 = vld [vmem:[%s12471_s2 + $0xf38] ss:$36 sps:$4 sm:$0xff]  }
  0xa6   :  { %5040 = vmatprep.subr.bf16.mxu1 %v8761_v46  ;;  %v8851_v46 = vld [vmem:[%s12471_s2 + $0xfc4] ss:$36 sps:$4 sm:$0xff]  }
  0xa8   :  { %4785 = vmatpush1.bf16.msra.mxu0 %v8756_v47 }
  0xa9   :  { %5041 = vmatpush1.bf16.msra.mxu1 %v8759_v48  ;;  %4786 = vmatprep.subr.bf16.mxu0 %v8764_v49  ;;  %v8854_v48 = vld [vmem:[%s12471_s2 + $0xf84] ss:$36 sps:$4 sm:$0xff]  }
  0xaa   :  { %5042 = vmatprep.subr.bf16.mxu1 %v8767_v50  ;;  %v8849_v50 = vld [vmem:[%s12471_s2 + $0xfc0] ss:$36 sps:$4 sm:$0xff]  }
  0xac   :  { %4787 = vmatpush1.bf16.msra.mxu0 %v8762_v51  ;;  %v8852_v51 = vld [vmem:[%s12471_s2 + $0xf80] ss:$36 sps:$4 sm:$0xff]  }
  0xad   :  { %5043 = vmatpush1.bf16.msra.mxu1 %v8765_v52  ;;  %4788 = vmatprep.subr.bf16.mxu0 %v8770_v53  ;;  %v8857_v52 = vld [vmem:[%s12471_s2 + $0x100c] ss:$36 sps:$4 sm:$0xff]  }
  0xae   :  { %5044 = vmatprep.subr.bf16.mxu1 %v8773_v54  ;;  %v8860_v53 = vld [vmem:[%s12471_s2 + $0xfcc] ss:$36 sps:$4 sm:$0xff]  }
  0xaf   :  { %v8855_v54 = vld [vmem:[%s12471_s2 + $0x1008] ss:$36 sps:$4 sm:$0xff]  }
  0xb0   :  { %4789 = vmatpush1.bf16.msra.mxu0 %v8768_v55  ;;  %v8858_v55 = vld [vmem:[%s12471_s2 + $0xfc8] ss:$36 sps:$4 sm:$0xff]  }
  0xb1   :  { %5045 = vmatpush1.bf16.msra.mxu1 %v8771_v56  ;;  %4790 = vmatprep.subr.bf16.mxu0 %v8776_v57  ;;  %v8863_v56 = vld [vmem:[%s12471_s2 + $0x1054] ss:$36 sps:$4 sm:$0xff]  }
  0xb2   :  { %5046 = vmatprep.subr.bf16.mxu1 %v8779_v58  ;;  %v8866_v57 = vld [vmem:[%s12471_s2 + $0x1014] ss:$36 sps:$4 sm:$0xff]  }
  0xb3   :  { %v8861_v58 = vld [vmem:[%s12471_s2 + $0x1050] ss:$36 sps:$4 sm:$0xff]  }
  0xb4   :  { %4791 = vmatpush1.bf16.msra.mxu0 %v8774_v59  ;;  %v8864_v59 = vld [vmem:[%s12471_s2 + $0x1010] ss:$36 sps:$4 sm:$0xff]  }
  0xb5   :  { %5047 = vmatpush1.bf16.msra.mxu1 %v8777_v60  ;;  %4792 = vmatprep.subr.bf16.mxu0 %v8782_v61  ;;  %v8869_v60 = vld [vmem:[%s12471_s2 + $0x109c] ss:$36 sps:$4 sm:$0xff]  }
  0xb6   :  { %5048 = vmatprep.subr.bf16.mxu1 %v8785_v62  ;;  %v8872_v61 = vld [vmem:[%s12471_s2 + $0x105c] ss:$36 sps:$4 sm:$0xff]  }
  0xb7   :  { %v8867_v62 = vld [vmem:[%s12471_s2 + $0x1098] ss:$36 sps:$4 sm:$0xff]  }
  0xb8   :  { %4793 = vmatpush1.bf16.msra.mxu0 %v8780_v63  ;;  %v8870_v63 = vld [vmem:[%s12471_s2 + $0x1058] ss:$36 sps:$4 sm:$0xff]  }
  0xb9   :  { %5049 = vmatpush1.bf16.msra.mxu1 %v8783_v0  ;;  %4794 = vmatprep.subr.bf16.mxu0 %v8788_v2  ;;  %v8875_v0 = vld [vmem:[%s12471_s2 + $0x10e4] ss:$36 sps:$4 sm:$0xff]  }
  0xba   :  { %5050 = vmatprep.subr.bf16.mxu1 %v8791_v3  ;;  %v8878_v2 = vld [vmem:[%s12471_s2 + $0x10a4] ss:$36 sps:$4 sm:$0xff]  }
  0xbb   :  { %v8873_v3 = vld [vmem:[%s12471_s2 + $0x10e0] ss:$36 sps:$4 sm:$0xff]  }
  0xbc   :  { %4795 = vmatpush1.bf16.msra.mxu0 %v8786_v4  ;;  %v8876_v4 = vld [vmem:[%s12471_s2 + $0x10a0] ss:$36 sps:$4 sm:$0xff]  }
  0xbd   :  { %5051 = vmatpush1.bf16.msra.mxu1 %v8789_v5  ;;  %4796 = vmatprep.subr.bf16.mxu0 %v8794_v6  ;;  %v8881_v5 = vld [vmem:[%s12471_s2 + $0x112c] ss:$36 sps:$4 sm:$0xff]  }
  0xbe   :  { %5052 = vmatprep.subr.bf16.mxu1 %v8797_v7  ;;  %v8884_v6 = vld [vmem:[%s12471_s2 + $0x10ec] ss:$36 sps:$4 sm:$0xff]  }
  0xbf   :  { %v8879_v7 = vld [vmem:[%s12471_s2 + $0x1128] ss:$36 sps:$4 sm:$0xff]  }
  0xc0   :  { %4797 = vmatpush1.bf16.msra.mxu0 %v8792_v8  ;;  %v8882_v8 = vld [vmem:[%s12471_s2 + $0x10e8] ss:$36 sps:$4 sm:$0xff]  }
  0xc1   :  { %5053 = vmatpush1.bf16.msra.mxu1 %v8795_v9  ;;  %4809 = vmatprep.subr.bf16.mxu0 %v8802_v10  ;;  %v8887_v9 = vld [vmem:[%s12471_s2 + $0x1174] ss:$36 sps:$4 sm:$0xff]  }
  0xc2   :  { %5054 = vmatprep.subr.bf16.mxu1 %v8805_v11  ;;  %v8890_v10 = vld [vmem:[%s12471_s2 + $0x1134] ss:$36 sps:$4 sm:$0xff]  }
  0xc3   :  { %4799 = vmatmul.mubr.bf16.vlgmr.msra.gmra.mrb[0].mxu0 %v8806_v13  ;;  %v8885_v11 = vld [vmem:[%s12471_s2 + $0x1170] ss:$36 sps:$4 sm:$0xff]  }
  0xc4   :  { %4810 = vmatpush1.bf16.msra.mxu0 %v8800_v12  ;;  %4841 = vmatprep.mubr.bf16.mxu0 %v8897_v15  ;;  %v8888_v12 = vld [vmem:[%s12471_s2 + $0x1130] ss:$36 sps:$4 sm:$0xff]  }
  0xc5   :  { %5055 = vmatpush1.bf16.msra.mxu1 %v8803_v14  ;;  %4811 = vmatprep.subr.bf16.mxu0 %v8809_v16  ;;  %v8896_v14 = vld [vmem:[%s12471_s2 + $0x117c] ss:$36 sps:$4 sm:$0xff]  }
  0xc6   :  { %5067 = vmatprep.subr.bf16.mxu1 %v8812_v17  ;;  %v8894_v16 = vld [vmem:[%s12471_s2 + $0x1178] ss:$36 sps:$4 sm:$0xff]   ;;  %v8901_v17 = vld [vmem:[%s12471_s2 + $0x1204] ss:$36 sps:$4 sm:$0xff]  }
  0xc8   :  { %4812 = vmatpush1.bf16.msra.mxu0 %v8807_v18  ;;  %5057 = vmatmul.mubr.bf16.vlgmr.msra.gmra.mrb[4].mxu1 %v8806_v13  ;;  %v8893_v13 = vld [vmem:[%s12471_s2 + $0x11bc] ss:$36 sps:$4 sm:$0xff]   ;;  %v8904_v18 = vld [vmem:[%s12471_s2 + $0x11c4] ss:$36 sps:$4 sm:$0xff]  }
  0xc9   :  { %5068 = vmatpush1.bf16.msra.mxu1 %v8810_v19  ;;  %4813 = vmatprep.subr.bf16.mxu0 %v8815_v20  ;;  %v8899_v19 = vld [vmem:[%s12471_s2 + $0x1200] ss:$36 sps:$4 sm:$0xff]  }
  0xca   :  { %5069 = vmatprep.subr.bf16.mxu1 %v8818_v21  ;;  %5099 = vmatprep.mubr.bf16.mxu1 %v8897_v15  ;;  %v8891_v15 = vld [vmem:[%s12471_s2 + $0x11b8] ss:$36 sps:$4 sm:$0xff]   ;;  %v8902_v21 = vld [vmem:[%s12471_s2 + $0x11c0] ss:$36 sps:$4 sm:$0xff]  }
  0xcb   :  { %v8905_v20 = vld [vmem:[%s12472_s1 + $0x18] ss:$44 sps:$4 sm:$0xff]  }
  0xcc   :  { %4814 = vmatpush1.bf16.msra.mxu0 %v8813_v22  ;;  %v8996_v22 = vld [vmem:[%s12472_s1 + $0x24] ss:$44 sps:$4 sm:$0xff]  }
  0xcd   :  { %5070 = vmatpush1.bf16.msra.mxu1 %v8816_v23  ;;  %4815 = vmatprep.subr.bf16.mxu0 %v8821_v24  ;;  %v8908_v23 = vld [vmem:[%s12471_s2 + $0x124c] ss:$36 sps:$4 sm:$0xff]  }
  0xce   :  { %5071 = vmatprep.subr.bf16.mxu1 %v8824_v25  ;;  %v8911_v24 = vld [vmem:[%s12471_s2 + $0x120c] ss:$36 sps:$4 sm:$0xff]  }
  0xcf   :  { %v8906_v25 = vld [vmem:[%s12471_s2 + $0x1248] ss:$36 sps:$4 sm:$0xff]  }
  0xd0   :  { %4816 = vmatpush1.bf16.msra.mxu0 %v8819_v26  ;;  %v8909_v26 = vld [vmem:[%s12471_s2 + $0x1208] ss:$36 sps:$4 sm:$0xff]  }
  0xd1   :  { %5072 = vmatpush1.bf16.msra.mxu1 %v8822_v27  ;;  %4817 = vmatprep.subr.bf16.mxu0 %v8827_v28  ;;  %v8914_v27 = vld [vmem:[%s12471_s2 + $0x1294] ss:$36 sps:$4 sm:$0xff]  }
  0xd2   :  { %5073 = vmatprep.subr.bf16.mxu1 %v8830_v29  ;;  %v8917_v28 = vld [vmem:[%s12471_s2 + $0x1254] ss:$36 sps:$4 sm:$0xff]  }
  0xd3   :  { %v8912_v29 = vld [vmem:[%s12471_s2 + $0x1290] ss:$36 sps:$4 sm:$0xff]  }
  0xd4   :  { %4818 = vmatpush1.bf16.msra.mxu0 %v8825_v30  ;;  %v8915_v30 = vld [vmem:[%s12471_s2 + $0x1250] ss:$36 sps:$4 sm:$0xff]  }
  0xd5   :  { %5074 = vmatpush1.bf16.msra.mxu1 %v8828_v31  ;;  %4819 = vmatprep.subr.bf16.mxu0 %v8833_v32  ;;  %v8920_v31 = vld [vmem:[%s12471_s2 + $0x12dc] ss:$36 sps:$4 sm:$0xff]  }
  0xd6   :  { %5075 = vmatprep.subr.bf16.mxu1 %v8836_v33  ;;  %v8923_v32 = vld [vmem:[%s12471_s2 + $0x129c] ss:$36 sps:$4 sm:$0xff]  }
  0xd7   :  { %v8918_v33 = vld [vmem:[%s12471_s2 + $0x12d8] ss:$36 sps:$4 sm:$0xff]  }
  0xd8   :  { %4820 = vmatpush1.bf16.msra.mxu0 %v8831_v34  ;;  %v8921_v34 = vld [vmem:[%s12471_s2 + $0x1298] ss:$36 sps:$4 sm:$0xff]  }
  0xd9   :  { %5076 = vmatpush1.bf16.msra.mxu1 %v8834_v35  ;;  %4821 = vmatprep.subr.bf16.mxu0 %v8839_v36  ;;  %v8926_v35 = vld [vmem:[%s12471_s2 + $0x1324] ss:$36 sps:$4 sm:$0xff]  }
  0xda   :  { %5077 = vmatprep.subr.bf16.mxu1 %v8842_v37  ;;  %v8929_v36 = vld [vmem:[%s12471_s2 + $0x12e4] ss:$36 sps:$4 sm:$0xff]  }
  0xdb   :  { %v10418_v42 = vpop.f32.mrb[0].mxu1  ;;  %v8924_v37 = vld [vmem:[%s12471_s2 + $0x1320] ss:$36 sps:$4 sm:$0xff]  }
  0xdc   :  { %4822 = vmatpush1.bf16.msra.mxu0 %v8837_v38  ;;  %v10426_v45 = vpop.f32.mrb[1].mxu1  ;;  %v8927_v38 = vld [vmem:[%s12471_s2 + $0x12e0] ss:$36 sps:$4 sm:$0xff]  }
  0xdd   :  { %5078 = vmatpush1.bf16.msra.mxu1 %v8840_v39  ;;  %4823 = vmatprep.subr.bf16.mxu0 %v8845_v40  ;;  %v10431_v47 = vpop.f32.mrb[2].mxu1  ;;  %v8932_v39 = vld [vmem:[%s12471_s2 + $0x136c] ss:$36 sps:$4 sm:$0xff]  }
  0xde   :  { %5079 = vmatprep.subr.bf16.mxu1 %v8848_v41  ;;  %v10436_v49 = vpop.f32.mrb[3].mxu1  ;;  %v8930_v40 = vld [vmem:[%s12471_s2 + $0x1368] ss:$36 sps:$4 sm:$0xff]  }
  0xdf   :  { %v8935_v41 = vld [vmem:[%s12471_s2 + $0x132c] ss:$36 sps:$4 sm:$0xff]  }
  0xe0   :  { %4824 = vmatpush1.bf16.msra.mxu0 %v8843_v43  ;;  %v8933_v43 = vld [vmem:[%s12471_s2 + $0x1328] ss:$36 sps:$4 sm:$0xff]  }
  0xe1   :  { %5080 = vmatpush1.bf16.msra.mxu1 %v8846_v44  ;;  %4825 = vmatprep.subr.bf16.mxu0 %v8851_v46  ;;  %v8938_v44 = vld [vmem:[%s12471_s2 + $0x13b4] ss:$36 sps:$4 sm:$0xff]  }
  0xe2   :  { %5081 = vmatprep.subr.bf16.mxu1 %v8854_v48  ;;  %v8936_v46 = vld [vmem:[%s12471_s2 + $0x13b0] ss:$36 sps:$4 sm:$0xff]  }
  0xe3   :  { %v8941_v48 = vld [vmem:[%s12471_s2 + $0x1374] ss:$36 sps:$4 sm:$0xff]  }
  0xe4   :  { %4826 = vmatpush1.bf16.msra.mxu0 %v8849_v50  ;;  %v8939_v50 = vld [vmem:[%s12471_s2 + $0x1370] ss:$36 sps:$4 sm:$0xff]  }
  0xe5   :  { %5082 = vmatpush1.bf16.msra.mxu1 %v8852_v51  ;;  %4827 = vmatprep.subr.bf16.mxu0 %v8857_v52  ;;  %v8944_v51 = vld [vmem:[%s12471_s2 + $0x13fc] ss:$36 sps:$4 sm:$0xff]  }
  0xe6   :  { %5083 = vmatprep.subr.bf16.mxu1 %v8860_v53  ;;  %v8942_v52 = vld [vmem:[%s12471_s2 + $0x13f8] ss:$36 sps:$4 sm:$0xff]  }
  0xe7   :  { %v8947_v53 = vld [vmem:[%s12471_s2 + $0x13bc] ss:$36 sps:$4 sm:$0xff]  }
  0xe8   :  { %4828 = vmatpush1.bf16.msra.mxu0 %v8855_v54  ;;  %v8945_v54 = vld [vmem:[%s12471_s2 + $0x13b8] ss:$36 sps:$4 sm:$0xff]  }
  0xe9   :  { %5084 = vmatpush1.bf16.msra.mxu1 %v8858_v55  ;;  %4829 = vmatprep.subr.bf16.mxu0 %v8863_v56  ;;  %v8950_v55 = vld [vmem:[%s12471_s2 + $0x1444] ss:$36 sps:$4 sm:$0xff]  }
  0xea   :  { %5085 = vmatprep.subr.bf16.mxu1 %v8866_v57  ;;  %v8948_v56 = vld [vmem:[%s12471_s2 + $0x1440] ss:$36 sps:$4 sm:$0xff]  }
  0xeb   :  { %v8953_v57 = vld [vmem:[%s12471_s2 + $0x1404] ss:$36 sps:$4 sm:$0xff]  }
  0xec   :  { %4830 = vmatpush1.bf16.msra.mxu0 %v8861_v58  ;;  %v8951_v58 = vld [vmem:[%s12471_s2 + $0x1400] ss:$36 sps:$4 sm:$0xff]  }
  0xed   :  { %5086 = vmatpush1.bf16.msra.mxu1 %v8864_v59  ;;  %4831 = vmatprep.subr.bf16.mxu0 %v8869_v60  ;;  %v8956_v59 = vld [vmem:[%s12471_s2 + $0x148c] ss:$36 sps:$4 sm:$0xff]  }
  0xee   :  { %5087 = vmatprep.subr.bf16.mxu1 %v8872_v61  ;;  %v8954_v60 = vld [vmem:[%s12471_s2 + $0x1488] ss:$36 sps:$4 sm:$0xff]  }
  0xef   :  { %v8959_v61 = vld [vmem:[%s12471_s2 + $0x144c] ss:$36 sps:$4 sm:$0xff]  }
  0xf0   :  { %4832 = vmatpush1.bf16.msra.mxu0 %v8867_v62  ;;  %v8957_v62 = vld [vmem:[%s12471_s2 + $0x1448] ss:$36 sps:$4 sm:$0xff]  }
  0xf1   :  { %5088 = vmatpush1.bf16.msra.mxu1 %v8870_v63  ;;  %4833 = vmatprep.subr.bf16.mxu0 %v8875_v0  ;;  %v8962_v63 = vld [vmem:[%s12471_s2 + $0x14d4] ss:$36 sps:$4 sm:$0xff]  }
  0xf2   :  { %5089 = vmatprep.subr.bf16.mxu1 %v8878_v2  ;;  %v8960_v0 = vld [vmem:[%s12471_s2 + $0x14d0] ss:$36 sps:$4 sm:$0xff]  }
  0xf3   :  { %v8965_v2 = vld [vmem:[%s12471_s2 + $0x1494] ss:$36 sps:$4 sm:$0xff]  }
  0xf4   :  { %4834 = vmatpush1.bf16.msra.mxu0 %v8873_v3  ;;  %v8963_v3 = vld [vmem:[%s12471_s2 + $0x1490] ss:$36 sps:$4 sm:$0xff]  }
  0xf5   :  { %5090 = vmatpush1.bf16.msra.mxu1 %v8876_v4  ;;  %4835 = vmatprep.subr.bf16.mxu0 %v8881_v5  ;;  %v8968_v4 = vld [vmem:[%s12471_s2 + $0x151c] ss:$36 sps:$4 sm:$0xff]  }
  0xf6   :  { %5091 = vmatprep.subr.bf16.mxu1 %v8884_v6  ;;  %v8966_v5 = vld [vmem:[%s12471_s2 + $0x1518] ss:$36 sps:$4 sm:$0xff]  }
  0xf7   :  { %v8971_v6 = vld [vmem:[%s12471_s2 + $0x14dc] ss:$36 sps:$4 sm:$0xff]  }
  0xf8   :  { %4836 = vmatpush1.bf16.msra.mxu0 %v8879_v7  ;;  %v8969_v7 = vld [vmem:[%s12471_s2 + $0x14d8] ss:$36 sps:$4 sm:$0xff]  }
  0xf9   :  { %5092 = vmatpush1.bf16.msra.mxu1 %v8882_v8  ;;  %4837 = vmatprep.subr.bf16.mxu0 %v8887_v9  ;;  %v8974_v8 = vld [vmem:[%s12471_s2 + $0x1564] ss:$36 sps:$4 sm:$0xff]  }
  0xfa   :  { %5093 = vmatprep.subr.bf16.mxu1 %v8890_v10  ;;  %v8972_v9 = vld [vmem:[%s12471_s2 + $0x1560] ss:$36 sps:$4 sm:$0xff]  }
  0xfb   :  { %v8977_v10 = vld [vmem:[%s12471_s2 + $0x1524] ss:$36 sps:$4 sm:$0xff]  }
  0xfc   :  { %4838 = vmatpush1.bf16.msra.mxu0 %v8885_v11  ;;  %v8975_v11 = vld [vmem:[%s12471_s2 + $0x1520] ss:$36 sps:$4 sm:$0xff]  }
  0xfd   :  { %5094 = vmatpush1.bf16.msra.mxu1 %v8888_v12  ;;  %4839 = vmatprep.subr.bf16.mxu0 %v8893_v13  ;;  %v8980_v12 = vld [vmem:[%s12471_s2 + $0x15ac] ss:$36 sps:$4 sm:$0xff]  }
  0xfe   :  { %5095 = vmatprep.subr.bf16.mxu1 %v8896_v14  ;;  %v8978_v13 = vld [vmem:[%s12471_s2 + $0x15a8] ss:$36 sps:$4 sm:$0xff]  }
  0xff   :  { %v8983_v14 = vld [vmem:[%s12471_s2 + $0x156c] ss:$36 sps:$4 sm:$0xff]  }
 0x100   :  { %4840 = vmatpush1.bf16.msra.mxu0 %v8891_v15  ;;  %v8981_v15 = vld [vmem:[%s12471_s2 + $0x1568] ss:$36 sps:$4 sm:$0xff]  }
 0x101   :  { %5096 = vmatpush1.bf16.msra.mxu1 %v8894_v16  ;;  %4852 = vmatprep.subr.bf16.mxu0 %v8901_v17  ;;  %v8986_v16 = vld [vmem:[%s12471_s2 + $0x15f4] ss:$36 sps:$4 sm:$0xff]  }
 0x102   :  { %5097 = vmatprep.subr.bf16.mxu1 %v8904_v18  ;;  %v8984_v17 = vld [vmem:[%s12471_s2 + $0x15f0] ss:$36 sps:$4 sm:$0xff]  }
 0x103   :  { %4842 = vmatmul.mubr.bf16.vlgmr.msra.gmra.mrb[0].mxu0 %v8905_v20  ;;  %v8989_v18 = vld [vmem:[%s12471_s2 + $0x15b4] ss:$36 sps:$4 sm:$0xff]  }
 0x104   :  { %4853 = vmatpush1.bf16.msra.mxu0 %v8899_v19  ;;  %4884 = vmatprep.mubr.bf16.mxu0 %v8996_v22  ;;  %v8987_v19 = vld [vmem:[%s12471_s2 + $0x15b0] ss:$36 sps:$4 sm:$0xff]  }
 0x105   :  { %5098 = vmatpush1.bf16.msra.mxu1 %v8902_v21  ;;  %4854 = vmatprep.subr.bf16.mxu0 %v8908_v23  ;;  %v8990_v21 = vld [vmem:[%s12471_s2 + $0x1638] ss:$36 sps:$4 sm:$0xff]  }
 0x106   :  { %5110 = vmatprep.subr.bf16.mxu1 %v8911_v24  ;;  %v8993_v23 = vld [vmem:[%s12471_s2 + $0x15f8] ss:$36 sps:$4 sm:$0xff]   ;;  %v8998_v24 = vld [vmem:[%s12472_s1 + $0x20] ss:$44 sps:$4 sm:$0xff]  }
 0x108   :  { %4855 = vmatpush1.bf16.msra.mxu0 %v8906_v25  ;;  %5100 = vmatmul.mubr.bf16.vlgmr.msra.gmra.mrb[4].mxu1 %v8905_v20  ;;  %v8992_v20 = vld [vmem:[%s12471_s2 + $0x163c] ss:$36 sps:$4 sm:$0xff]   ;;  %v9004_v25 = vld [vmem:[%s12471_s2 + $0x14] ss:$36 sps:$4 sm:$0xff]  }
 0x109   :  { %5111 = vmatpush1.bf16.msra.mxu1 %v8909_v26  ;;  %4856 = vmatprep.subr.bf16.mxu0 %v8914_v27  ;;  %v9001_v26 = vld [vmem:[%s12471_s2 + $0x1644] ss:$36 sps:$4 sm:$0xff]   ;;  %v9002_v27 = vld [vmem:[%s12471_s2 + $0x10] ss:$36 sps:$4 sm:$0xff]  }
 0x10a   :  { %5112 = vmatprep.subr.bf16.mxu1 %v8917_v28  ;;  %5142 = vmatprep.mubr.bf16.mxu1 %v8996_v22  ;;  %v8995_v22 = vld [vmem:[%s12471_s2 + $0x15fc] ss:$36 sps:$4 sm:$0xff]  }
 0x10b   :  { %v8999_v28 = vld [vmem:[%s12471_s2 + $0x1640] ss:$36 sps:$4 sm:$0xff]  }
 0x10c   :  { %4857 = vmatpush1.bf16.msra.mxu0 %v8912_v29  ;;  %v9007_v29 = vld [vmem:[%s12471_s2 + $0x5c] ss:$36 sps:$4 sm:$0xff]  }
 0x10d   :  { %5113 = vmatpush1.bf16.msra.mxu1 %v8915_v30  ;;  %4858 = vmatprep.subr.bf16.mxu0 %v8920_v31  ;;  %v9005_v30 = vld [vmem:[%s12471_s2 + $0x58] ss:$36 sps:$4 sm:$0xff]   ;;  %v9013_v31 = vld [vmem:[%s12471_s2 + $0x168c] ss:$36 sps:$4 sm:$0xff]  }
 0x10e   :  { %5114 = vmatprep.subr.bf16.mxu1 %v8923_v32  ;;  %v9668_v32 = vld [vmem:[%s12472_s1 + $0x4] ss:$44 sps:$4 sm:$0xff]  }
 0x110   :  { %4859 = vmatpush1.bf16.msra.mxu0 %v8918_v33  ;;  %v9010_v33 = vld [vmem:[%s12471_s2 + $0xa4] ss:$36 sps:$4 sm:$0xff]  }
 0x111   :  { %5115 = vmatpush1.bf16.msra.mxu1 %v8921_v34  ;;  %4860 = vmatprep.subr.bf16.mxu0 %v8926_v35  ;;  %v9011_v34 = vld [vmem:[%s12471_s2 + $0x1688] ss:$36 sps:$4 sm:$0xff]   ;;  %v9008_v35 = vld [vmem:[%s12471_s2 + $0xa0] ss:$36 sps:$4 sm:$0xff]  }
 0x112   :  { %5116 = vmatprep.subr.bf16.mxu1 %v8929_v36  ;;  %v9019_v36 = vld [vmem:[%s12471_s2 + $0x1c] ss:$36 sps:$4 sm:$0xff]  }
 0x114   :  { %4861 = vmatpush1.bf16.msra.mxu0 %v8924_v37  ;;  %v9016_v37 = vld [vmem:[%s12471_s2 + $0xec] ss:$36 sps:$4 sm:$0xff]  }
 0x115   :  { %5117 = vmatpush1.bf16.msra.mxu1 %v8927_v38  ;;  %4862 = vmatprep.subr.bf16.mxu0 %v8932_v39  ;;  %v9014_v38 = vld [vmem:[%s12471_s2 + $0xe8] ss:$36 sps:$4 sm:$0xff]   ;;  %v9022_v39 = vld [vmem:[%s12471_s2 + $0x134] ss:$36 sps:$4 sm:$0xff]  }
 0x116   :  { %5118 = vmatprep.subr.bf16.mxu1 %v8935_v41  ;;  %v9017_v41 = vld [vmem:[%s12471_s2 + $0x18] ss:$36 sps:$4 sm:$0xff]  }
 0x118   :  { %4863 = vmatpush1.bf16.msra.mxu0 %v8930_v40  ;;  %v9020_v40 = vld [vmem:[%s12471_s2 + $0x130] ss:$36 sps:$4 sm:$0xff]  }
 0x119   :  { %5119 = vmatpush1.bf16.msra.mxu1 %v8933_v43  ;;  %4864 = vmatprep.subr.bf16.mxu0 %v8938_v44  ;;  %v9028_v43 = vld [vmem:[%s12471_s2 + $0x17c] ss:$36 sps:$4 sm:$0xff]   ;;  %v9025_v44 = vld [vmem:[%s12471_s2 + $0x64] ss:$36 sps:$4 sm:$0xff]  }
 0x11a   :  { %5120 = vmatprep.subr.bf16.mxu1 %v8941_v48  ;;  %v9669_v48 = vld [vmem:[%s12472_s1 + $0x28] ss:$44 sps:$4 sm:$0xff]  }
 0x11c   :  { %4865 = vmatpush1.bf16.msra.mxu0 %v8936_v46  ;;  %v9026_v46 = vld [vmem:[%s12471_s2 + $0x178] ss:$36 sps:$4 sm:$0xff]  }
 0x11d   :  { %5121 = vmatpush1.bf16.msra.mxu1 %v8939_v50  ;;  %4866 = vmatprep.subr.bf16.mxu0 %v8944_v51  ;;  %v9023_v50 = vld [vmem:[%s12471_s2 + $0x60] ss:$36 sps:$4 sm:$0xff]  }
 0x11e   :  { %5122 = vmatprep.subr.bf16.mxu1 %v8947_v53  ;;  %v9034_v51 = vld [vmem:[%s12471_s2 + $0x1c4] ss:$36 sps:$4 sm:$0xff]  }
 0x11f   :  { %v9032_v53 = vld [vmem:[%s12471_s2 + $0x1c0] ss:$36 sps:$4 sm:$0xff]  }
 0x120   :  { %4867 = vmatpush1.bf16.msra.mxu0 %v8942_v52  ;;  %v9031_v52 = vld [vmem:[%s12471_s2 + $0xac] ss:$36 sps:$4 sm:$0xff]  }
 0x121   :  { %5123 = vmatpush1.bf16.msra.mxu1 %v8945_v54  ;;  %4868 = vmatprep.subr.bf16.mxu0 %v8950_v55  ;;  %v9029_v54 = vld [vmem:[%s12471_s2 + $0xa8] ss:$36 sps:$4 sm:$0xff]  }
 0x122   :  { %5124 = vmatprep.subr.bf16.mxu1 %v8953_v57  ;;  %v9040_v55 = vld [vmem:[%s12471_s2 + $0x20c] ss:$36 sps:$4 sm:$0xff]  }
 0x123   :  { %v9038_v57 = vld [vmem:[%s12471_s2 + $0x208] ss:$36 sps:$4 sm:$0xff]  }
 0x124   :  { %4869 = vmatpush1.bf16.msra.mxu0 %v8948_v56  ;;  %v9037_v56 = vld [vmem:[%s12471_s2 + $0xf4] ss:$36 sps:$4 sm:$0xff]  }
 0x125   :  { %5125 = vmatpush1.bf16.msra.mxu1 %v8951_v58  ;;  %4870 = vmatprep.subr.bf16.mxu0 %v8956_v59  ;;  %v9035_v58 = vld [vmem:[%s12471_s2 + $0xf0] ss:$36 sps:$4 sm:$0xff]  }
 0x126   :  { %5126 = vmatprep.subr.bf16.mxu1 %v8959_v61  ;;  %v9046_v59 = vld [vmem:[%s12471_s2 + $0x254] ss:$36 sps:$4 sm:$0xff]  }
 0x127   :  { %v9044_v61 = vld [vmem:[%s12471_s2 + $0x250] ss:$36 sps:$4 sm:$0xff]  }
 0x128   :  { %4871 = vmatpush1.bf16.msra.mxu0 %v8954_v60  ;;  %v9043_v60 = vld [vmem:[%s12471_s2 + $0x13c] ss:$36 sps:$4 sm:$0xff]  }
 0x129   :  { %5127 = vmatpush1.bf16.msra.mxu1 %v8957_v62  ;;  %4872 = vmatprep.subr.bf16.mxu0 %v8962_v63  ;;  %v9041_v62 = vld [vmem:[%s12471_s2 + $0x138] ss:$36 sps:$4 sm:$0xff]  }
 0x12a   :  { %5128 = vmatprep.subr.bf16.mxu1 %v8965_v2  ;;  %v9052_v63 = vld [vmem:[%s12471_s2 + $0x29c] ss:$36 sps:$4 sm:$0xff]  }
 0x12b   :  { %v9050_v2 = vld [vmem:[%s12471_s2 + $0x298] ss:$36 sps:$4 sm:$0xff]  }
 0x12c   :  { %4873 = vmatpush1.bf16.msra.mxu0 %v8960_v0  ;;  %v9049_v0 = vld [vmem:[%s12471_s2 + $0x184] ss:$36 sps:$4 sm:$0xff]  }
 0x12d   :  { %5129 = vmatpush1.bf16.msra.mxu1 %v8963_v3  ;;  %4874 = vmatprep.subr.bf16.mxu0 %v8968_v4  ;;  %v9047_v3 = vld [vmem:[%s12471_s2 + $0x180] ss:$36 sps:$4 sm:$0xff]  }
 0x12e   :  { %5130 = vmatprep.subr.bf16.mxu1 %v8971_v6  ;;  %v9058_v4 = vld [vmem:[%s12471_s2 + $0x2e4] ss:$36 sps:$4 sm:$0xff]  }
 0x12f   :  { %v9056_v6 = vld [vmem:[%s12471_s2 + $0x2e0] ss:$36 sps:$4 sm:$0xff]  }
 0x130   :  { %4875 = vmatpush1.bf16.msra.mxu0 %v8966_v5  ;;  %v9055_v5 = vld [vmem:[%s12471_s2 + $0x1cc] ss:$36 sps:$4 sm:$0xff]  }
 0x131   :  { %5131 = vmatpush1.bf16.msra.mxu1 %v8969_v7  ;;  %4876 = vmatprep.subr.bf16.mxu0 %v8974_v8  ;;  %v9053_v7 = vld [vmem:[%s12471_s2 + $0x1c8] ss:$36 sps:$4 sm:$0xff]  }
 0x132   :  { %5132 = vmatprep.subr.bf16.mxu1 %v8977_v10  ;;  %v9064_v8 = vld [vmem:[%s12471_s2 + $0x32c] ss:$36 sps:$4 sm:$0xff]  }
 0x133   :  { %v9062_v10 = vld [vmem:[%s12471_s2 + $0x328] ss:$36 sps:$4 sm:$0xff]  }
 0x134   :  { %4877 = vmatpush1.bf16.msra.mxu0 %v8972_v9  ;;  %v9061_v9 = vld [vmem:[%s12471_s2 + $0x214] ss:$36 sps:$4 sm:$0xff]  }
 0x135   :  { %5133 = vmatpush1.bf16.msra.mxu1 %v8975_v11  ;;  %4878 = vmatprep.subr.bf16.mxu0 %v8980_v12  ;;  %v9059_v11 = vld [vmem:[%s12471_s2 + $0x210] ss:$36 sps:$4 sm:$0xff]  }
 0x136   :  { %5134 = vmatprep.subr.bf16.mxu1 %v8983_v14  ;;  %v9070_v12 = vld [vmem:[%s12471_s2 + $0x374] ss:$36 sps:$4 sm:$0xff]  }
 0x137   :  { %v9068_v14 = vld [vmem:[%s12471_s2 + $0x370] ss:$36 sps:$4 sm:$0xff]  }
 0x138   :  { %4879 = vmatpush1.bf16.msra.mxu0 %v8978_v13  ;;  %v9067_v13 = vld [vmem:[%s12471_s2 + $0x25c] ss:$36 sps:$4 sm:$0xff]  }
 0x139   :  { %5135 = vmatpush1.bf16.msra.mxu1 %v8981_v15  ;;  %4880 = vmatprep.subr.bf16.mxu0 %v8986_v16  ;;  %v9065_v15 = vld [vmem:[%s12471_s2 + $0x258] ss:$36 sps:$4 sm:$0xff]  }
 0x13a   :  { %5136 = vmatprep.subr.bf16.mxu1 %v8989_v18  ;;  %v9076_v16 = vld [vmem:[%s12471_s2 + $0x3bc] ss:$36 sps:$4 sm:$0xff]  }
 0x13b   :  { %v9074_v18 = vld [vmem:[%s12471_s2 + $0x3b8] ss:$36 sps:$4 sm:$0xff]  }
 0x13c   :  { %4881 = vmatpush1.bf16.msra.mxu0 %v8984_v17  ;;  %v9073_v17 = vld [vmem:[%s12471_s2 + $0x2a4] ss:$36 sps:$4 sm:$0xff]  }
 0x13d   :  { %5137 = vmatpush1.bf16.msra.mxu1 %v8987_v19  ;;  %4882 = vmatprep.subr.bf16.mxu0 %v8992_v20  ;;  %v9071_v19 = vld [vmem:[%s12471_s2 + $0x2a0] ss:$36 sps:$4 sm:$0xff]  }
 0x13e   :  { %5138 = vmatprep.subr.bf16.mxu1 %v8995_v22  ;;  %v9082_v20 = vld [vmem:[%s12471_s2 + $0x404] ss:$36 sps:$4 sm:$0xff]  }
 0x13f   :  { %v9080_v22 = vld [vmem:[%s12471_s2 + $0x400] ss:$36 sps:$4 sm:$0xff]  }
 0x140   :  { %4883 = vmatpush1.bf16.msra.mxu0 %v8990_v21  ;;  %v9079_v21 = vld [vmem:[%s12471_s2 + $0x2ec] ss:$36 sps:$4 sm:$0xff]  }
 0x141   :  { %5139 = vmatpush1.bf16.msra.mxu1 %v8993_v23  ;;  %5196 = vmatprep.subr.bf16.mxu0 %v9004_v25  ;;  %v9077_v23 = vld [vmem:[%s12471_s2 + $0x2e8] ss:$36 sps:$4 sm:$0xff]   ;;  %v9085_v25 = vld [vmem:[%s12471_s2 + $0x334] ss:$36 sps:$4 sm:$0xff]  }
 0x142   :  { %5140 = vmatprep.subr.bf16.mxu1 %v9001_v26  ;;  %v9086_v26 = vld [vmem:[%s12471_s2 + $0x448] ss:$36 sps:$4 sm:$0xff]  }
 0x143   :  { %4885 = vmatmul.mubr.bf16.vlgmr.msra.gmra.mrb[0].mxu0 %v8998_v24 }
 0x144   :  { %5197 = vmatpush1.bf16.msra.mxu0 %v9002_v27  ;;  %5228 = vmatprep.mubr.bf16.mxu0 %v9668_v32  ;;  %v9083_v27 = vld [vmem:[%s12471_s2 + $0x330] ss:$36 sps:$4 sm:$0xff]  }
 0x145   :  { %5141 = vmatpush1.bf16.msra.mxu1 %v8999_v28  ;;  %5198 = vmatprep.subr.bf16.mxu0 %v9007_v29  ;;  %v9094_v28 = vld [vmem:[%s12471_s2 + $0x494] ss:$36 sps:$4 sm:$0xff]   ;;  %v9091_v29 = vld [vmem:[%s12471_s2 + $0x37c] ss:$36 sps:$4 sm:$0xff]  }
 0x146   :  { %5153 = vmatprep.subr.bf16.mxu1 %v9013_v31  ;;  %v9089_v31 = vld [vmem:[%s12471_s2 + $0x378] ss:$36 sps:$4 sm:$0xff]  }
 0x148   :  { %5143 = vmatmul.mubr.bf16.vlgmr.msra.gmra.mrb[4].mxu1 %v8998_v24  ;;  %5199 = vmatpush1.bf16.msra.mxu0 %v9005_v30  ;;  %v9088_v24 = vld [vmem:[%s12471_s2 + $0x44c] ss:$36 sps:$4 sm:$0xff]  }
 0x149   :  { %5200 = vmatprep.subr.bf16.mxu0 %v9010_v33  ;;  %5154 = vmatpush1.bf16.msra.mxu1 %v9011_v34  ;;  %v9092_v30 = vld [vmem:[%s12471_s2 + $0x490] ss:$36 sps:$4 sm:$0xff]   ;;  %v9097_v33 = vld [vmem:[%s12471_s2 + $0x3c4] ss:$36 sps:$4 sm:$0xff]   ;;  %v9098_v34 = vld [vmem:[%s12471_s2 + $0x4d8] ss:$36 sps:$4 sm:$0xff]  }
 0x14a   :  { %5185 = vmatprep.mubr.bf16.mxu1 %v9688_v1  ;;  %5454 = vmatprep.subr.bf16.mxu1 %v9019_v36  ;;  %v9671_v36 = vld [vmem:[%s12472_s1 + $0xc] ss:$44 sps:$4 sm:$0xff]  }
 0x14c   :  { %5201 = vmatpush1.bf16.msra.mxu0 %v9008_v35  ;;  %v9670_v35 = vld [vmem:[%s12472_s1] ss:$44 sps:$4 sm:$0xff]  }
 0x14d   :  { %5202 = vmatprep.subr.bf16.mxu0 %v9016_v37  ;;  %v9095_v37 = vld [vmem:[%s12471_s2 + $0x3c0] ss:$36 sps:$4 sm:$0xff]  }
 0x150   :  { %5203 = vmatpush1.bf16.msra.mxu0 %v9014_v38  ;;  %v9106_v38 = vld [vmem:[%s12471_s2 + $0x524] ss:$36 sps:$4 sm:$0xff]  }
 0x151   :  { %5204 = vmatprep.subr.bf16.mxu0 %v9022_v39  ;;  %v9103_v39 = vld [vmem:[%s12471_s2 + $0x40c] ss:$36 sps:$4 sm:$0xff]  }
 0x154   :  { %7980 = vmatmul.mubr.msk.bf16.vlgmr.msra.gmra.mrb[4].mxu1 %vm4676_vm0, %v9669_v48  ;;  %5205 = vmatpush1.bf16.msra.mxu0 %v9020_v40  ;;  %v9104_v40 = vld [vmem:[%s12471_s2 + $0x520] ss:$36 sps:$4 sm:$0xff]   ;;  %v9107_v48 = vld [vmem:[%s12471_s2 + $0x450] ss:$36 sps:$4 sm:$0xff]  }
 0x155   :  { %5455 = vmatpush1.bf16.msra.mxu1 %v9017_v41  ;;  %5206 = vmatprep.subr.bf16.mxu0 %v9028_v43  ;;  %v9101_v41 = vld [vmem:[%s12471_s2 + $0x408] ss:$36 sps:$4 sm:$0xff]  }
 0x156   :  { %5456 = vmatprep.subr.bf16.mxu1 %v9025_v44  ;;  %5486 = vmatprep.mubr.bf16.mxu1 %v9668_v32  ;;  %v9100_v32 = vld [vmem:[%s12471_s2 + $0x4dc] ss:$36 sps:$4 sm:$0xff]   ;;  %v9112_v43 = vld [vmem:[%s12471_s2 + $0x56c] ss:$36 sps:$4 sm:$0xff]   ;;  %v9109_v44 = vld [vmem:[%s12471_s2 + $0x454] ss:$36 sps:$4 sm:$0xff]  }
 0x158   :  { %5207 = vmatpush1.bf16.msra.mxu0 %v9026_v46  ;;  %v9110_v46 = vld [vmem:[%s12471_s2 + $0x568] ss:$36 sps:$4 sm:$0xff]  }
 0x159   :  { %5457 = vmatpush1.bf16.msra.mxu1 %v9023_v50  ;;  %5208 = vmatprep.subr.bf16.mxu0 %v9034_v51  ;;  %v9118_v50 = vld [vmem:[%s12471_s2 + $0x5b4] ss:$36 sps:$4 sm:$0xff]   ;;  %v9115_v51 = vld [vmem:[%s12471_s2 + $0x49c] ss:$36 sps:$4 sm:$0xff]  }
 0x15a   :  { %5458 = vmatprep.subr.bf16.mxu1 %v9031_v52  ;;  %v9116_v52 = vld [vmem:[%s12471_s2 + $0x5b0] ss:$36 sps:$4 sm:$0xff]  }
 0x15c   :  { %5209 = vmatpush1.bf16.msra.mxu0 %v9032_v53  ;;  %v9113_v53 = vld [vmem:[%s12471_s2 + $0x498] ss:$36 sps:$4 sm:$0xff]  }
 0x15d   :  { %5459 = vmatpush1.bf16.msra.mxu1 %v9029_v54  ;;  %5210 = vmatprep.subr.bf16.mxu0 %v9040_v55  ;;  %v9124_v54 = vld [vmem:[%s12471_s2 + $0x5fc] ss:$36 sps:$4 sm:$0xff]   ;;  %v9121_v55 = vld [vmem:[%s12471_s2 + $0x4e4] ss:$36 sps:$4 sm:$0xff]  }
 0x15e   :  { %5460 = vmatprep.subr.bf16.mxu1 %v9037_v56  ;;  %v9122_v56 = vld [vmem:[%s12471_s2 + $0x5f8] ss:$36 sps:$4 sm:$0xff]  }
 0x160   :  { %5211 = vmatpush1.bf16.msra.mxu0 %v9038_v57  ;;  %v9119_v57 = vld [vmem:[%s12471_s2 + $0x4e0] ss:$36 sps:$4 sm:$0xff]  }
 0x161   :  { %5461 = vmatpush1.bf16.msra.mxu1 %v9035_v58  ;;  %5212 = vmatprep.subr.bf16.mxu0 %v9046_v59  ;;  %v9130_v58 = vld [vmem:[%s12471_s2 + $0x644] ss:$36 sps:$4 sm:$0xff]   ;;  %v9127_v59 = vld [vmem:[%s12471_s2 + $0x52c] ss:$36 sps:$4 sm:$0xff]  }
 0x162   :  { %5462 = vmatprep.subr.bf16.mxu1 %v9043_v60  ;;  %v9125_v60 = vld [vmem:[%s12471_s2 + $0x528] ss:$36 sps:$4 sm:$0xff]  }
 0x164   :  { %5213 = vmatpush1.bf16.msra.mxu0 %v9044_v61  ;;  %v9128_v61 = vld [vmem:[%s12471_s2 + $0x640] ss:$36 sps:$4 sm:$0xff]  }
 0x165   :  { %5463 = vmatpush1.bf16.msra.mxu1 %v9041_v62  ;;  %5214 = vmatprep.subr.bf16.mxu0 %v9052_v63  ;;  %v9136_v62 = vld [vmem:[%s12471_s2 + $0x68c] ss:$36 sps:$4 sm:$0xff]   ;;  %v9133_v63 = vld [vmem:[%s12471_s2 + $0x574] ss:$36 sps:$4 sm:$0xff]  }
 0x166   :  { %5464 = vmatprep.subr.bf16.mxu1 %v9049_v0  ;;  %v9131_v0 = vld [vmem:[%s12471_s2 + $0x570] ss:$36 sps:$4 sm:$0xff]  }
 0x168   :  { %5215 = vmatpush1.bf16.msra.mxu0 %v9050_v2  ;;  %v9134_v2 = vld [vmem:[%s12471_s2 + $0x688] ss:$36 sps:$4 sm:$0xff]  }
 0x169   :  { %5465 = vmatpush1.bf16.msra.mxu1 %v9047_v3  ;;  %5216 = vmatprep.subr.bf16.mxu0 %v9058_v4  ;;  %v9142_v3 = vld [vmem:[%s12471_s2 + $0x6d4] ss:$36 sps:$4 sm:$0xff]   ;;  %v9139_v4 = vld [vmem:[%s12471_s2 + $0x5bc] ss:$36 sps:$4 sm:$0xff]  }
 0x16a   :  { %5466 = vmatprep.subr.bf16.mxu1 %v9055_v5  ;;  %v9140_v5 = vld [vmem:[%s12471_s2 + $0x6d0] ss:$36 sps:$4 sm:$0xff]  }
 0x16c   :  { %5217 = vmatpush1.bf16.msra.mxu0 %v9056_v6  ;;  %v9137_v6 = vld [vmem:[%s12471_s2 + $0x5b8] ss:$36 sps:$4 sm:$0xff]  }
 0x16d   :  { %5467 = vmatpush1.bf16.msra.mxu1 %v9053_v7  ;;  %5218 = vmatprep.subr.bf16.mxu0 %v9064_v8  ;;  %v9148_v7 = vld [vmem:[%s12471_s2 + $0x71c] ss:$36 sps:$4 sm:$0xff]   ;;  %v9145_v8 = vld [vmem:[%s12471_s2 + $0x604] ss:$36 sps:$4 sm:$0xff]  }
 0x16e   :  { %5468 = vmatprep.subr.bf16.mxu1 %v9061_v9  ;;  %v9146_v9 = vld [vmem:[%s12471_s2 + $0x718] ss:$36 sps:$4 sm:$0xff]  }
 0x170   :  { %5219 = vmatpush1.bf16.msra.mxu0 %v9062_v10  ;;  %v9143_v10 = vld [vmem:[%s12471_s2 + $0x600] ss:$36 sps:$4 sm:$0xff]  }
 0x171   :  { %5469 = vmatpush1.bf16.msra.mxu1 %v9059_v11  ;;  %5220 = vmatprep.subr.bf16.mxu0 %v9070_v12  ;;  %v9154_v11 = vld [vmem:[%s12471_s2 + $0x764] ss:$36 sps:$4 sm:$0xff]   ;;  %v9151_v12 = vld [vmem:[%s12471_s2 + $0x64c] ss:$36 sps:$4 sm:$0xff]  }
 0x172   :  { %5470 = vmatprep.subr.bf16.mxu1 %v9067_v13  ;;  %v9149_v13 = vld [vmem:[%s12471_s2 + $0x648] ss:$36 sps:$4 sm:$0xff]  }
 0x174   :  { %5221 = vmatpush1.bf16.msra.mxu0 %v9068_v14  ;;  %v9152_v14 = vld [vmem:[%s12471_s2 + $0x760] ss:$36 sps:$4 sm:$0xff]  }
 0x175   :  { %5471 = vmatpush1.bf16.msra.mxu1 %v9065_v15  ;;  %5222 = vmatprep.subr.bf16.mxu0 %v9076_v16  ;;  %v9160_v15 = vld [vmem:[%s12471_s2 + $0x7ac] ss:$36 sps:$4 sm:$0xff]   ;;  %v9157_v16 = vld [vmem:[%s12471_s2 + $0x694] ss:$36 sps:$4 sm:$0xff]  }
 0x176   :  { %5472 = vmatprep.subr.bf16.mxu1 %v9073_v17  ;;  %v9155_v17 = vld [vmem:[%s12471_s2 + $0x690] ss:$36 sps:$4 sm:$0xff]  }
 0x178   :  { %5223 = vmatpush1.bf16.msra.mxu0 %v9074_v18  ;;  %v9158_v18 = vld [vmem:[%s12471_s2 + $0x7a8] ss:$36 sps:$4 sm:$0xff]  }
 0x179   :  { %5473 = vmatpush1.bf16.msra.mxu1 %v9071_v19  ;;  %5224 = vmatprep.subr.bf16.mxu0 %v9082_v20  ;;  %v9166_v19 = vld [vmem:[%s12471_s2 + $0x7f4] ss:$36 sps:$4 sm:$0xff]   ;;  %v9163_v20 = vld [vmem:[%s12471_s2 + $0x6dc] ss:$36 sps:$4 sm:$0xff]  }
 0x17a   :  { %5474 = vmatprep.subr.bf16.mxu1 %v9079_v21  ;;  %v9164_v21 = vld [vmem:[%s12471_s2 + $0x7f0] ss:$36 sps:$4 sm:$0xff]  }
 0x17c   :  { %5225 = vmatpush1.bf16.msra.mxu0 %v9080_v22  ;;  %v9161_v22 = vld [vmem:[%s12471_s2 + $0x6d8] ss:$36 sps:$4 sm:$0xff]  }
 0x17d   :  { %5475 = vmatpush1.bf16.msra.mxu1 %v9077_v23  ;;  %5226 = vmatprep.subr.bf16.mxu0 %v9088_v24  ;;  %v9172_v23 = vld [vmem:[%s12471_s2 + $0x83c] ss:$36 sps:$4 sm:$0xff]   ;;  %v9169_v24 = vld [vmem:[%s12471_s2 + $0x724] ss:$36 sps:$4 sm:$0xff]  }
 0x17e   :  { %5476 = vmatprep.subr.bf16.mxu1 %v9085_v25  ;;  %v9170_v25 = vld [vmem:[%s12471_s2 + $0x838] ss:$36 sps:$4 sm:$0xff]  }
 0x180   :  { %5227 = vmatpush1.bf16.msra.mxu0 %v9086_v26  ;;  %v9167_v26 = vld [vmem:[%s12471_s2 + $0x720] ss:$36 sps:$4 sm:$0xff]  }
 0x181   :  { %5477 = vmatpush1.bf16.msra.mxu1 %v9083_v27  ;;  %5239 = vmatprep.subr.bf16.mxu0 %v9094_v28  ;;  %v9178_v27 = vld [vmem:[%s12471_s2 + $0x884] ss:$36 sps:$4 sm:$0xff]   ;;  %v9175_v28 = vld [vmem:[%s12471_s2 + $0x76c] ss:$36 sps:$4 sm:$0xff]  }
 0x182   :  { %5478 = vmatprep.subr.bf16.mxu1 %v9091_v29  ;;  %v9176_v29 = vld [vmem:[%s12471_s2 + $0x880] ss:$36 sps:$4 sm:$0xff]  }
 0x183   :  { %5229 = vmatmul.mubr.bf16.vlgmr.msra.gmra.mrb[4].mxu0 %v9670_v35 }
 0x184   :  { %5240 = vmatpush1.bf16.msra.mxu0 %v9092_v30  ;;  %5271 = vmatprep.mubr.bf16.mxu0 %v9671_v36  ;;  %v9173_v30 = vld [vmem:[%s12471_s2 + $0x768] ss:$36 sps:$4 sm:$0xff]  }
 0x185   :  { %5479 = vmatpush1.bf16.msra.mxu1 %v9089_v31  ;;  %5241 = vmatprep.subr.bf16.mxu0 %v9100_v32  ;;  %v9184_v31 = vld [vmem:[%s12471_s2 + $0x8cc] ss:$36 sps:$4 sm:$0xff]   ;;  %v9181_v32 = vld [vmem:[%s12471_s2 + $0x7b4] ss:$36 sps:$4 sm:$0xff]  }
 0x186   :  { %5480 = vmatprep.subr.bf16.mxu1 %v9097_v33  ;;  %v9182_v33 = vld [vmem:[%s12471_s2 + $0x8c8] ss:$36 sps:$4 sm:$0xff]  }
 0x188   :  { %5242 = vmatpush1.bf16.msra.mxu0 %v9098_v34  ;;  %v9179_v34 = vld [vmem:[%s12471_s2 + $0x7b0] ss:$36 sps:$4 sm:$0xff]  }
 0x189   :  { %5481 = vmatpush1.bf16.msra.mxu1 %v9095_v37  ;;  %5243 = vmatprep.subr.bf16.mxu0 %v9106_v38  ;;  %v9188_v37 = vld [vmem:[%s12471_s2 + $0x910] ss:$36 sps:$4 sm:$0xff]   ;;  %v9185_v38 = vld [vmem:[%s12471_s2 + $0x7f8] ss:$36 sps:$4 sm:$0xff]  }
 0x18a   :  { %5482 = vmatprep.subr.bf16.mxu1 %v9103_v39  ;;  %v9196_v39 = vld [vmem:[%s12471_s2 + $0x95c] ss:$36 sps:$4 sm:$0xff]  }
 0x18c   :  { %5244 = vmatpush1.bf16.msra.mxu0 %v9104_v40  ;;  %v9193_v40 = vld [vmem:[%s12471_s2 + $0x844] ss:$36 sps:$4 sm:$0xff]  }
 0x18d   :  { %5483 = vmatpush1.bf16.msra.mxu1 %v9101_v41  ;;  %5245 = vmatprep.subr.bf16.mxu0 %v9112_v43  ;;  %v9194_v41 = vld [vmem:[%s12471_s2 + $0x958] ss:$36 sps:$4 sm:$0xff]   ;;  %v9672_v43 = vld [vmem:[%s12472_s1 + $0x8] ss:$44 sps:$4 sm:$0xff]  }
 0x18e   :  { %5484 = vmatprep.subr.bf16.mxu1 %v9109_v44  ;;  %v9673_v44 = vld [vmem:[%s12472_s1 + $0x14] ss:$44 sps:$4 sm:$0xff]  }
 0x190   :  { %5246 = vmatpush1.bf16.msra.mxu0 %v9110_v46  ;;  %v9191_v46 = vld [vmem:[%s12471_s2 + $0x840] ss:$36 sps:$4 sm:$0xff]  }
 0x191   :  { %5485 = vmatpush1.bf16.msra.mxu1 %v9107_v48  ;;  %5247 = vmatprep.subr.bf16.mxu0 %v9118_v50  ;;  %v9202_v48 = vld [vmem:[%s12471_s2 + $0x9a4] ss:$36 sps:$4 sm:$0xff]   ;;  %v9199_v50 = vld [vmem:[%s12471_s2 + $0x88c] ss:$36 sps:$4 sm:$0xff]  }
 0x192   :  { %5497 = vmatprep.subr.bf16.mxu1 %v9115_v51  ;;  %v9200_v51 = vld [vmem:[%s12471_s2 + $0x9a0] ss:$36 sps:$4 sm:$0xff]  }
 0x194   :  { %5487 = vmatmul.mubr.bf16.vlgmr.msra.gmra.mrb[8].mxu1 %v9670_v35  ;;  %5248 = vmatpush1.bf16.msra.mxu0 %v9116_v52  ;;  %v9190_v35 = vld [vmem:[%s12471_s2 + $0x914] ss:$36 sps:$4 sm:$0xff]   ;;  %v9197_v52 = vld [vmem:[%s12471_s2 + $0x888] ss:$36 sps:$4 sm:$0xff]  }
 0x195   :  { %5498 = vmatpush1.bf16.msra.mxu1 %v9113_v53  ;;  %5249 = vmatprep.subr.bf16.mxu0 %v9124_v54  ;;  %v9208_v53 = vld [vmem:[%s12471_s2 + $0x9ec] ss:$36 sps:$4 sm:$0xff]   ;;  %v9205_v54 = vld [vmem:[%s12471_s2 + $0x8d4] ss:$36 sps:$4 sm:$0xff]  }
 0x196   :  { %5499 = vmatprep.subr.bf16.mxu1 %v9121_v55  ;;  %5529 = vmatprep.mubr.bf16.mxu1 %v9671_v36  ;;  %v9187_v36 = vld [vmem:[%s12471_s2 + $0x7fc] ss:$36 sps:$4 sm:$0xff]   ;;  %v9206_v55 = vld [vmem:[%s12471_s2 + $0x9e8] ss:$36 sps:$4 sm:$0xff]  }
 0x198   :  { %5250 = vmatpush1.bf16.msra.mxu0 %v9122_v56  ;;  %v9203_v56 = vld [vmem:[%s12471_s2 + $0x8d0] ss:$36 sps:$4 sm:$0xff]  }
 0x199   :  { %5500 = vmatpush1.bf16.msra.mxu1 %v9119_v57  ;;  %5251 = vmatprep.subr.bf16.mxu0 %v9130_v58  ;;  %v9214_v57 = vld [vmem:[%s12471_s2 + $0xa34] ss:$36 sps:$4 sm:$0xff]   ;;  %v9211_v58 = vld [vmem:[%s12471_s2 + $0x91c] ss:$36 sps:$4 sm:$0xff]  }
 0x19a   :  { %5501 = vmatprep.subr.bf16.mxu1 %v9127_v59  ;;  %v9212_v59 = vld [vmem:[%s12471_s2 + $0xa30] ss:$36 sps:$4 sm:$0xff]  }
 0x19c   :  { %5252 = vmatpush1.bf16.msra.mxu0 %v9128_v61  ;;  %v9220_v61 = vld [vmem:[%s12471_s2 + $0xa7c] ss:$36 sps:$4 sm:$0xff]  }
 0x19d   :  { %5502 = vmatpush1.bf16.msra.mxu1 %v9125_v60  ;;  %5253 = vmatprep.subr.bf16.mxu0 %v9136_v62  ;;  %v9209_v60 = vld [vmem:[%s12471_s2 + $0x918] ss:$36 sps:$4 sm:$0xff]   ;;  %v9217_v62 = vld [vmem:[%s12471_s2 + $0x964] ss:$36 sps:$4 sm:$0xff]  }
 0x19e   :  { %5503 = vmatprep.subr.bf16.mxu1 %v9133_v63  ;;  %v9218_v63 = vld [vmem:[%s12471_s2 + $0xa78] ss:$36 sps:$4 sm:$0xff]  }
 0x1a0   :  { %5254 = vmatpush1.bf16.msra.mxu0 %v9134_v2  ;;  %v9226_v2 = vld [vmem:[%s12471_s2 + $0xac4] ss:$36 sps:$4 sm:$0xff]  }
 0x1a1   :  { %5504 = vmatpush1.bf16.msra.mxu1 %v9131_v0  ;;  %5255 = vmatprep.subr.bf16.mxu0 %v9142_v3  ;;  %v9215_v0 = vld [vmem:[%s12471_s2 + $0x960] ss:$36 sps:$4 sm:$0xff]   ;;  %v9223_v3 = vld [vmem:[%s12471_s2 + $0x9ac] ss:$36 sps:$4 sm:$0xff]  }
 0x1a2   :  { %5505 = vmatprep.subr.bf16.mxu1 %v9139_v4  ;;  %v9224_v4 = vld [vmem:[%s12471_s2 + $0xac0] ss:$36 sps:$4 sm:$0xff]  }
 0x1a4   :  { %5256 = vmatpush1.bf16.msra.mxu0 %v9140_v5  ;;  %v9221_v5 = vld [vmem:[%s12471_s2 + $0x9a8] ss:$36 sps:$4 sm:$0xff]  }
 0x1a5   :  { %5506 = vmatpush1.bf16.msra.mxu1 %v9137_v6  ;;  %5257 = vmatprep.subr.bf16.mxu0 %v9148_v7  ;;  %v9232_v6 = vld [vmem:[%s12471_s2 + $0xb0c] ss:$36 sps:$4 sm:$0xff]   ;;  %v9229_v7 = vld [vmem:[%s12471_s2 + $0x9f4] ss:$36 sps:$4 sm:$0xff]  }
 0x1a6   :  { %5507 = vmatprep.subr.bf16.mxu1 %v9145_v8  ;;  %v9230_v8 = vld [vmem:[%s12471_s2 + $0xb08] ss:$36 sps:$4 sm:$0xff]  }
 0x1a8   :  { %5258 = vmatpush1.bf16.msra.mxu0 %v9146_v9  ;;  %v9227_v9 = vld [vmem:[%s12471_s2 + $0x9f0] ss:$36 sps:$4 sm:$0xff]  }
 0x1a9   :  { %5508 = vmatpush1.bf16.msra.mxu1 %v9143_v10  ;;  %5259 = vmatprep.subr.bf16.mxu0 %v9154_v11  ;;  %v9238_v10 = vld [vmem:[%s12471_s2 + $0xb54] ss:$36 sps:$4 sm:$0xff]   ;;  %v9235_v11 = vld [vmem:[%s12471_s2 + $0xa3c] ss:$36 sps:$4 sm:$0xff]  }
 0x1aa   :  { %5509 = vmatprep.subr.bf16.mxu1 %v9151_v12  ;;  %v9236_v12 = vld [vmem:[%s12471_s2 + $0xb50] ss:$36 sps:$4 sm:$0xff]  }
 0x1ac   :  { %5260 = vmatpush1.bf16.msra.mxu0 %v9152_v14  ;;  %v9244_v14 = vld [vmem:[%s12471_s2 + $0xb9c] ss:$36 sps:$4 sm:$0xff]  }
 0x1ad   :  { %5510 = vmatpush1.bf16.msra.mxu1 %v9149_v13  ;;  %5261 = vmatprep.subr.bf16.mxu0 %v9160_v15  ;;  %v9233_v13 = vld [vmem:[%s12471_s2 + $0xa38] ss:$36 sps:$4 sm:$0xff]   ;;  %v9241_v15 = vld [vmem:[%s12471_s2 + $0xa84] ss:$36 sps:$4 sm:$0xff]  }
 0x1ae   :  { %5511 = vmatprep.subr.bf16.mxu1 %v9157_v16  ;;  %v9242_v16 = vld [vmem:[%s12471_s2 + $0xb98] ss:$36 sps:$4 sm:$0xff]  }
 0x1b0   :  { %5262 = vmatpush1.bf16.msra.mxu0 %v9158_v18  ;;  %v9250_v18 = vld [vmem:[%s12471_s2 + $0xbe4] ss:$36 sps:$4 sm:$0xff]  }
 0x1b1   :  { %5512 = vmatpush1.bf16.msra.mxu1 %v9155_v17  ;;  %5263 = vmatprep.subr.bf16.mxu0 %v9166_v19  ;;  %v9239_v17 = vld [vmem:[%s12471_s2 + $0xa80] ss:$36 sps:$4 sm:$0xff]   ;;  %v9247_v19 = vld [vmem:[%s12471_s2 + $0xacc] ss:$36 sps:$4 sm:$0xff]  }
 0x1b2   :  { %5513 = vmatprep.subr.bf16.mxu1 %v9163_v20  ;;  %v9248_v20 = vld [vmem:[%s12471_s2 + $0xbe0] ss:$36 sps:$4 sm:$0xff]  }
 0x1b4   :  { %5264 = vmatpush1.bf16.msra.mxu0 %v9164_v21  ;;  %v9245_v21 = vld [vmem:[%s12471_s2 + $0xac8] ss:$36 sps:$4 sm:$0xff]  }
 0x1b5   :  { %5514 = vmatpush1.bf16.msra.mxu1 %v9161_v22  ;;  %5265 = vmatprep.subr.bf16.mxu0 %v9172_v23  ;;  %v9256_v22 = vld [vmem:[%s12471_s2 + $0xc2c] ss:$36 sps:$4 sm:$0xff]   ;;  %v9253_v23 = vld [vmem:[%s12471_s2 + $0xb14] ss:$36 sps:$4 sm:$0xff]  }
 0x1b6   :  { %5515 = vmatprep.subr.bf16.mxu1 %v9169_v24  ;;  %v9254_v24 = vld [vmem:[%s12471_s2 + $0xc28] ss:$36 sps:$4 sm:$0xff]  }
 0x1b8   :  { %5266 = vmatpush1.bf16.msra.mxu0 %v9170_v25  ;;  %v9251_v25 = vld [vmem:[%s12471_s2 + $0xb10] ss:$36 sps:$4 sm:$0xff]  }
 0x1b9   :  { %5516 = vmatpush1.bf16.msra.mxu1 %v9167_v26  ;;  %5267 = vmatprep.subr.bf16.mxu0 %v9178_v27  ;;  %v9262_v26 = vld [vmem:[%s12471_s2 + $0xc74] ss:$36 sps:$4 sm:$0xff]   ;;  %v9259_v27 = vld [vmem:[%s12471_s2 + $0xb5c] ss:$36 sps:$4 sm:$0xff]  }
 0x1ba   :  { %5517 = vmatprep.subr.bf16.mxu1 %v9175_v28  ;;  %v9260_v28 = vld [vmem:[%s12471_s2 + $0xc70] ss:$36 sps:$4 sm:$0xff]  }
 0x1bc   :  { %5268 = vmatpush1.bf16.msra.mxu0 %v9176_v29  ;;  %v9257_v29 = vld [vmem:[%s12471_s2 + $0xb58] ss:$36 sps:$4 sm:$0xff]  }
 0x1bd   :  { %5518 = vmatpush1.bf16.msra.mxu1 %v9173_v30  ;;  %5269 = vmatprep.subr.bf16.mxu0 %v9184_v31  ;;  %v9268_v30 = vld [vmem:[%s12471_s2 + $0xcbc] ss:$36 sps:$4 sm:$0xff]   ;;  %v9265_v31 = vld [vmem:[%s12471_s2 + $0xba4] ss:$36 sps:$4 sm:$0xff]  }
 0x1be   :  { %5519 = vmatprep.subr.bf16.mxu1 %v9181_v32  ;;  %v9266_v32 = vld [vmem:[%s12471_s2 + $0xcb8] ss:$36 sps:$4 sm:$0xff]  }
 0x1c0   :  { %5270 = vmatpush1.bf16.msra.mxu0 %v9182_v33  ;;  %v9263_v33 = vld [vmem:[%s12471_s2 + $0xba0] ss:$36 sps:$4 sm:$0xff]  }
 0x1c1   :  { %5520 = vmatpush1.bf16.msra.mxu1 %v9179_v34  ;;  %5282 = vmatprep.subr.bf16.mxu0 %v9190_v35  ;;  %v9274_v34 = vld [vmem:[%s12471_s2 + $0xd04] ss:$36 sps:$4 sm:$0xff]   ;;  %v9271_v35 = vld [vmem:[%s12471_s2 + $0xbec] ss:$36 sps:$4 sm:$0xff]  }
 0x1c2   :  { %5521 = vmatprep.subr.bf16.mxu1 %v9187_v36  ;;  %v9272_v36 = vld [vmem:[%s12471_s2 + $0xd00] ss:$36 sps:$4 sm:$0xff]  }
 0x1c3   :  { %5272 = vmatmul.mubr.bf16.vlgmr.msra.gmra.mrb[4].mxu0 %v9672_v43 }
 0x1c4   :  { %5283 = vmatpush1.bf16.msra.mxu0 %v9188_v37  ;;  %5314 = vmatprep.mubr.bf16.mxu0 %v9673_v44  ;;  %v9269_v37 = vld [vmem:[%s12471_s2 + $0xbe8] ss:$36 sps:$4 sm:$0xff]  }
 0x1c5   :  { %5522 = vmatpush1.bf16.msra.mxu1 %v9185_v38  ;;  %5284 = vmatprep.subr.bf16.mxu0 %v9196_v39  ;;  %v9280_v38 = vld [vmem:[%s12471_s2 + $0xd4c] ss:$36 sps:$4 sm:$0xff]   ;;  %v9277_v39 = vld [vmem:[%s12471_s2 + $0xc34] ss:$36 sps:$4 sm:$0xff]  }
 0x1c6   :  { %5523 = vmatprep.subr.bf16.mxu1 %v9193_v40  ;;  %v9278_v40 = vld [vmem:[%s12471_s2 + $0xd48] ss:$36 sps:$4 sm:$0xff]  }
 0x1c8   :  { %5285 = vmatpush1.bf16.msra.mxu0 %v9194_v41  ;;  %v9275_v41 = vld [vmem:[%s12471_s2 + $0xc30] ss:$36 sps:$4 sm:$0xff]  }
 0x1c9   :  { %5524 = vmatpush1.bf16.msra.mxu1 %v9191_v46  ;;  %5286 = vmatprep.subr.bf16.mxu0 %v9202_v48  ;;  %v9284_v46 = vld [vmem:[%s12471_s2 + $0xd90] ss:$36 sps:$4 sm:$0xff]   ;;  %v9281_v48 = vld [vmem:[%s12471_s2 + $0xc78] ss:$36 sps:$4 sm:$0xff]  }
 0x1ca   :  { %5525 = vmatprep.subr.bf16.mxu1 %v9199_v50  ;;  %v9292_v50 = vld [vmem:[%s12471_s2 + $0xddc] ss:$36 sps:$4 sm:$0xff]  }
 0x1cc   :  { %5287 = vmatpush1.bf16.msra.mxu0 %v9200_v51  ;;  %v9289_v51 = vld [vmem:[%s12471_s2 + $0xcc4] ss:$36 sps:$4 sm:$0xff]  }
 0x1cd   :  { %5526 = vmatpush1.bf16.msra.mxu1 %v9197_v52  ;;  %5288 = vmatprep.subr.bf16.mxu0 %v9208_v53  ;;  %v9674_v52 = vld [vmem:[%s12472_s1 + $0x10] ss:$44 sps:$4 sm:$0xff]  }
 0x1ce   :  { %5527 = vmatprep.subr.bf16.mxu1 %v9205_v54  ;;  %v9290_v53 = vld [vmem:[%s12471_s2 + $0xdd8] ss:$36 sps:$4 sm:$0xff]  }
 0x1cf   :  { %v9675_v54 = vld [vmem:[%s12472_s1 + $0x1c] ss:$44 sps:$4 sm:$0xff]  }
 0x1d0   :  { %5289 = vmatpush1.bf16.msra.mxu0 %v9206_v55  ;;  %v9287_v55 = vld [vmem:[%s12471_s2 + $0xcc0] ss:$36 sps:$4 sm:$0xff]  }
 0x1d1   :  { %5528 = vmatpush1.bf16.msra.mxu1 %v9203_v56  ;;  %5290 = vmatprep.subr.bf16.mxu0 %v9214_v57  ;;  %v9298_v56 = vld [vmem:[%s12471_s2 + $0xe24] ss:$36 sps:$4 sm:$0xff]   ;;  %v9295_v57 = vld [vmem:[%s12471_s2 + $0xd0c] ss:$36 sps:$4 sm:$0xff]  }
 0x1d2   :  { %5540 = vmatprep.subr.bf16.mxu1 %v9211_v58  ;;  %v850_v58 = vlaneseq }
 0x1d4   :  { %5530 = vmatmul.mubr.bf16.vlgmr.msra.gmra.mrb[8].mxu1 %v9672_v43  ;;  %5291 = vmatpush1.bf16.msra.mxu0 %v9212_v59  ;;  %v9286_v43 = vld [vmem:[%s12471_s2 + $0xd94] ss:$36 sps:$4 sm:$0xff]   ;;  %v9296_v59 = vld [vmem:[%s12471_s2 + $0xe20] ss:$36 sps:$4 sm:$0xff]  }
 0x1d5   :  { %5541 = vmatpush1.bf16.msra.mxu1 %v9209_v60  ;;  %5292 = vmatprep.subr.bf16.mxu0 %v9220_v61  ;;  %v9293_v60 = vld [vmem:[%s12471_s2 + $0xd08] ss:$36 sps:$4 sm:$0xff]  }
 0x1d6   :  { %5542 = vmatprep.subr.bf16.mxu1 %v9217_v62  ;;  %5572 = vmatprep.mubr.bf16.mxu1 %v9673_v44  ;;  %v9283_v44 = vld [vmem:[%s12471_s2 + $0xc7c] ss:$36 sps:$4 sm:$0xff]   ;;  %v9304_v61 = vld [vmem:[%s12471_s2 + $0xe6c] ss:$36 sps:$4 sm:$0xff]   ;;  %v9301_v62 = vld [vmem:[%s12471_s2 + $0xd54] ss:$36 sps:$4 sm:$0xff]  }
 0x1d8   :  { %5293 = vmatpush1.bf16.msra.mxu0 %v9218_v63  ;;  %v11362_v63 = vshrl.u32 %v850_v58, 7 }
 0x1d9   :  { %5543 = vmatpush1.bf16.msra.mxu1 %v9215_v0  ;;  %5294 = vmatprep.subr.bf16.mxu0 %v9226_v2  ;;  %v9302_v0 = vld [vmem:[%s12471_s2 + $0xe68] ss:$36 sps:$4 sm:$0xff]   ;;  %v9299_v2 = vld [vmem:[%s12471_s2 + $0xd50] ss:$36 sps:$4 sm:$0xff]  }
 0x1da   :  { %5544 = vmatprep.subr.bf16.mxu1 %v9223_v3  ;;  %v9310_v3 = vld [vmem:[%s12471_s2 + $0xeb4] ss:$36 sps:$4 sm:$0xff]  }
 0x1dc   :  { %5295 = vmatpush1.bf16.msra.mxu0 %v9224_v4  ;;  %v9307_v4 = vld [vmem:[%s12471_s2 + $0xd9c] ss:$36 sps:$4 sm:$0xff]  }
 0x1dd   :  { %5545 = vmatpush1.bf16.msra.mxu1 %v9221_v5  ;;  %5296 = vmatprep.subr.bf16.mxu0 %v9232_v6  ;;  %v852_v5 = vsub.s32 0, %v11362_v63  ;;  %v9308_v6 = vld [vmem:[%s12471_s2 + $0xeb0] ss:$36 sps:$4 sm:$0xff]  }
 0x1de   :  { %5546 = vmatprep.subr.bf16.mxu1 %v9229_v7  ;;  %v11383_v7 = vld [vmem:[%s12473_s5] sm:$0xff] }
 0x1e0   :  { %5297 = vmatpush1.bf16.msra.mxu0 %v9230_v8  ;;  %v856_v8 = vsub.s32 1, %v11362_v63 }
 0x1e1   :  { %5547 = vmatpush1.bf16.msra.mxu1 %v9227_v9  ;;  %5298 = vmatprep.subr.bf16.mxu0 %v9238_v10  ;;  %v9305_v9 = vld [vmem:[%s12471_s2 + $0xd98] ss:$36 sps:$4 sm:$0xff]  }
 0x1e2   :  { %5548 = vmatprep.subr.bf16.mxu1 %v9235_v11  ;;  %v9316_v10 = vld [vmem:[%s12471_s2 + $0xefc] ss:$36 sps:$4 sm:$0xff]   ;;  %v9313_v11 = vld [vmem:[%s12471_s2 + $0xde4] ss:$36 sps:$4 sm:$0xff]  }
 0x1e4   :  { %5299 = vmatpush1.bf16.msra.mxu0 %v9236_v12  ;;  %v853_v12 = vrot.slane %v11383_v7, %v852_v5  ;;  %v9349_v5 = vld [vmem:[%s12471_s2 + $0xf94] ss:$36 sps:$4 sm:$0xff]  }
 0x1e5   :  { %5549 = vmatpush1.bf16.msra.mxu1 %v9233_v13  ;;  %5300 = vmatprep.subr.bf16.mxu0 %v9244_v14  ;;  %v857_v13 = vrot.slane %v11383_v7, %v856_v8  ;;  %v9314_v14 = vld [vmem:[%s12471_s2 + $0xef8] ss:$36 sps:$4 sm:$0xff]  }
 0x1e6   :  { %5550 = vmatprep.subr.bf16.mxu1 %v9241_v15  ;;  %v9311_v15 = vld [vmem:[%s12471_s2 + $0xde0] ss:$36 sps:$4 sm:$0xff]  }
 0x1e8   :  { %5301 = vmatpush1.bf16.msra.mxu0 %v9242_v16  ;;  %v9322_v16 = vld [vmem:[%s12471_s2 + $0xf44] ss:$36 sps:$4 sm:$0xff]  }
 0x1e9   :  { %5551 = vmatpush1.bf16.msra.mxu1 %v9239_v17  ;;  %5302 = vmatprep.subr.bf16.mxu0 %v9250_v18  ;;  %v9319_v18 = vld [vmem:[%s12471_s2 + $0xe2c] ss:$36 sps:$4 sm:$0xff]  }
 0x1ea   :  { %5552 = vmatprep.subr.bf16.mxu1 %v9247_v19 }
 0x1ec   :  { %5303 = vmatpush1.bf16.msra.mxu0 %v9248_v20 }
 0x1ed   :  { %5553 = vmatpush1.bf16.msra.mxu1 %v9245_v21  ;;  %5304 = vmatprep.subr.bf16.mxu0 %v9256_v22 }
 0x1ee   :  { %5554 = vmatprep.subr.bf16.mxu1 %v9253_v23  ;;  %v9320_v23 = vld [vmem:[%s12471_s2 + $0xf40] ss:$36 sps:$4 sm:$0xff]  }
 0x1f0   :  { %5305 = vmatpush1.bf16.msra.mxu0 %v9254_v24 }
 0x1f1   :  { %5555 = vmatpush1.bf16.msra.mxu1 %v9251_v25  ;;  %5306 = vmatprep.subr.bf16.mxu0 %v9262_v26 }
 0x1f2   :  { %5556 = vmatprep.subr.bf16.mxu1 %v9259_v27  ;;  %v9317_v27 = vld [vmem:[%s12471_s2 + $0xe28] ss:$36 sps:$4 sm:$0xff]  }
 0x1f4   :  { %5307 = vmatpush1.bf16.msra.mxu0 %v9260_v28  ;;  %v9328_v28 = vld [vmem:[%s12471_s2 + $0xf8c] ss:$36 sps:$4 sm:$0xff]  }
 0x1f5   :  { %5557 = vmatpush1.bf16.msra.mxu1 %v9257_v29  ;;  %5308 = vmatprep.subr.bf16.mxu0 %v9268_v30 }
 0x1f6   :  { %5558 = vmatprep.subr.bf16.mxu1 %v9265_v31 }
 0x1f8   :  { %5309 = vmatpush1.bf16.msra.mxu0 %v9266_v32 }
 0x1f9   :  { %5559 = vmatpush1.bf16.msra.mxu1 %v9263_v33  ;;  %5310 = vmatprep.subr.bf16.mxu0 %v9274_v34  ;;  %v9326_v33 = vld [vmem:[%s12471_s2 + $0xf88] ss:$36 sps:$4 sm:$0xff]  }
 0x1fa   :  { %5560 = vmatprep.subr.bf16.mxu1 %v9271_v35 }
 0x1fc   :  { %5311 = vmatpush1.bf16.msra.mxu0 %v9272_v36  ;;  %v9334_v36 = vld [vmem:[%s12471_s2 + $0xfd4] ss:$36 sps:$4 sm:$0xff]  }
 0x1fd   :  { %5561 = vmatpush1.bf16.msra.mxu1 %v9269_v37  ;;  %5312 = vmatprep.subr.bf16.mxu0 %v9280_v38 }
 0x1fe   :  { %5562 = vmatprep.subr.bf16.mxu1 %v9277_v39  ;;  %v9332_v39 = vld [vmem:[%s12471_s2 + $0xfd0] ss:$36 sps:$4 sm:$0xff]  }
 0x200   :  { %5313 = vmatpush1.bf16.msra.mxu0 %v9278_v40  ;;  %v860_v40 = vsub.s32 2, %v11362_v63 }
 0x201   :  { %5563 = vmatpush1.bf16.msra.mxu1 %v9275_v41  ;;  %5325 = vmatprep.subr.bf16.mxu0 %v9286_v43  ;;  %v9329_v43 = vld [vmem:[%s12471_s2 + $0xeb8] ss:$36 sps:$4 sm:$0xff]  }
 0x202   :  { %5564 = vmatprep.subr.bf16.mxu1 %v9283_v44  ;;  %v864_v44 = vsub.s32 3, %v11362_v63 }
 0x203   :  { %5315 = vmatmul.mubr.bf16.vlgmr.msra.gmra.mrb[4].mxu0 %v9674_v52 }
 0x204   :  { %5326 = vmatpush1.bf16.msra.mxu0 %v9284_v46  ;;  %5357 = vmatprep.mubr.bf16.mxu0 %v9675_v54  ;;  %v9340_v46 = vld [vmem:[%s12471_s2 + $0x101c] ss:$36 sps:$4 sm:$0xff]  }
 0x205   :  { %5565 = vmatpush1.bf16.msra.mxu1 %v9281_v48  ;;  %5327 = vmatprep.subr.bf16.mxu0 %v9292_v50  ;;  %v9337_v48 = vld [vmem:[%s12471_s2 + $0xf04] ss:$36 sps:$4 sm:$0xff]   ;;  %v861_v50 = vrot.slane %v11383_v7, %v860_v40 }
 0x206   :  { %5566 = vmatprep.subr.bf16.mxu1 %v9289_v51  ;;  %v9338_v51 = vld [vmem:[%s12471_s2 + $0x1018] ss:$36 sps:$4 sm:$0xff]   ;;  %v9392_v40 = vld [vmem:[%s12471_s2 + $0x12a0] ss:$36 sps:$4 sm:$0xff]  }
 0x208   :  { %5328 = vmatpush1.bf16.msra.mxu0 %v9290_v53  ;;  %v865_v53 = vrot.slane %v11383_v7, %v864_v44  ;;  %v9400_v44 = vld [vmem:[%s12471_s2 + $0x12ec] ss:$36 sps:$4 sm:$0xff]  }
 0x209   :  { %5567 = vmatpush1.bf16.msra.mxu1 %v9287_v55  ;;  %5329 = vmatprep.subr.bf16.mxu0 %v9298_v56  ;;  %v9343_v55 = vld [vmem:[%s12471_s2 + $0xf4c] ss:$36 sps:$4 sm:$0xff]  }
 0x20a   :  { %5568 = vmatprep.subr.bf16.mxu1 %v9295_v57 }
 0x20c   :  { %5330 = vmatpush1.bf16.msra.mxu0 %v9296_v59 }
 0x20d   :  { %5569 = vmatpush1.bf16.msra.mxu1 %v9293_v60  ;;  %5331 = vmatprep.subr.bf16.mxu0 %v9304_v61  ;;  %v9344_v60 = vld [vmem:[%s12471_s2 + $0x1060] ss:$36 sps:$4 sm:$0xff]  }
 0x20e   :  { %5570 = vmatprep.subr.bf16.mxu1 %v9301_v62 }
 0x210   :  { %5332 = vmatpush1.bf16.msra.mxu0 %v9302_v0  ;;  %v9341_v0 = vld [vmem:[%s12471_s2 + $0xf48] ss:$36 sps:$4 sm:$0xff]  }
 0x211   :  { %5571 = vmatpush1.bf16.msra.mxu1 %v9299_v2  ;;  %5333 = vmatprep.subr.bf16.mxu0 %v9310_v3  ;;  %v9352_v2 = vld [vmem:[%s12471_s2 + $0x10ac] ss:$36 sps:$4 sm:$0xff]  }
 0x212   :  { %5583 = vmatprep.subr.bf16.mxu1 %v9307_v4 }
 0x214   :  { %5573 = vmatmul.mubr.bf16.vlgmr.msra.gmra.mrb[8].mxu1 %v9674_v52  ;;  %5334 = vmatpush1.bf16.msra.mxu0 %v9308_v6  ;;  %v9335_v52 = vld [vmem:[%s12471_s2 + $0xf00] ss:$36 sps:$4 sm:$0xff]  }
 0x215   :  { %5584 = vmatpush1.bf16.msra.mxu1 %v9305_v9  ;;  %5335 = vmatprep.subr.bf16.mxu0 %v9316_v10  ;;  %v9350_v9 = vld [vmem:[%s12471_s2 + $0x10a8] ss:$36 sps:$4 sm:$0xff]  }
 0x216   :  { %v4886_v17 = vpop.f32.mrb[0].mxu0  ;;  %5585 = vmatprep.subr.bf16.mxu1 %v9313_v11  ;;  %5615 = vmatprep.mubr.bf16.mxu1 %v9675_v54  ;;  %v9346_v54 = vld [vmem:[%s12471_s2 + $0x1064] ss:$36 sps:$4 sm:$0xff]  }
 0x217   :  { %v8404_v19 = vadd.f32 %v4886_v17, %v853_v12  ;;  %v4888_v20 = vpop.f32.mrb[1].mxu0  ;;  %v9356_v17 = vld [vmem:[%s12471_s2 + $0x10f0] ss:$36 sps:$4 sm:$0xff]  }
 0x218   :  { %v8406_v21 = vadd.f32 %v4888_v20, %v857_v13  ;;  %v4890_v22 = vpop.f32.mrb[2].mxu0  ;;  %5336 = vmatpush1.bf16.msra.mxu0 %v9314_v14  ;;  %v9361_v20 = vld [vmem:[%s12471_s2 + $0x1024] ss:$36 sps:$4 sm:$0xff]  }
 0x219   :  { %v8405_v24 = vadd.f32 %v8404_v19, %v10418_v42  ;;  %5586 = vmatpush1.bf16.msra.mxu1 %v9311_v15  ;;  %v8408_v25 = vadd.f32 %v4890_v22, %v853_v12  ;;  %v4892_v26 = vpop.f32.mrb[3].mxu0  ;;  %5337 = vmatprep.subr.bf16.mxu0 %v9322_v16  ;;  %v9325_v42 = vld [vmem:[%s12471_s2 + $0xe74] ss:$36 sps:$4 sm:$0xff]   ;;  %v9355_v15 = vld [vmem:[%s12471_s2 + $0xfdc] ss:$36 sps:$4 sm:$0xff]  }
 0x21a   :  { %v8407_v29 = vadd.f32 %v8406_v21, %v10426_v45  ;;  %v8410_v30 = vadd.f32 %v4892_v26, %v857_v13  ;;  %5587 = vmatprep.subr.bf16.mxu1 %v9319_v18  ;;  %v9323_v45 = vld [vmem:[%s12471_s2 + $0xe70] ss:$36 sps:$4 sm:$0xff]   ;;  %v9353_v18 = vld [vmem:[%s12471_s2 + $0xfd8] ss:$36 sps:$4 sm:$0xff]   ;;  %v9359_v22 = vld [vmem:[%s12471_s2 + $0x1020] ss:$36 sps:$4 sm:$0xff]  }
 0x21b   :  { %v8409_v31 = vadd.f32 %v8408_v25, %v10431_v47  ;;  %v5958_v34 = vmax.f32 %v8405_v24, 0.0  ;;  %v9347_v12 = vld [vmem:[%s12471_s2 + $0xf90] ss:$36 sps:$4 sm:$0xff]   ;;  %v9364_v19 = vld [vmem:[%s12471_s2 + $0x113c] ss:$36 sps:$4 sm:$0xff]  }
 0x21c   :  { %v8411_v32 = vadd.f32 %v8410_v30, %v10436_v49  ;;  %5338 = vmatpush1.bf16.msra.mxu0 %v9320_v23  ;;  %v5959_v47 = vmax.f32 %v8407_v29, 0.0  ;;  %v9331_v49 = vld [vmem:[%s12471_s2 + $0xebc] ss:$36 sps:$4 sm:$0xff]   ;;  %v9358_v13 = vld [vmem:[%s12471_s2 + $0x10f4] ss:$36 sps:$4 sm:$0xff]  }
 0x21d   :  { %v5967_v35 = vmax.f32 %v8409_v31, 0.0  ;;  %5588 = vmatpush1.bf16.msra.mxu1 %v9317_v27  ;;  %5339 = vmatprep.subr.bf16.mxu0 %v9328_v28  ;;  %v9362_v21 = vld [vmem:[%s12471_s2 + $0x1138] ss:$36 sps:$4 sm:$0xff]   ;;  %v9370_v23 = vld [vmem:[%s12471_s2 + $0x1184] ss:$36 sps:$4 sm:$0xff]  }
 0x21e   :  { %v5968_v37 = vmax.f32 %v8411_v32, 0.0  ;;  %5589 = vmatprep.subr.bf16.mxu1 %v9325_v42  ;;  %v9367_v24 = vld [vmem:[%s12471_s2 + $0x106c] ss:$36 sps:$4 sm:$0xff]   ;;  %v9368_v25 = vld [vmem:[%s12471_s2 + $0x1180] ss:$36 sps:$4 sm:$0xff]  }
 0x21f   :  { %v11437_v38 = vpack.c.bf16 %v5967_v35, %v5958_v34  ;;  %v9365_v26 = vld [vmem:[%s12471_s2 + $0x1068] ss:$36 sps:$4 sm:$0xff]   ;;  %v9373_v28 = vld [vmem:[%s12471_s2 + $0x10b4] ss:$36 sps:$4 sm:$0xff]   ;;  %v9379_v31 = vld [vmem:[%s12471_s2 + $0x10fc] ss:$36 sps:$4 sm:$0xff]  }
 0x220   :  { %5340 = vmatpush1.bf16.msra.mxu0 %v9326_v33  ;;  %v11443_v41 = vpack.c.bf16 %v5968_v37, %v5959_v47  ;;  %v9376_v27 = vld [vmem:[%s12471_s2 + $0x11cc] ss:$36 sps:$4 sm:$0xff]   ;;  %v9382_v42 = vld [vmem:[%s12471_s2 + $0x1214] ss:$36 sps:$4 sm:$0xff]   ;;  %v9388_v34 = vld [vmem:[%s12471_s2 + $0x125c] ss:$36 sps:$4 sm:$0xff]  }
 0x221   :  { %5590 = vmatpush1.bf16.msra.mxu1 %v9323_v45  ;;  %5341 = vmatprep.subr.bf16.mxu0 %v9334_v36  ;;  %v9374_v29 = vld [vmem:[%s12471_s2 + $0x11c8] ss:$36 sps:$4 sm:$0xff]   ;;  %v9371_v30 = vld [vmem:[%s12471_s2 + $0x10b0] ss:$36 sps:$4 sm:$0xff]   ;;  %v9377_v33 = vld [vmem:[%s12471_s2 + $0x10f8] ss:$36 sps:$4 sm:$0xff]  }
 0x222   :  { %5591 = vmatprep.subr.bf16.mxu1 %v9331_v49  ;;  %v9380_v32 = vld [vmem:[%s12471_s2 + $0x1210] ss:$36 sps:$4 sm:$0xff]   ;;  %v9385_v35 = vld [vmem:[%s12471_s2 + $0x1144] ss:$36 sps:$4 sm:$0xff]   ;;  %v9386_v36 = vld [vmem:[%s12471_s2 + $0x1258] ss:$36 sps:$4 sm:$0xff]  }
 0x223   :  { %v11560_v45 = vld [vmem:[%s12472_s1 + $0x18] ss:$44 sps:$4 sm:$0xff]  }
 0x224   :  { %5342 = vmatpush1.bf16.msra.mxu0 %v9332_v39  ;;  %v11569_v47 = vld [vmem:[%s12472_s1 + $0x24] ss:$44 sps:$4 sm:$0xff]  }
 0x225   :  { %5592 = vmatpush1.bf16.msra.mxu1 %v9329_v43  ;;  %5343 = vmatprep.subr.bf16.mxu0 %v9340_v46  ;;  %v9383_v37 = vld [vmem:[%s12471_s2 + $0x1140] ss:$36 sps:$4 sm:$0xff]   ;;  %v9391_v39 = vld [vmem:[%s12471_s2 + $0x118c] ss:$36 sps:$4 sm:$0xff]   ;;  %v9397_v46 = vld [vmem:[%s12471_s2 + $0x11d4] ss:$36 sps:$4 sm:$0xff]  }
 0x226   :  { %5593 = vmatprep.subr.bf16.mxu1 %v9337_v48  ;;  %v9394_v49 = vld [vmem:[%s12471_s2 + $0x12a4] ss:$36 sps:$4 sm:$0xff]  }
 0x227   :  { %v5187_v56 = vpop.f32.mrb[4].mxu1  ;;  %v9389_v43 = vld [vmem:[%s12471_s2 + $0x1188] ss:$36 sps:$4 sm:$0xff]  }
 0x228   :  { %v8412_v57 = vadd.f32 %v5187_v56, %v861_v50  ;;  %v5189_v59 = vpop.f32.mrb[5].mxu1  ;;  %5344 = vmatpush1.bf16.msra.mxu0 %v9338_v51  ;;  %v9398_v48 = vld [vmem:[%s12471_s2 + $0x12e8] ss:$36 sps:$4 sm:$0xff]   ;;  %v9406_v51 = vld [vmem:[%s12471_s2 + $0x1334] ss:$36 sps:$4 sm:$0xff]  }
 0x229   :  { %v8413_v61 = vadd.f32 %v5189_v59, %v865_v53  ;;  %5594 = vmatpush1.bf16.msra.mxu1 %v9335_v52  ;;  %v5191_v62 = vpop.f32.mrb[6].mxu1  ;;  %5345 = vmatprep.subr.bf16.mxu0 %v9346_v54  ;;  %v9403_v52 = vld [vmem:[%s12471_s2 + $0x121c] ss:$36 sps:$4 sm:$0xff]   ;;  %v9409_v56 = vld [vmem:[%s12471_s2 + $0x1264] ss:$36 sps:$4 sm:$0xff]  }
 0x22a   :  { %v8414_v3 = vadd.f32 %v5191_v62, %v861_v50  ;;  %v5193_v4 = vpop.f32.mrb[7].mxu1  ;;  %5595 = vmatprep.subr.bf16.mxu1 %v9343_v55  ;;  %v5960_v7 = vmax.f32 %v8412_v57, 0.0  ;;  %v9395_v50 = vld [vmem:[%s12471_s2 + $0x11d0] ss:$36 sps:$4 sm:$0xff]   ;;  %v9401_v54 = vld [vmem:[%s12471_s2 + $0x1218] ss:$36 sps:$4 sm:$0xff]  }
 0x22b   :  { %v8415_v6 = vadd.f32 %v5193_v4, %v865_v53  ;;  %v5961_v10 = vmax.f32 %v8413_v61, 0.0  ;;  %v9404_v53 = vld [vmem:[%s12471_s2 + $0x1330] ss:$36 sps:$4 sm:$0xff]   ;;  %v9412_v55 = vld [vmem:[%s12471_s2 + $0x137c] ss:$36 sps:$4 sm:$0xff]  }
 0x22c   :  { %v5969_v8 = vmax.f32 %v8414_v3, 0.0  ;;  %5346 = vmatpush1.bf16.msra.mxu0 %v9344_v60  ;;  %v9410_v57 = vld [vmem:[%s12471_s2 + $0x1378] ss:$36 sps:$4 sm:$0xff]   ;;  %v9407_v59 = vld [vmem:[%s12471_s2 + $0x1260] ss:$36 sps:$4 sm:$0xff]  }
 0x22d   :  { %v5970_v11 = vmax.f32 %v8415_v6, 0.0  ;;  %5596 = vmatpush1.bf16.msra.mxu1 %v9341_v0  ;;  %5347 = vmatprep.subr.bf16.mxu0 %v9352_v2  ;;  %v9418_v60 = vld [vmem:[%s12471_s2 + $0x13c4] ss:$36 sps:$4 sm:$0xff]   ;;  %v9415_v61 = vld [vmem:[%s12471_s2 + $0x12ac] ss:$36 sps:$4 sm:$0xff]  }
 0x22e   :  { %v11490_v14 = vpack.c.bf16 %v5969_v8, %v5960_v7  ;;  %5597 = vmatprep.subr.bf16.mxu1 %v9349_v5  ;;  %v9416_v62 = vld [vmem:[%s12471_s2 + $0x13c0] ss:$36 sps:$4 sm:$0xff]   ;;  %v9413_v0 = vld [vmem:[%s12471_s2 + $0x12a8] ss:$36 sps:$4 sm:$0xff]   ;;  %v9421_v3 = vld [vmem:[%s12471_s2 + $0x12f4] ss:$36 sps:$4 sm:$0xff]  }
 0x22f   :  { %v11495_v16 = vpack.c.bf16 %v5970_v11, %v5961_v10  ;;  %v9424_v2 = vld [vmem:[%s12471_s2 + $0x140c] ss:$36 sps:$4 sm:$0xff]   ;;  %v9430_v6 = vld [vmem:[%s12471_s2 + $0x1454] ss:$36 sps:$4 sm:$0xff]   ;;  %v9427_v7 = vld [vmem:[%s12471_s2 + $0x133c] ss:$36 sps:$4 sm:$0xff]  }
 0x230   :  { %5348 = vmatpush1.bf16.msra.mxu0 %v9350_v9  ;;  %v9422_v4 = vld [vmem:[%s12471_s2 + $0x1408] ss:$36 sps:$4 sm:$0xff]   ;;  %v9419_v5 = vld [vmem:[%s12471_s2 + $0x12f0] ss:$36 sps:$4 sm:$0xff]   ;;  %v9425_v9 = vld [vmem:[%s12471_s2 + $0x1338] ss:$36 sps:$4 sm:$0xff]  }
 0x231   :  { %5598 = vmatpush1.bf16.msra.mxu1 %v9347_v12  ;;  %5349 = vmatprep.subr.bf16.mxu0 %v9358_v13  ;;  %v9428_v8 = vld [vmem:[%s12471_s2 + $0x1450] ss:$36 sps:$4 sm:$0xff]   ;;  %v9436_v10 = vld [vmem:[%s12471_s2 + $0x149c] ss:$36 sps:$4 sm:$0xff]   ;;  %v9433_v11 = vld [vmem:[%s12471_s2 + $0x1384] ss:$36 sps:$4 sm:$0xff]  }
 0x232   :  { %5599 = vmatprep.subr.bf16.mxu1 %v9355_v15  ;;  %v9431_v12 = vld [vmem:[%s12471_s2 + $0x1380] ss:$36 sps:$4 sm:$0xff]   ;;  %v9434_v13 = vld [vmem:[%s12471_s2 + $0x1498] ss:$36 sps:$4 sm:$0xff]  }
 0x233   :  { %v9442_v15 = vld [vmem:[%s12471_s2 + $0x14e4] ss:$36 sps:$4 sm:$0xff]  }
 0x234   :  { %5350 = vmatpush1.bf16.msra.mxu0 %v9356_v17  ;;  %v9439_v17 = vld [vmem:[%s12471_s2 + $0x13cc] ss:$36 sps:$4 sm:$0xff]  }
 0x235   :  { %5600 = vmatpush1.bf16.msra.mxu1 %v9353_v18  ;;  %5351 = vmatprep.subr.bf16.mxu0 %v9364_v19  ;;  %v9440_v18 = vld [vmem:[%s12471_s2 + $0x14e0] ss:$36 sps:$4 sm:$0xff]   ;;  %v9437_v19 = vld [vmem:[%s12471_s2 + $0x13c8] ss:$36 sps:$4 sm:$0xff]  }
 0x236   :  { %5601 = vmatprep.subr.bf16.mxu1 %v9361_v20  ;;  %v9448_v20 = vld [vmem:[%s12471_s2 + $0x152c] ss:$36 sps:$4 sm:$0xff]  }
 0x238   :  { %5352 = vmatpush1.bf16.msra.mxu0 %v9362_v21  ;;  %v9445_v21 = vld [vmem:[%s12471_s2 + $0x1414] ss:$36 sps:$4 sm:$0xff]  }
 0x239   :  { %5602 = vmatpush1.bf16.msra.mxu1 %v9359_v22  ;;  %5353 = vmatprep.subr.bf16.mxu0 %v9370_v23  ;;  %v9446_v22 = vld [vmem:[%s12471_s2 + $0x1528] ss:$36 sps:$4 sm:$0xff]   ;;  %v9443_v23 = vld [vmem:[%s12471_s2 + $0x1410] ss:$36 sps:$4 sm:$0xff]  }
 0x23a   :  { %5603 = vmatprep.subr.bf16.mxu1 %v9367_v24  ;;  %v9454_v24 = vld [vmem:[%s12471_s2 + $0x1574] ss:$36 sps:$4 sm:$0xff]  }
 0x23c   :  { %5354 = vmatpush1.bf16.msra.mxu0 %v9368_v25  ;;  %v9451_v25 = vld [vmem:[%s12471_s2 + $0x145c] ss:$36 sps:$4 sm:$0xff]  }
 0x23d   :  { %5604 = vmatpush1.bf16.msra.mxu1 %v9365_v26  ;;  %5355 = vmatprep.subr.bf16.mxu0 %v9376_v27  ;;  %v9452_v26 = vld [vmem:[%s12471_s2 + $0x1570] ss:$36 sps:$4 sm:$0xff]   ;;  %v9449_v27 = vld [vmem:[%s12471_s2 + $0x1458] ss:$36 sps:$4 sm:$0xff]  }
 0x23e   :  { %5605 = vmatprep.subr.bf16.mxu1 %v9373_v28  ;;  %v9460_v28 = vld [vmem:[%s12471_s2 + $0x15bc] ss:$36 sps:$4 sm:$0xff]  }
 0x240   :  { %5356 = vmatpush1.bf16.msra.mxu0 %v9374_v29  ;;  %v9457_v29 = vld [vmem:[%s12471_s2 + $0x14a4] ss:$36 sps:$4 sm:$0xff]  }
 0x241   :  { %5606 = vmatpush1.bf16.msra.mxu1 %v9371_v30  ;;  %5368 = vmatprep.subr.bf16.mxu0 %v9382_v42  ;;  %v9458_v30 = vld [vmem:[%s12471_s2 + $0x15b8] ss:$36 sps:$4 sm:$0xff]   ;;  %v9455_v42 = vld [vmem:[%s12471_s2 + $0x14a0] ss:$36 sps:$4 sm:$0xff]  }
 0x242   :  { %5607 = vmatprep.subr.bf16.mxu1 %v9379_v31  ;;  %v9466_v31 = vld [vmem:[%s12471_s2 + $0x1604] ss:$36 sps:$4 sm:$0xff]  }
 0x243   :  { %5358 = vmatmul.mubr.bf16.vlgmr.msra.gmra.mrb[4].mxu0 %v11560_v45 }
 0x244   :  { %5369 = vmatpush1.bf16.msra.mxu0 %v9380_v32  ;;  %5400 = vmatprep.mubr.bf16.mxu0 %v11569_v47  ;;  %v9463_v32 = vld [vmem:[%s12471_s2 + $0x14ec] ss:$36 sps:$4 sm:$0xff]  }
 0x245   :  { %5608 = vmatpush1.bf16.msra.mxu1 %v9377_v33  ;;  %5370 = vmatprep.subr.bf16.mxu0 %v9388_v34  ;;  %v9464_v33 = vld [vmem:[%s12471_s2 + $0x1600] ss:$36 sps:$4 sm:$0xff]   ;;  %v9461_v34 = vld [vmem:[%s12471_s2 + $0x14e8] ss:$36 sps:$4 sm:$0xff]  }
 0x246   :  { %5609 = vmatprep.subr.bf16.mxu1 %v9385_v35  ;;  %v9472_v35 = vld [vmem:[%s12471_s2 + $0x164c] ss:$36 sps:$4 sm:$0xff]  }
 0x248   :  { %5371 = vmatpush1.bf16.msra.mxu0 %v9386_v36  ;;  %v9469_v36 = vld [vmem:[%s12471_s2 + $0x1534] ss:$36 sps:$4 sm:$0xff]  }
 0x249   :  { %5610 = vmatpush1.bf16.msra.mxu1 %v9383_v37  ;;  %5372 = vmatprep.subr.bf16.mxu0 %v9394_v49  ;;  %v9470_v37 = vld [vmem:[%s12471_s2 + $0x1648] ss:$36 sps:$4 sm:$0xff]   ;;  %v9467_v49 = vld [vmem:[%s12471_s2 + $0x1530] ss:$36 sps:$4 sm:$0xff]  }
 0x24a   :  { %5611 = vmatprep.subr.bf16.mxu1 %v9391_v39  ;;  %v9478_v39 = vld [vmem:[%s12471_s2 + $0x1694] ss:$36 sps:$4 sm:$0xff]  }
 0x24c   :  { %5373 = vmatpush1.bf16.msra.mxu0 %v9392_v40  ;;  %v9475_v40 = vld [vmem:[%s12471_s2 + $0x157c] ss:$36 sps:$4 sm:$0xff]  }
 0x24d   :  { %5612 = vmatpush1.bf16.msra.mxu1 %v9389_v43  ;;  %5374 = vmatprep.subr.bf16.mxu0 %v9400_v44  ;;  %v9476_v43 = vld [vmem:[%s12471_s2 + $0x1690] ss:$36 sps:$4 sm:$0xff]   ;;  %v9473_v44 = vld [vmem:[%s12471_s2 + $0x1578] ss:$36 sps:$4 sm:$0xff]  }
 0x24e   :  { %5613 = vmatprep.subr.bf16.mxu1 %v9397_v46  ;;  %v9488_v46 = vld [vmem:[%s12471_s2 + $0x260] ss:$36 sps:$4 sm:$0xff]  }
 0x250   :  { %5375 = vmatpush1.bf16.msra.mxu0 %v9398_v48  ;;  %v9481_v48 = vld [vmem:[%s12471_s2 + $0x15c4] ss:$36 sps:$4 sm:$0xff]  }
 0x251   :  { %5614 = vmatpush1.bf16.msra.mxu1 %v9395_v50  ;;  %5376 = vmatprep.subr.bf16.mxu0 %v9406_v51  ;;  %v11766_v50 = vld [vmem:[%s12472_s1 + $0x20] ss:$44 sps:$4 sm:$0xff]  }
 0x252   :  { %5626 = vmatprep.subr.bf16.mxu1 %v9403_v52  ;;  %v9479_v51 = vld [vmem:[%s12471_s2 + $0x15c0] ss:$36 sps:$4 sm:$0xff]   ;;  %v9484_v52 = vld [vmem:[%s12471_s2 + $0x160c] ss:$36 sps:$4 sm:$0xff]  }
 0x254   :  { %5616 = vmatmul.mubr.bf16.vlgmr.msra.gmra.mrb[8].mxu1 %v11560_v45  ;;  %5377 = vmatpush1.bf16.msra.mxu0 %v9404_v53  ;;  %v9482_v53 = vld [vmem:[%s12471_s2 + $0x1608] ss:$36 sps:$4 sm:$0xff]  }
 0x255   :  { %5627 = vmatpush1.bf16.msra.mxu1 %v9401_v54  ;;  %5378 = vmatprep.subr.bf16.mxu0 %v9412_v55  ;;  %v9487_v54 = vld [vmem:[%s12471_s2 + $0x1654] ss:$36 sps:$4 sm:$0xff]   ;;  %v9489_v55 = vld [vmem:[%s12471_s2 + $0x20] ss:$36 sps:$4 sm:$0xff]  }
 0x256   :  { %5628 = vmatprep.subr.bf16.mxu1 %v9409_v56  ;;  %5658 = vmatprep.mubr.bf16.mxu1 %v11569_v47  ;;  %v9485_v56 = vld [vmem:[%s12471_s2 + $0x1650] ss:$36 sps:$4 sm:$0xff]  }
 0x258   :  { %5379 = vmatpush1.bf16.msra.mxu0 %v9410_v57  ;;  %v9490_v57 = vld [vmem:[%s12471_s2 + $0x2a8] ss:$36 sps:$4 sm:$0xff]  }
 0x259   :  { %5629 = vmatpush1.bf16.msra.mxu1 %v9407_v59  ;;  %5380 = vmatprep.subr.bf16.mxu0 %v9418_v60  ;;  %v9496_v59 = vld [vmem:[%s12471_s2 + $0x169c] ss:$36 sps:$4 sm:$0xff]   ;;  %v11797_v60 = vld [vmem:[%s12472_s1 + $0x28] ss:$44 sps:$4 sm:$0xff]  }
 0x25a   :  { %5630 = vmatprep.subr.bf16.mxu1 %v9415_v61  ;;  %v9491_v61 = vld [vmem:[%s12471_s2 + $0x68] ss:$36 sps:$4 sm:$0xff]  }
 0x25c   :  { %5381 = vmatpush1.bf16.msra.mxu0 %v9416_v62  ;;  %v9492_v62 = vld [vmem:[%s12471_s2 + $0x2f0] ss:$36 sps:$4 sm:$0xff]  }
 0x25d   :  { %5631 = vmatpush1.bf16.msra.mxu1 %v9413_v0  ;;  %5382 = vmatprep.subr.bf16.mxu0 %v9424_v2  ;;  %v9680_v0 = vld [vmem:[%s12472_s1 + $0x4] ss:$44 sps:$4 sm:$0xff]   ;;  %v9494_v2 = vld [vmem:[%s12471_s2 + $0x1698] ss:$36 sps:$4 sm:$0xff]  }
 0x25e   :  { %5632 = vmatprep.subr.bf16.mxu1 %v9421_v3  ;;  %v9493_v3 = vld [vmem:[%s12471_s2 + $0xb0] ss:$36 sps:$4 sm:$0xff]  }
 0x260   :  { %5383 = vmatpush1.bf16.msra.mxu0 %v9422_v4  ;;  %v9499_v4 = vld [vmem:[%s12471_s2 + $0x6e0] ss:$36 sps:$4 sm:$0xff]  }
 0x261   :  { %5633 = vmatpush1.bf16.msra.mxu1 %v9419_v5  ;;  %5384 = vmatprep.subr.bf16.mxu0 %v9430_v6  ;;  %v9497_v5 = vld [vmem:[%s12471_s2 + $0x338] ss:$36 sps:$4 sm:$0xff]  }
 0x262   :  { %5634 = vmatprep.subr.bf16.mxu1 %v9427_v7  ;;  %v9498_v6 = vld [vmem:[%s12471_s2 + $0xf8] ss:$36 sps:$4 sm:$0xff]   ;;  %v9500_v7 = vld [vmem:[%s12471_s2 + $0x380] ss:$36 sps:$4 sm:$0xff]  }
 0x264   :  { %5385 = vmatpush1.bf16.msra.mxu0 %v9428_v8  ;;  %v9502_v8 = vld [vmem:[%s12471_s2 + $0x140] ss:$36 sps:$4 sm:$0xff]  }
 0x265   :  { %5635 = vmatpush1.bf16.msra.mxu1 %v9425_v9  ;;  %5386 = vmatprep.subr.bf16.mxu0 %v9436_v10  ;;  %v9501_v9 = vld [vmem:[%s12471_s2 + $0x4a0] ss:$36 sps:$4 sm:$0xff]   ;;  %v9504_v10 = vld [vmem:[%s12471_s2 + $0x3c8] ss:$36 sps:$4 sm:$0xff]  }
 0x266   :  { %5636 = vmatprep.subr.bf16.mxu1 %v9433_v11  ;;  %v9506_v11 = vld [vmem:[%s12471_s2 + $0x188] ss:$36 sps:$4 sm:$0xff]  }
 0x268   :  { %5387 = vmatpush1.bf16.msra.mxu0 %v9434_v13  ;;  %v9508_v13 = vld [vmem:[%s12471_s2 + $0x410] ss:$36 sps:$4 sm:$0xff]  }
 0x269   :  { %5637 = vmatpush1.bf16.msra.mxu1 %v9431_v12  ;;  %5388 = vmatprep.subr.bf16.mxu0 %v9442_v15  ;;  %v9505_v12 = vld [vmem:[%s12471_s2 + $0x4e8] ss:$36 sps:$4 sm:$0xff]   ;;  %v9507_v15 = vld [vmem:[%s12471_s2 + $0x770] ss:$36 sps:$4 sm:$0xff]  }
 0x26a   :  { %5638 = vmatprep.subr.bf16.mxu1 %v9439_v17  ;;  %v9510_v17 = vld [vmem:[%s12471_s2 + $0x1d0] ss:$36 sps:$4 sm:$0xff]  }
 0x26c   :  { %5389 = vmatpush1.bf16.msra.mxu0 %v9440_v18  ;;  %v9681_v18 = vld [vmem:[%s12472_s1 + $0xc] ss:$44 sps:$4 sm:$0xff]  }
 0x26d   :  { %5639 = vmatpush1.bf16.msra.mxu1 %v9437_v19  ;;  %5390 = vmatprep.subr.bf16.mxu0 %v9448_v20  ;;  %v9509_v19 = vld [vmem:[%s12471_s2 + $0x530] ss:$36 sps:$4 sm:$0xff]   ;;  %v9512_v20 = vld [vmem:[%s12471_s2 + $0x458] ss:$36 sps:$4 sm:$0xff]  }
 0x26e   :  { %5640 = vmatprep.subr.bf16.mxu1 %v9445_v21  ;;  %v9511_v21 = vld [vmem:[%s12471_s2 + $0x7b8] ss:$36 sps:$4 sm:$0xff]  }
 0x270   :  { %5391 = vmatpush1.bf16.msra.mxu0 %v9446_v22  ;;  %v9514_v22 = vld [vmem:[%s12471_s2 + $0x218] ss:$36 sps:$4 sm:$0xff]  }
 0x271   :  { %5641 = vmatpush1.bf16.msra.mxu1 %v9443_v23  ;;  %5392 = vmatprep.subr.bf16.mxu0 %v9454_v24  ;;  %v9513_v23 = vld [vmem:[%s12471_s2 + $0x578] ss:$36 sps:$4 sm:$0xff]   ;;  %v9517_v24 = vld [vmem:[%s12471_s2 + $0xb60] ss:$36 sps:$4 sm:$0xff]  }
 0x272   :  { %5642 = vmatprep.subr.bf16.mxu1 %v9451_v25  ;;  %v9515_v25 = vld [vmem:[%s12471_s2 + $0x800] ss:$36 sps:$4 sm:$0xff]  }
 0x274   :  { %5393 = vmatpush1.bf16.msra.mxu0 %v9452_v26  ;;  %v9518_v26 = vld [vmem:[%s12471_s2 + $0x920] ss:$36 sps:$4 sm:$0xff]  }
 0x275   :  { %5643 = vmatpush1.bf16.msra.mxu1 %v9449_v27  ;;  %5394 = vmatprep.subr.bf16.mxu0 %v9460_v28  ;;  %v9516_v27 = vld [vmem:[%s12471_s2 + $0x5c0] ss:$36 sps:$4 sm:$0xff]   ;;  %v9521_v28 = vld [vmem:[%s12471_s2 + $0xba8] ss:$36 sps:$4 sm:$0xff]  }
 0x276   :  { %5644 = vmatprep.subr.bf16.mxu1 %v9457_v29  ;;  %v9519_v29 = vld [vmem:[%s12471_s2 + $0x848] ss:$36 sps:$4 sm:$0xff]  }
 0x278   :  { %5395 = vmatpush1.bf16.msra.mxu0 %v9458_v30  ;;  %v9682_v30 = vld [vmem:[%s12472_s1] ss:$44 sps:$4 sm:$0xff]  }
 0x279   :  { %5645 = vmatpush1.bf16.msra.mxu1 %v9455_v42  ;;  %5396 = vmatprep.subr.bf16.mxu0 %v9466_v31  ;;  %v9522_v42 = vld [vmem:[%s12471_s2 + $0x968] ss:$36 sps:$4 sm:$0xff]   ;;  %v9683_v31 = vld [vmem:[%s12472_s1 + $0x14] ss:$44 sps:$4 sm:$0xff]  }
 0x27a   :  { %5646 = vmatprep.subr.bf16.mxu1 %v9463_v32  ;;  %v9520_v32 = vld [vmem:[%s12471_s2 + $0x608] ss:$36 sps:$4 sm:$0xff]  }
 0x27c   :  { %5397 = vmatpush1.bf16.msra.mxu0 %v9464_v33  ;;  %v9525_v33 = vld [vmem:[%s12471_s2 + $0xbf0] ss:$36 sps:$4 sm:$0xff]  }
 0x27d   :  { %5647 = vmatpush1.bf16.msra.mxu1 %v9461_v34  ;;  %5398 = vmatprep.subr.bf16.mxu0 %v9472_v35  ;;  %v9523_v34 = vld [vmem:[%s12471_s2 + $0x890] ss:$36 sps:$4 sm:$0xff]  }
 0x27e   :  { %5648 = vmatprep.subr.bf16.mxu1 %v9469_v36  ;;  %v9526_v35 = vld [vmem:[%s12471_s2 + $0x9b0] ss:$36 sps:$4 sm:$0xff]  }
 0x27f   :  { %v9524_v36 = vld [vmem:[%s12471_s2 + $0x650] ss:$36 sps:$4 sm:$0xff]  }
 0x280   :  { %5399 = vmatpush1.bf16.msra.mxu0 %v9470_v37  ;;  %v9529_v37 = vld [vmem:[%s12471_s2 + $0xc38] ss:$36 sps:$4 sm:$0xff]  }
 0x281   :  { %5649 = vmatpush1.bf16.msra.mxu1 %v9467_v49  ;;  %5411 = vmatprep.subr.bf16.mxu0 %v9478_v39  ;;  %v9527_v49 = vld [vmem:[%s12471_s2 + $0x8d8] ss:$36 sps:$4 sm:$0xff]  }
 0x282   :  { %5650 = vmatprep.subr.bf16.mxu1 %v9475_v40  ;;  %v9530_v39 = vld [vmem:[%s12471_s2 + $0x9f8] ss:$36 sps:$4 sm:$0xff]  }
 0x283   :  { %5401 = vmatmul.mubr.bf16.vlgmr.msra.gmra.mrb[4].mxu0 %v11766_v50  ;;  %v9528_v40 = vld [vmem:[%s12471_s2 + $0x698] ss:$36 sps:$4 sm:$0xff]  }
 0x284   :  { %5412 = vmatpush1.bf16.msra.mxu0 %v9476_v43  ;;  %5443 = vmatprep.mubr.bf16.mxu0 %v9688_v1  ;;  %v9532_v43 = vld [vmem:[%s12471_s2 + $0xc80] ss:$36 sps:$4 sm:$0xff]  }
 0x285   :  { %5651 = vmatpush1.bf16.msra.mxu1 %v9473_v44  ;;  %8081 = vmatprep.subr.bf16.mxu0 %v9488_v46  ;;  %v9531_v44 = vld [vmem:[%s12471_s2 + $0xfe0] ss:$36 sps:$4 sm:$0xff]  }
 0x286   :  { %5652 = vmatprep.subr.bf16.mxu1 %v9481_v48  ;;  %v9534_v46 = vld [vmem:[%s12471_s2 + $0xa40] ss:$36 sps:$4 sm:$0xff]  }
 0x287   :  { %v9533_v48 = vld [vmem:[%s12471_s2 + $0xda0] ss:$36 sps:$4 sm:$0xff]  }
 0x289   :  { %5653 = vmatpush1.bf16.msra.mxu1 %v9479_v51  ;;  %v9536_v51 = vld [vmem:[%s12471_s2 + $0xcc8] ss:$36 sps:$4 sm:$0xff]  }
 0x28a   :  { %5654 = vmatprep.subr.bf16.mxu1 %v9484_v52  ;;  %v9535_v52 = vld [vmem:[%s12471_s2 + $0x1028] ss:$36 sps:$4 sm:$0xff]  }
 0x28d   :  { %5655 = vmatpush1.bf16.msra.mxu1 %v9482_v53  ;;  %v9684_v53 = vld [vmem:[%s12472_s1 + $0x8] ss:$44 sps:$4 sm:$0xff]  }
 0x28e   :  { %5656 = vmatprep.subr.bf16.mxu1 %v9487_v54  ;;  %v9538_v54 = vld [vmem:[%s12471_s2 + $0xa88] ss:$36 sps:$4 sm:$0xff]  }
 0x28f   :  { %7981 = vmatmul.mubr.msk.bf16.vlgmr.msra.gmra.mrb[4].mxu0 %vm4676_vm0, %v11797_v60 }
 0x290   :  { %8082 = vmatpush3.bf16.msra.mxu0 %v9489_v55  ;;  %5744 = vmatprep.mubr.bf16.mxu0 %v9680_v0  ;;  %v9537_v55 = vld [vmem:[%s12471_s2 + $0xde8] ss:$36 sps:$4 sm:$0xff]   ;;  %v9544_v0 = vld [vmem:[%s12471_s2 + $0xd58] ss:$36 sps:$4 sm:$0xff]  }
 0x291   :  { %5657 = vmatpush1.bf16.msra.mxu1 %v9485_v56  ;;  %8083 = vmatprep.subr.bf16.mxu0 %v9490_v57  ;;  %v9540_v56 = vld [vmem:[%s12471_s2 + $0xd10] ss:$36 sps:$4 sm:$0xff]  }
 0x292   :  { %5669 = vmatprep.subr.bf16.mxu1 %v9496_v59  ;;  %v9539_v57 = vld [vmem:[%s12471_s2 + $0x1070] ss:$36 sps:$4 sm:$0xff]   ;;  %v9685_v59 = vld [vmem:[%s12472_s1 + $0x1c] ss:$44 sps:$4 sm:$0xff]  }
 0x294   :  { %5659 = vmatmul.mubr.bf16.vlgmr.msra.gmra.mrb[8].mxu1 %v11766_v50  ;;  %8084 = vmatpush3.bf16.msra.mxu0 %v9491_v61  ;;  %v9542_v61 = vld [vmem:[%s12471_s2 + $0xad0] ss:$36 sps:$4 sm:$0xff]  }
 0x295   :  { %8085 = vmatprep.subr.bf16.mxu0 %v9492_v62  ;;  %5670 = vmatpush1.bf16.msra.mxu1 %v9494_v2  ;;  %v9541_v62 = vld [vmem:[%s12471_s2 + $0xe30] ss:$36 sps:$4 sm:$0xff]   ;;  %v9543_v2 = vld [vmem:[%s12471_s2 + $0x10b8] ss:$36 sps:$4 sm:$0xff]  }
 0x296   :  { %5701 = vmatprep.mubr.bf16.mxu1 %v9688_v1  ;;  %8103 = vmatprep.subr.bf16.mxu1 %v9499_v4  ;;  %v9503_v1 = vld [vmem:[%s12471_s2 + $0x728] ss:$36 sps:$4 sm:$0xff]   ;;  %v9545_v4 = vld [vmem:[%s12471_s2 + $0xe78] ss:$36 sps:$4 sm:$0xff]  }
 0x298   :  { %8086 = vmatpush3.bf16.msra.mxu0 %v9493_v3  ;;  %v9546_v3 = vld [vmem:[%s12471_s2 + $0xb18] ss:$36 sps:$4 sm:$0xff]  }
 0x299   :  { %8087 = vmatprep.subr.bf16.mxu0 %v9497_v5  ;;  %v9549_v5 = vld [vmem:[%s12471_s2 + $0x1460] ss:$36 sps:$4 sm:$0xff]  }
 0x29c   :  { %8088 = vmatpush3.bf16.msra.mxu0 %v9498_v6  ;;  %v9547_v6 = vld [vmem:[%s12471_s2 + $0x1100] ss:$36 sps:$4 sm:$0xff]  }
 0x29d   :  { %8089 = vmatprep.subr.bf16.mxu0 %v9500_v7  ;;  %v9550_v7 = vld [vmem:[%s12471_s2 + $0x1220] ss:$36 sps:$4 sm:$0xff]  }
 0x2a0   :  { %7982 = vmatmul.mubr.msk.bf16.vlgmr.msra.gmra.mrb[8].mxu1 %vm4676_vm0, %v11797_v60  ;;  %8090 = vmatpush3.bf16.msra.mxu0 %v9502_v8  ;;  %v9548_v8 = vld [vmem:[%s12471_s2 + $0xec0] ss:$36 sps:$4 sm:$0xff]  }
 0x2a1   :  { %8104 = vmatpush3.bf16.msra.mxu1 %v9501_v9  ;;  %8091 = vmatprep.subr.bf16.mxu0 %v9504_v10  ;;  %v9553_v9 = vld [vmem:[%s12471_s2 + $0x14a8] ss:$36 sps:$4 sm:$0xff]  }
 0x2a2   :  { %8105 = vmatprep.subr.bf16.mxu1 %v9503_v1  ;;  %5785 = vmatprep.mubr.bf16.mxu1 %v9681_v18  ;;  %v9551_v10 = vld [vmem:[%s12471_s2 + $0x1148] ss:$36 sps:$4 sm:$0xff]   ;;  %v9686_v1 = vld [vmem:[%s12472_s1 + $0x10] ss:$44 sps:$4 sm:$0xff]  }
 0x2a3   :  { %v9561_v18 = vld [vmem:[%s12471_s2 + $0x1538] ss:$36 sps:$4 sm:$0xff]  }
 0x2a4   :  { %8092 = vmatpush3.bf16.msra.mxu0 %v9506_v11  ;;  %v9554_v11 = vld [vmem:[%s12471_s2 + $0x1268] ss:$36 sps:$4 sm:$0xff]  }
 0x2a5   :  { %8106 = vmatpush3.bf16.msra.mxu1 %v9505_v12  ;;  %8093 = vmatprep.subr.bf16.mxu0 %v9508_v13  ;;  %v9552_v12 = vld [vmem:[%s12471_s2 + $0xf08] ss:$36 sps:$4 sm:$0xff]   ;;  %v9557_v13 = vld [vmem:[%s12471_s2 + $0x14f0] ss:$36 sps:$4 sm:$0xff]  }
 0x2a6   :  { %8107 = vmatprep.subr.bf16.mxu1 %v9507_v15  ;;  %v9555_v15 = vld [vmem:[%s12471_s2 + $0x1190] ss:$36 sps:$4 sm:$0xff]  }
 0x2a8   :  { %8094 = vmatpush3.bf16.msra.mxu0 %v9510_v17  ;;  %v9556_v17 = vld [vmem:[%s12471_s2 + $0xf50] ss:$36 sps:$4 sm:$0xff]  }
 0x2a9   :  { %8108 = vmatpush3.bf16.msra.mxu1 %v9509_v19  ;;  %8095 = vmatprep.subr.bf16.mxu0 %v9512_v20  ;;  %v9559_v19 = vld [vmem:[%s12471_s2 + $0x11d8] ss:$36 sps:$4 sm:$0xff]  }
 0x2aa   :  { %8109 = vmatprep.subr.bf16.mxu1 %v9511_v21  ;;  %v9562_v20 = vld [vmem:[%s12471_s2 + $0x12f8] ss:$36 sps:$4 sm:$0xff]  }
 0x2ab   :  { %v9560_v21 = vld [vmem:[%s12471_s2 + $0xf98] ss:$36 sps:$4 sm:$0xff]  }
 0x2ac   :  { %8096 = vmatpush3.bf16.msra.mxu0 %v9514_v22  ;;  %v9563_v22 = vld [vmem:[%s12471_s2 + $0x1580] ss:$36 sps:$4 sm:$0xff]  }
 0x2ad   :  { %8110 = vmatpush3.bf16.msra.mxu1 %v9513_v23  ;;  %8125 = vmatprep.subr.bf16.mxu0 %v9517_v24  ;;  %v9564_v23 = vld [vmem:[%s12471_s2 + $0x1340] ss:$36 sps:$4 sm:$0xff]  }
 0x2ae   :  { %8111 = vmatprep.subr.bf16.mxu1 %v9515_v25  ;;  %v9565_v24 = vld [vmem:[%s12471_s2 + $0x16a0] ss:$36 sps:$4 sm:$0xff]   ;;  %v9566_v25 = vld [vmem:[%s12471_s2 + $0x15c8] ss:$36 sps:$4 sm:$0xff]  }
 0x2af   :  { %5745 = vmatmul.mubr.bf16.vlgmr.msra.gmra.mrb[8].mxu0 %v9682_v30  ;;  %v9569_v30 = vld [vmem:[%s12474_s3] sm:$0xff]  }
 0x2b0   :  { %8126 = vmatpush3.bf16.msra.mxu0 %v9518_v26  ;;  %5826 = vmatprep.mubr.bf16.mxu0 %v9683_v31  ;;  %v9689_v26 = vmov 0.0   ;;  %v9574_v31 = vld [vmem:[%s12471_s2 + $0x1658] ss:$36 sps:$4 sm:$0xff]  }
 0x2b1   :  { %8112 = vmatpush3.bf16.msra.mxu1 %v9516_v27  ;;  %8127 = vmatprep.subr.bf16.mxu0 %v9521_v28  ;;  %v9568_v27 = vld [vmem:[%s12474_s3 + $0x40] sm:$0xff]   ;;  %v9567_v28 = vld [vmem:[%s12471_s2 + $0x1388] ss:$36 sps:$4 sm:$0xff]  }
 0x2b2   :  { %8113 = vmatprep.subr.bf16.mxu1 %v9519_v29  ;;  %v9570_v29 = vld [vmem:[%s12471_s2 + $0x1610] ss:$36 sps:$4 sm:$0xff]  }
 0x2b4   :  { %8128 = vmatpush3.bf16.msra.mxu0 %v9522_v42  ;;  %v9572_v42 = vld [vmem:[%s12474_s3 + $0x48] sm:$0xff]  }
 0x2b5   :  { %8114 = vmatpush3.bf16.msra.mxu1 %v9520_v32  ;;  %8129 = vmatprep.subr.bf16.mxu0 %v9525_v33  ;;  %v9575_v32 = vld [vmem:[%s12471_s2 + $0x1418] ss:$36 sps:$4 sm:$0xff]   ;;  %v9573_v33 = vld [vmem:[%s12474_s3 + $0x8] sm:$0xff]  }
 0x2b6   :  { %8115 = vmatprep.subr.bf16.mxu1 %v9523_v34  ;;  %v9578_v34 = vld [vmem:[%s12474_s3 + $0xc0] sm:$0xff]  }
 0x2b8   :  { %8130 = vmatpush3.bf16.msra.mxu0 %v9526_v35  ;;  %v9579_v35 = vld [vmem:[%s12474_s3 + $0x80] sm:$0xff]  }
 0x2b9   :  { %8116 = vmatpush3.bf16.msra.mxu1 %v9524_v36  ;;  %8131 = vmatprep.subr.bf16.mxu0 %v9529_v37  ;;  %v9582_v36 = vld [vmem:[%s12474_s3 + $0xc8] sm:$0xff]   ;;  %v9580_v37 = vld [vmem:[%s12474_s3 + $0x58] sm:$0xff]  }
 0x2ba   :  { %8117 = vmatprep.subr.bf16.mxu1 %v9527_v49  ;;  %v9583_v49 = vld [vmem:[%s12474_s3 + $0x88] sm:$0xff]  }
 0x2bc   :  { %8132 = vmatpush3.bf16.msra.mxu0 %v9530_v39  ;;  %v9581_v39 = vld [vmem:[%s12474_s3 + $0x18] sm:$0xff]  }
 0x2bd   :  { %8118 = vmatpush3.bf16.msra.mxu1 %v9528_v40  ;;  %8133 = vmatprep.subr.bf16.mxu0 %v9532_v43  ;;  %v9586_v40 = vld [vmem:[%s12474_s3 + $0xd0] sm:$0xff]   ;;  %v9585_v43 = vld [vmem:[%s12474_s3 + $0x20] sm:$0xff]  }
 0x2be   :  { %8147 = vmatprep.subr.bf16.mxu1 %v9531_v44  ;;  %v9590_v44 = vld [vmem:[%s12474_s3 + $0xd8] sm:$0xff]  }
 0x2c0   :  { %5786 = vmatmul.mubr.bf16.vlgmr.msra.gmra.mrb[12].mxu1 %v9684_v53  ;;  %8134 = vmatpush3.bf16.msra.mxu0 %v9534_v46  ;;  %v9588_v46 = vld [vmem:[%s12474_s3 + $0x68] sm:$0xff]   ;;  %v9592_v53 = vld [vmem:[%s12474_s3 + $0x70] sm:$0xff]  }
 0x2c1   :  { %8148 = vmatpush3.bf16.msra.mxu1 %v9533_v48  ;;  %8135 = vmatprep.subr.bf16.mxu0 %v9536_v51  ;;  %v9591_v48 = vld [vmem:[%s12474_s3 + $0x98] sm:$0xff]   ;;  %v9589_v51 = vld [vmem:[%s12474_s3 + $0x28] sm:$0xff]  }
 0x2c2   :  { %8149 = vmatprep.subr.bf16.mxu1 %v9535_v52  ;;  %5867 = vmatprep.mubr.bf16.mxu1 %v9685_v59  ;;  %v9594_v52 = vld [vmem:[%s12474_s3 + $0xe0] sm:$0xff]   ;;  %v9599_v59 = vld [vmem:[%s12474_s3 + $0xa8] sm:$0xff]  }
 0x2c4   :  { %8136 = vmatpush3.bf16.msra.mxu0 %v9538_v54  ;;  %v9595_v54 = vld [vmem:[%s12474_s3 + $0xa0] sm:$0xff]  }
 0x2c5   :  { %8150 = vmatpush3.bf16.msra.mxu1 %v9537_v55  ;;  %8137 = vmatprep.subr.bf16.mxu0 %v9540_v56  ;;  %v9593_v55 = vld [vmem:[%s12474_s3 + $0x30] sm:$0xff]   ;;  %v9598_v56 = vld [vmem:[%s12474_s3 + $0xe8] sm:$0xff]  }
 0x2c6   :  { %8151 = vmatprep.subr.bf16.mxu1 %v9539_v57  ;;  %v9596_v57 = vld [vmem:[%s12474_s3 + $0x78] sm:$0xff]  }
 0x2c8   :  { %8138 = vmatpush3.bf16.msra.mxu0 %v9542_v61  ;;  %v9597_v61 = vld [vmem:[%s12474_s3 + $0x38] sm:$0xff]  }
 0x2c9   :  { %8152 = vmatpush3.bf16.msra.mxu1 %v9541_v62  ;;  %8139 = vmatprep.subr.bf16.mxu0 %v9544_v0  ;;  %v9600_v62 = vld [vmem:[%s12474_s3 + $0xf0] sm:$0xff]   ;;  %v9604_v0 = vld [vmem:[%s12474_s3 + $0x140] sm:$0xff]  }
 0x2ca   :  { %8153 = vmatprep.subr.bf16.mxu1 %v9543_v2  ;;  %v9601_v2 = vld [vmem:[%s12474_s3 + $0xb0] sm:$0xff]  }
 0x2cc   :  { %8140 = vmatpush3.bf16.msra.mxu0 %v9546_v3  ;;  %v9602_v3 = vld [vmem:[%s12474_s3 + $0xf8] sm:$0xff]  }
 0x2cd   :  { %8154 = vmatpush3.bf16.msra.mxu1 %v9545_v4  ;;  %8169 = vmatprep.subr.bf16.mxu0 %v9549_v5  ;;  %v9605_v4 = vld [vmem:[%s12474_s3 + $0x100] sm:$0xff]   ;;  %v9606_v5 = vld [vmem:[%s12474_s3 + $0x148] sm:$0xff]  }
 0x2ce   :  { %8155 = vmatprep.subr.bf16.mxu1 %v9547_v6  ;;  %v9603_v6 = vld [vmem:[%s12474_s3 + $0xb8] sm:$0xff]  }
 0x2cf   :  { %5827 = vmatmul.mubr.bf16.vlgmr.msra.gmra.mrb[12].mxu0 %v9686_v1  ;;  %v9616_v1 = vld [vmem:[%s12474_s3 + $0x1c8] sm:$0xff]  }
 0x2d0   :  { %8170 = vmatpush3.bf16.msra.mxu0 %v9550_v7  ;;  %5908 = vmatprep.mubr.bf16.mxu0 %v11569_v47  ;;  %v9558_v47 = vld [vmem:[%s12471_s2 + $0x12b0] ss:$36 sps:$4 sm:$0xff]   ;;  %v9607_v7 = vld [vmem:[%s12474_s3 + $0x108] sm:$0xff]  }
 0x2d1   :  { %8156 = vmatpush3.bf16.msra.mxu1 %v9548_v8  ;;  %8171 = vmatprep.subr.bf16.mxu0 %v9553_v9  ;;  %v9612_v8 = vld [vmem:[%s12474_s3 + $0x1c0] sm:$0xff]  }
 0x2d2   :  { %8157 = vmatprep.subr.bf16.mxu1 %v9551_v10  ;;  %v9614_v9 = vld [vmem:[%s12474_s3 + $0x180] sm:$0xff]   ;;  %v9609_v10 = vld [vmem:[%s12474_s3 + $0x110] sm:$0xff]  }
 0x2d4   :  { %8172 = vmatpush3.bf16.msra.mxu0 %v9554_v11  ;;  %v9610_v11 = vld [vmem:[%s12474_s3 + $0x158] sm:$0xff]  }
 0x2d5   :  { %8158 = vmatpush3.bf16.msra.mxu1 %v9552_v12  ;;  %8173 = vmatprep.subr.bf16.mxu0 %v9557_v13  ;;  %v9618_v12 = vld [vmem:[%s12474_s3 + $0x188] sm:$0xff]   ;;  %v9611_v13 = vld [vmem:[%s12474_s3 + $0x118] sm:$0xff]  }
 0x2d6   :  { %8159 = vmatprep.subr.bf16.mxu1 %v9555_v15  ;;  %v9620_v15 = vld [vmem:[%s12474_s3 + $0x1d0] sm:$0xff]  }
 0x2d8   :  { %8174 = vmatpush3.bf16.msra.mxu0 %v9558_v47  ;;  %v9622_v47 = vld [vmem:[%s12474_s3 + $0x190] sm:$0xff]  }
 0x2d9   :  { %8160 = vmatpush3.bf16.msra.mxu1 %v9556_v17  ;;  %8175 = vmatprep.subr.bf16.mxu0 %v9561_v18  ;;  %v9615_v17 = vld [vmem:[%s12474_s3 + $0x120] sm:$0xff]   ;;  %v9624_v18 = vld [vmem:[%s12474_s3 + $0x1d8] sm:$0xff]  }
 0x2da   :  { %8161 = vmatprep.subr.bf16.mxu1 %v9559_v19  ;;  %v9617_v19 = vld [vmem:[%s12474_s3 + $0x168] sm:$0xff]  }
 0x2dc   :  { %8176 = vmatpush3.bf16.msra.mxu0 %v9562_v20  ;;  %v9626_v20 = vld [vmem:[%s12474_s3 + $0x198] sm:$0xff]  }
 0x2dd   :  { %8162 = vmatpush3.bf16.msra.mxu1 %v9560_v21  ;;  %8177 = vmatprep.subr.bf16.mxu0 %v9563_v22  ;;  %v9619_v21 = vld [vmem:[%s12474_s3 + $0x128] sm:$0xff]   ;;  %v9628_v22 = vld [vmem:[%s12474_s3 + $0x1e0] sm:$0xff]  }
 0x2de   :  { %8316 = vmatprep.subr.bf16.mxu1 %v9689_v26 }
 0x2e0   :  { %5868 = vmatmul.mubr.bf16.vlgmr.msra.gmra.mrb[16].mxu1 %v11560_v45  ;;  %8178 = vmatpush3.bf16.msra.mxu0 %v9564_v23  ;;  %v9571_v45 = vld [vmem:[%s12471_s2 + $0x13d0] ss:$36 sps:$4 sm:$0xff]  }
 0x2e1   :  { %8317 = vmatpush3.bf16.msra.mxu1 %v9565_v24  ;;  %8179 = vmatprep.subr.bf16.mxu0 %v9566_v25  ;;  %v9621_v23 = vld [vmem:[%s12474_s3 + $0x170] sm:$0xff]   ;;  %v9629_v24 = vld [vmem:[%s12474_s3 + $0x1a0] sm:$0xff]  }
 0x2e2   :  { %8318 = vmatprep.mubr.msk.bf16.mxu1 %vm9690_vm1, %v9689_v26  ;;  %8193 = vmatprep.subr.bf16.mxu1 %v9568_v27  ;;  %v9623_v25 = vld [vmem:[%s12474_s3 + $0x130] sm:$0xff]   ;;  %v9630_v27 = vld [vmem:[%s12474_s3 + $0x1e8] sm:$0xff]  }
 0x2e4   :  { %8180 = vmatpush3.bf16.msra.mxu0 %v9567_v28  ;;  %v9625_v28 = vld [vmem:[%s12474_s3 + $0x178] sm:$0xff]  }
 0x2e5   :  { %8181 = vmatprep.subr.bf16.mxu0 %v9570_v29  ;;  %v9631_v29 = vld [vmem:[%s12474_s3 + $0x1a8] sm:$0xff]  }
 0x2e8   :  { %8319 = vmatmul.mubr.msk.bf16.vlgmr.msra.gmra.mrb[20].mxu1 %vm4676_vm0, %v11797_v60  ;;  %8182 = vmatpush3.bf16.msra.mxu0 %v9571_v45  ;;  %v9576_v60 = vld [vmem:[%s12474_s3 + $0x50] sm:$0xff]   ;;  %v9627_v45 = vld [vmem:[%s12474_s3 + $0x138] sm:$0xff]  }
 0x2e9   :  { %8194 = vmatpush3.bf16.msra.mxu1 %v9569_v30  ;;  %6600 = vmatprep.mubr.bf16.mxu1 %v11443_v41  ;;  %v9577_v41 = vld [vmem:[%s12474_s3 + $0x10] sm:$0xff]  }
 0x2ea   :  { %8195 = vmatprep.subr.bf16.mxu1 %v9572_v42  ;;  %8183 = vmatprep.subr.bf16.mxu0 %v9574_v31  ;;  %v9632_v30 = vld [vmem:[%s12474_s3 + $0x1f0] sm:$0xff]   ;;  %v9634_v31 = vld [vmem:[%s12474_s3 + $0x1f8] sm:$0xff]  }
 0x2eb   :  { %v9633_v42 = vld [vmem:[%s12474_s3 + $0x1b0] sm:$0xff]  }
 0x2ec   :  { %8184 = vmatpush3.bf16.msra.mxu0 %v9575_v32  ;;  %v9635_v32 = vld [vmem:[%s12474_s3 + $0x1b8] sm:$0xff]  }
 0x2ed   :  { %8196 = vmatpush3.bf16.msra.mxu1 %v9573_v33  ;;  %8215 = vmatprep.subr.bf16.mxu0 %v9578_v34  ;;  %v868_v33 = vsub.s32 4, %v11362_v63  ;;  %v872_v34 = vsub.s32 5, %v11362_v63 }
 0x2ee   :  { %8197 = vmatprep.subr.bf16.mxu1 %v9576_v60  ;;  %v9687_v60 = vld [vmem:[%s12473_s5] sm:$0xff] }
 0x2ef   :  { %5909 = vmatmul.mubr.bf16.vlgmr.msra.gmra.mrb[16].mxu0 %v11766_v50  ;;  %v9584_v50 = vld [vmem:[%s12474_s3 + $0x60] sm:$0xff]  }
 0x2f0   :  { %8216 = vmatpush3.bf16.msra.mxu0 %v9579_v35  ;;  %6641 = vmatprep.mubr.bf16.mxu0 %v11495_v16  ;;  %v9587_v16 = vld [vmem:[%s12474_s3 + $0x90] sm:$0xff]   ;;  %v869_v35 = vrot.slane %v9687_v60, %v868_v33 }
 0x2f1   :  { %8198 = vmatpush3.bf16.msra.mxu1 %v9577_v41  ;;  %8217 = vmatprep.subr.bf16.mxu0 %v9582_v36  ;;  %v873_v41 = vrot.slane %v9687_v60, %v872_v34 }
 0x2f2   :  { %8199 = vmatprep.subr.bf16.mxu1 %v9580_v37 }
 0x2f4   :  { %8218 = vmatpush3.bf16.msra.mxu0 %v9583_v49 }
 0x2f5   :  { %8200 = vmatpush3.bf16.msra.mxu1 %v9581_v39  ;;  %8219 = vmatprep.subr.bf16.mxu0 %v9586_v40 }
 0x2f6   :  { %8201 = vmatprep.subr.bf16.mxu1 %v9584_v50 }
 0x2f8   :  { %8220 = vmatpush3.bf16.msra.mxu0 %v9587_v16 }
 0x2f9   :  { %8202 = vmatpush3.bf16.msra.mxu1 %v9585_v43  ;;  %8221 = vmatprep.subr.bf16.mxu0 %v9590_v44 }
 0x2fa   :  { %8203 = vmatprep.subr.bf16.mxu1 %v9588_v46 }
 0x2fc   :  { %8222 = vmatpush3.bf16.msra.mxu0 %v9591_v48 }
 0x2fd   :  { %8204 = vmatpush3.bf16.msra.mxu1 %v9589_v51  ;;  %8223 = vmatprep.subr.bf16.mxu0 %v9594_v52 }
 0x2fe   :  { %8205 = vmatprep.subr.bf16.mxu1 %v9592_v53 }
 0x300   :  { %8224 = vmatpush3.bf16.msra.mxu0 %v9595_v54  ;;  %v9636_v54 = vld [vmem:[%s12474_s3 + $0x200] sm:$0xff]  }
 0x301   :  { %8206 = vmatpush3.bf16.msra.mxu1 %v9593_v55  ;;  %8225 = vmatprep.subr.bf16.mxu0 %v9598_v56  ;;  %v876_v55 = vsub.s32 6, %v11362_v63  ;;  %v880_v56 = vsub.s32 7, %v11362_v63 }
 0x302   :  { %8207 = vmatprep.subr.bf16.mxu1 %v9596_v57  ;;  %v9637_v57 = vld [vmem:[%s12474_s3 + $0x208] sm:$0xff]  }
 0x304   :  { %8226 = vmatpush3.bf16.msra.mxu0 %v9599_v59  ;;  %v877_v59 = vrot.slane %v9687_v60, %v876_v55 }
 0x305   :  { %8208 = vmatpush3.bf16.msra.mxu1 %v9597_v61  ;;  %8227 = vmatprep.subr.bf16.mxu0 %v9600_v62  ;;  %v881_v61 = vrot.slane %v9687_v60, %v880_v56  ;;  %v9638_v62 = vld [vmem:[%s12474_s3 + $0x210] sm:$0xff]  }
 0x306   :  { %8237 = vmatprep.subr.bf16.mxu1 %v9604_v0 }
 0x308   :  { %6601 = vmatmul.mubr.bf16.vlgmr.msra.gmra.mrb[24].mxu1 %v11437_v38  ;;  %8228 = vmatpush3.bf16.msra.mxu0 %v9601_v2  ;;  %v9608_v38 = vld [vmem:[%s12474_s3 + $0x150] sm:$0xff]  }
 0x309   :  { %8229 = vmatprep.subr.bf16.mxu0 %v9602_v3  ;;  %8238 = vmatpush3.bf16.msra.mxu1 %v9605_v4 }
 0x30a   :  { %8239 = vmatprep.subr.bf16.mxu1 %v9606_v5 }
 0x30c   :  { %8230 = vmatpush3.bf16.msra.mxu0 %v9603_v6 }
 0x30d   :  { %8240 = vmatpush3.bf16.msra.mxu1 %v9607_v7  ;;  %8259 = vmatprep.subr.bf16.mxu0 %v9612_v8  ;;  %v9639_v7 = vld [vmem:[%s12474_s3 + $0x218] sm:$0xff]  }
 0x30e   :  { %8241 = vmatprep.subr.bf16.mxu1 %v9608_v38 }
 0x30f   :  { %6642 = vmatmul.mubr.bf16.vlgmr.msra.gmra.mrb[20].mxu0 %v11490_v14  ;;  %v9613_v14 = vld [vmem:[%s12474_s3 + $0x160] sm:$0xff]  }
 0x310   :  { %8260 = vmatpush3.bf16.msra.mxu0 %v9614_v9 }
 0x311   :  { %8242 = vmatpush3.bf16.msra.mxu1 %v9609_v10  ;;  %8261 = vmatprep.subr.bf16.mxu0 %v9616_v1 }
 0x312   :  { %8243 = vmatprep.subr.bf16.mxu1 %v9610_v11 }
 0x314   :  { %8262 = vmatpush3.bf16.msra.mxu0 %v9618_v12  ;;  %v9640_v12 = vld [vmem:[%s12474_s3 + $0x220] sm:$0xff]  }
 0x315   :  { %8244 = vmatpush3.bf16.msra.mxu1 %v9611_v13  ;;  %8263 = vmatprep.subr.bf16.mxu0 %v9620_v15  ;;  %v9641_v15 = vld [vmem:[%s12474_s3 + $0x228] sm:$0xff]  }
 0x316   :  { %8245 = vmatprep.subr.bf16.mxu1 %v9613_v14 }
 0x318   :  { %8264 = vmatpush3.bf16.msra.mxu0 %v9622_v47  ;;  %v9642_v47 = vld [vmem:[%s12474_s3 + $0x230] sm:$0xff]  }
 0x319   :  { %8246 = vmatpush3.bf16.msra.mxu1 %v9615_v17  ;;  %8265 = vmatprep.subr.bf16.mxu0 %v9624_v18 }
 0x31a   :  { %8247 = vmatprep.subr.bf16.mxu1 %v9617_v19 }
 0x31c   :  { %8266 = vmatpush3.bf16.msra.mxu0 %v9626_v20 }
 0x31d   :  { %8248 = vmatpush3.bf16.msra.mxu1 %v9619_v21  ;;  %8267 = vmatprep.subr.bf16.mxu0 %v9628_v22  ;;  %v9643_v22 = vld [vmem:[%s12474_s3 + $0x238] sm:$0xff]  }
 0x31e   :  { %8249 = vmatprep.subr.bf16.mxu1 %v9621_v23  ;;  %v7238_v23 = vld [vmem:[%s12473_s5 + $0x8] ss:$0 sm:$0xff] }
 0x320   :  { %8268 = vmatpush3.bf16.msra.mxu0 %v9629_v24 }
 0x321   :  { %8250 = vmatpush3.bf16.msra.mxu1 %v9623_v25  ;;  %8269 = vmatprep.subr.bf16.mxu0 %v9630_v27 }
 0x322   :  { %8251 = vmatprep.subr.bf16.mxu1 %v9625_v28 }
 0x324   :  { %8270 = vmatpush3.bf16.msra.mxu0 %v9631_v29 }
 0x325   :  { %8252 = vmatpush3.bf16.msra.mxu1 %v9627_v45  ;;  %8271 = vmatprep.subr.bf16.mxu0 %v9632_v30 }
 0x326   :  { %8322 = vmatprep.subr.bf16.mxu1 %v9689_v26 }
 0x328   :  { %8272 = vmatpush3.bf16.msra.mxu0 %v9633_v42 }
 0x329   :  { %8273 = vmatprep.subr.bf16.mxu0 %v9634_v31 }
 0x32c   :  { %8274 = vmatpush3.bf16.msra.mxu0 %v9635_v32 }
 0x32d   :  { %8342 = vmatprep.subr.bf16.mxu0 %v9689_v26 }
 0x362   :  { %v5445_v36 = vpop.f32.mrb[4].mxu0 }
 0x363   :  { %v8416_v37 = vadd.f32 %v5445_v36, %v869_v35  ;;  %v5447_v49 = vpop.f32.mrb[5].mxu0 }
 0x364   :  { %v8417_v39 = vadd.f32 %v5447_v49, %v873_v41  ;;  %v5449_v40 = vpop.f32.mrb[6].mxu0 }
 0x365   :  { %v8418_v50 = vadd.f32 %v5449_v40, %v869_v35  ;;  %v5451_v16 = vpop.f32.mrb[7].mxu0  ;;  %v5962_v44 = vmax.f32 %v8416_v37, 0.0 }
 0x366   :  { %v8419_v43 = vadd.f32 %v5451_v16, %v873_v41  ;;  %v5963_v48 = vmax.f32 %v8417_v39, 0.0 }
 0x367   :  { %v5971_v46 = vmax.f32 %v8418_v50, 0.0 }
 0x368   :  { %v5972_v51 = vmax.f32 %v8419_v43, 0.0 }
 0x369   :  { %v5980_v52 = vpack.c.bf16 %v5971_v46, %v5962_v44 }
 0x36a   :  { %v5981_v53 = vpack.c.bf16 %v5972_v51, %v5963_v48 }
 0x36c   :  { %6682 = vmatprep.mubr.bf16.mxu1 %v5981_v53 }
 0x36d   :  { %6683 = vmatmul.mubr.bf16.vlgmr.msra.gmra.mrb[28].mxu1 %v5980_v52 }
 0x36e   :  { %8323 = vmatpush3.bf16.msra.mxu1 %v9636_v54  ;;  %8338 = vmatprep.mubr.msk.bf16.mxu1 %vm9690_vm1, %v9689_v26 }
 0x36f   :  { %8324 = vmatprep.subr.bf16.mxu1 %v9689_v26 }
 0x372   :  { %8325 = vmatpush3.bf16.msra.mxu1 %v9637_v57 }
 0x373   :  { %v5703_v0 = vpop.f32.mrb[8].mxu1  ;;  %8326 = vmatprep.subr.bf16.mxu1 %v9689_v26 }
 0x374   :  { %v8420_v63 = vadd.f32 %v5703_v0, %v877_v59  ;;  %v5705_v2 = vpop.f32.mrb[9].mxu1 }
 0x375   :  { %v8421_v3 = vadd.f32 %v5705_v2, %v881_v61  ;;  %v5707_v4 = vpop.f32.mrb[10].mxu1 }
 0x376   :  { %v8422_v5 = vadd.f32 %v5707_v4, %v877_v59  ;;  %v5709_v6 = vpop.f32.mrb[11].mxu1  ;;  %8327 = vmatpush3.bf16.msra.mxu1 %v9638_v62  ;;  %v5964_v38 = vmax.f32 %v8420_v63, 0.0 }
 0x377   :  { %v8423_v8 = vadd.f32 %v5709_v6, %v881_v61  ;;  %8328 = vmatprep.subr.bf16.mxu1 %v9689_v26  ;;  %v5965_v10 = vmax.f32 %v8421_v3, 0.0 }
 0x378   :  { %v5973_v9 = vmax.f32 %v8422_v5, 0.0 }
 0x379   :  { %v5974_v1 = vmax.f32 %v8423_v8, 0.0  ;;  %v9645_v8 = vld [vmem:[%s12474_s3 + $0x248] sm:$0xff]  }
 0x37a   :  { %v5982_v11 = vpack.c.bf16 %v5973_v9, %v5964_v38  ;;  %8329 = vmatpush3.bf16.msra.mxu1 %v9639_v7  ;;  %v9644_v7 = vld [vmem:[%s12474_s3 + $0x240] sm:$0xff]  }
 0x37b   :  { %v5983_v13 = vpack.c.bf16 %v5974_v1, %v5965_v10  ;;  %8330 = vmatprep.subr.bf16.mxu1 %v9689_v26 }
 0x37d   :  { %6723 = vmatprep.mubr.bf16.mxu0 %v5983_v13  ;;  %v7984_v13 = vld [vmem:[%s12473_s5 + $0x9] ss:$0 sm:$0xff] }
 0x37e   :  { %6724 = vmatmul.mubr.bf16.vlgmr.msra.gmra.mrb[24].mxu0 %v5982_v11  ;;  %8331 = vmatpush3.bf16.msra.mxu1 %v9640_v12 }
 0x37f   :  { %8332 = vmatprep.subr.bf16.mxu1 %v9689_v26  ;;  %8350 = vmatprep.mubr.msk.bf16.mxu0 %vm9690_vm1, %v9689_v26 }
 0x380   :  { %8343 = vmatpush3.bf16.msra.mxu0 %v9644_v7  ;;  %v6863_v7 = vld [vmem:[%s12476_s0 + $0x8] sm:$0xff] }
 0x381   :  { %8344 = vmatprep.subr.bf16.mxu0 %v9689_v26 }
 0x382   :  { %v8097_v14 = vpop.f32.mrb[8].mxu0  ;;  %8333 = vmatpush3.bf16.msra.mxu1 %v9641_v15 }
 0x383   :  { %v8098_v17 = vpop.f32.mrb[9].mxu0  ;;  %8334 = vmatprep.subr.bf16.mxu1 %v9689_v26 }
 0x384   :  { %v8099_v18 = vadd.f32 %v8098_v17, %v8097_v14  ;;  %v8100_v19 = vpop.f32.mrb[10].mxu0  ;;  %8345 = vmatpush3.bf16.msra.mxu0 %v9645_v8 }
 0x385   :  { %v8101_v20 = vpop.f32.mrb[11].mxu0  ;;  %8346 = vmatprep.subr.bf16.mxu0 %v9689_v26 }
 0x386   :  { %v8102_v21 = vadd.f32 %v8101_v20, %v8100_v19  ;;  %8335 = vmatpush3.bf16.msra.mxu1 %v9642_v47  ;;  %v5747_v27 = vadd.f32 %v8099_v18, %v7238_v23 }
 0x387   :  { %8336 = vmatprep.subr.bf16.mxu1 %v9689_v26 }
 0x388   :  { %v5750_v30 = vadd.f32 %v8102_v21, %v7238_v23 }
 0x38a   :  { %8337 = vmatpush3.bf16.msra.mxu1 %v9643_v22 }
 0x38b   :  { %8354 = vmatprep.subr.bf16.mxu1 %v9689_v26 }
 0x393   :  { %v8119_v24 = vpop.f32.mrb[12].mxu1 }
 0x394   :  { %v8120_v25 = vpop.f32.mrb[13].mxu1 }
 0x395   :  { %v8121_v28 = vadd.f32 %v8120_v25, %v8119_v24  ;;  %v8122_v29 = vpop.f32.mrb[14].mxu1  ;;  %v9646_v24 = vld [vmem:[%s12474_s3 + $0x250] sm:$0xff]   ;;  %v9647_v25 = vld [vmem:[%s12474_s3 + $0x258] sm:$0xff]  }
 0x396   :  { %v8123_v45 = vpop.f32.mrb[15].mxu1  ;;  %8347 = vmatpush3.bf16.msra.mxu0 %v9646_v24 }
 0x397   :  { %v5788_v42 = vadd.f32 %v8121_v28, %v5747_v27  ;;  %v8124_v31 = vadd.f32 %v8123_v45, %v8122_v29  ;;  %8348 = vmatprep.subr.bf16.mxu0 %v9689_v26  ;;  %v6868_v27 = vld [vmem:[%s12475_s4 + $0x8] sm:$0xff]  ;;  %v6869_v28 = vld [vmem:[%s12475_s4 + $0x10] sm:$0xff]  ;;  %v6870_v29 = vld [vmem:[%s12475_s4 + $0x18] sm:$0xff] }
 0x398   :  { %v6876_v45 = vpack.c.bf16 %v6869_v28, %v6868_v27  ;;  %v9654_v28 = vld [vmem:[%s12474_s3 + $0x290] sm:$0xff]  }
 0x399   :  { %v5791_v32 = vadd.f32 %v8124_v31, %v5750_v30  ;;  %v6871_v30 = vld [vmem:[%s12475_s4 + $0x20] sm:$0xff] }
 0x39a   :  { %8349 = vmatpush3.bf16.msra.mxu0 %v9647_v25 }
 0x39b   :  { %8366 = vmatprep.subr.bf16.mxu0 %v9689_v26 }
 0x3a2   :  { %v8141_v33 = vpop.f32.mrb[12].mxu0 }
 0x3a3   :  { %v8142_v34 = vpop.f32.mrb[13].mxu0 }
 0x3a4   :  { %v8143_v60 = vadd.f32 %v8142_v34, %v8141_v33  ;;  %v8144_v35 = vpop.f32.mrb[14].mxu0 }
 0x3a5   :  { %v8145_v41 = vpop.f32.mrb[15].mxu0 }
 0x3a6   :  { %v5829_v36 = vadd.f32 %v8143_v60, %v5788_v42  ;;  %v8146_v37 = vadd.f32 %v8145_v41, %v8144_v35  ;;  %v6877_v42 = vpack.c.bf16 %v6871_v30, %v6870_v29  ;;  %v9655_v29 = vld [vmem:[%s12474_s3 + $0x298] sm:$0xff]   ;;  %v9657_v30 = vld [vmem:[%s12474_s3 + $0x2a8] sm:$0xff]  }
 0x3a8   :  { %v5832_v49 = vadd.f32 %v8146_v37, %v5791_v32 }
 0x3b3   :  { %v8163_v39 = vpop.f32.mrb[16].mxu1 }
 0x3b4   :  { %v8164_v40 = vpop.f32.mrb[17].mxu1 }
 0x3b5   :  { %v8165_v50 = vadd.f32 %v8164_v40, %v8163_v39  ;;  %v8166_v16 = vpop.f32.mrb[18].mxu1 }
 0x3b6   :  { %v8167_v43 = vpop.f32.mrb[19].mxu1 }
 0x3b7   :  { %v5870_v44 = vadd.f32 %v8165_v50, %v5829_v36  ;;  %v8168_v46 = vadd.f32 %v8167_v43, %v8166_v16 }
 0x3b9   :  { %v5873_v48 = vadd.f32 %v8168_v46, %v5832_v49 }
 0x3bb   :  { %v5951_v51 = vpop.f32.mrb[20].mxu1 }
 0x3bc   :  { %v8320_v52 = vpop.f32.mrb[21].mxu1 }
 0x3bd   :  { %v5954_v53 = vpop.f32.mrb[22].mxu1 }
 0x3be   :  { %v8321_v54 = vpop.f32.mrb[23].mxu1 }
 0x3c2   :  { %v8185_v55 = vpop.f32.mrb[16].mxu0 }
 0x3c3   :  { %v8186_v56 = vpop.f32.mrb[17].mxu0 }
 0x3c4   :  { %v8187_v57 = vadd.f32 %v8186_v56, %v8185_v55  ;;  %v8188_v59 = vpop.f32.mrb[18].mxu0 }
 0x3c5   :  { %v8189_v61 = vpop.f32.mrb[19].mxu0 }
 0x3c6   :  { %v8190_v62 = vadd.f32 %v8189_v61, %v8188_v59  ;;  %v5911_v0 = vadd.f32 %v8187_v57, %v5870_v44  ;;  %v6872_v59 = vld [vmem:[%s12475_s4 + $0x28] sm:$0xff]  ;;  %v6873_v61 = vld [vmem:[%s12475_s4 + $0x30] sm:$0xff] }
 0x3c8   :  { %v5952_v63 = vadd.f32 %v5951_v51, %v5911_v0  ;;  %v5914_v2 = vadd.f32 %v8190_v62, %v5873_v48  ;;  %v6865_v62 = vld [vmem:[%s12475_s4] sm:$0xff]  ;;  %v6878_v0 = vpack.c.bf16 %v6873_v61, %v6872_v59 }
 0x3ca   :  { %v5955_v3 = vadd.f32 %v5954_v53, %v5914_v2  ;;  %v5966_v4 = vmax.f32 %v5952_v63, 0.0  ;;  %v6866_v63 = vpack.c.bf16 %v6865_v62, %v6865_v62 }
 0x3cc   :  { %v5975_v5 = vmax.f32 %v5955_v3, 0.0  ;;  %v6930_v2 = vsel %vm6928_vm3, %v6866_v63, 0  ;;  %v6874_v3 = vld [vmem:[%s12475_s4 + $0x38] sm:$0xff] }
 0x3ce   :  { %v5984_v6 = vpack.c.bf16 %v5975_v5, %v5966_v4  ;;  %v6875_v4 = vld [vmem:[%s12475_s4 + $0x40] sm:$0xff] }
 0x3cf   :  { %v6862_v5 = vld [vmem:[%s12476_s0] sm:$0xff] }
 0x3d0   :  { %8339 = vmatmul.mubr.bf16.vlgmr.msra.gmra.mrb[32].mxu1 %v5984_v6  ;;  %v6879_v6 = vpack.c.bf16 %v6875_v4, %v6874_v3  ;;  %v6864_v8 = vpack.c.bf16 %v6863_v7, %v6862_v5 }
 0x3d1   :  { %8362 = vmatprep.mubr.msk.bf16.mxu1 %vm9690_vm1, %v9689_v26  ;;  %8355 = vmatpush3.bf16.msra.mxu1 %v6876_v45  ;;  %v9656_v45 = vld [vmem:[%s12474_s3 + $0x2a0] sm:$0xff]  }
 0x3d2   :  { %8356 = vmatprep.subr.bf16.mxu1 %v9689_v26 }
 0x3d5   :  { %8357 = vmatpush3.bf16.msra.mxu1 %v6877_v42 }
 0x3d6   :  { %8358 = vmatprep.subr.bf16.mxu1 %v9689_v26 }
 0x3d9   :  { %8359 = vmatpush3.bf16.msra.mxu1 %v6878_v0 }
 0x3da   :  { %8360 = vmatprep.subr.bf16.mxu1 %v9689_v26 }
 0x3db   :  { %v8209_v38 = vpop.f32.mrb[24].mxu1 }
 0x3dc   :  { %v8210_v9 = vpop.f32.mrb[25].mxu1 }
 0x3dd   :  { %v8211_v10 = vadd.f32 %v8210_v9, %v8209_v38  ;;  %v8212_v1 = vpop.f32.mrb[26].mxu1  ;;  %8361 = vmatpush3.bf16.msra.mxu1 %v6879_v6  ;;  %v9648_v38 = vld [vmem:[%s12474_s3 + $0x260] sm:$0xff]   ;;  %v9649_v9 = vld [vmem:[%s12474_s3 + $0x268] sm:$0xff]  }
 0x3de   :  { %v8213_v11 = vpop.f32.mrb[27].mxu1  ;;  %8392 = vmatprep.subr.bf16.mxu1 %v9689_v26 }
 0x3df   :  { %v8214_v12 = vadd.f32 %v8213_v11, %v8212_v1  ;;  %v6603_v47 = vadd.f32 %v8211_v10, %v7984_v13  ;;  %v9650_v10 = vld [vmem:[%s12474_s3 + $0x270] sm:$0xff]   ;;  %v9651_v1 = vld [vmem:[%s12474_s3 + $0x278] sm:$0xff]   ;;  %v9652_v11 = vld [vmem:[%s12474_s3 + $0x280] sm:$0xff]  }
 0x3e1   :  { %v6606_v20 = vadd.f32 %v8214_v12, %v7984_v13  ;;  %v8057_v12 = vld [vmem:[%s12473_s5 + $0xa] ss:$0 sm:$0xff] }
 0x3e2   :  { %v8231_v15 = vpop.f32.mrb[20].mxu0 }
 0x3e3   :  { %v8232_v14 = vpop.f32.mrb[21].mxu0 }
 0x3e4   :  { %v8233_v17 = vadd.f32 %v8232_v14, %v8231_v15  ;;  %v8234_v18 = vpop.f32.mrb[22].mxu0 }
 0x3e5   :  { %v8235_v19 = vpop.f32.mrb[23].mxu0 }
 0x3e6   :  { %v6644_v21 = vadd.f32 %v8233_v17, %v6603_v47  ;;  %v8236_v22 = vadd.f32 %v8235_v19, %v8234_v18 }
 0x3e8   :  { %v6647_v23 = vadd.f32 %v8236_v22, %v6606_v20 }
 0x440   :  { %v8253_v31 = vpop.f32.mrb[28].mxu1 }
 0x441   :  { %v8254_v32 = vpop.f32.mrb[29].mxu1 }
 0x442   :  { %v8255_v33 = vadd.f32 %v8254_v32, %v8253_v31  ;;  %v8256_v34 = vpop.f32.mrb[30].mxu1  ;;  %v8065_v31 = vld [vmem:[%s12473_s5 + $0xb] ss:$0 sm:$0xff] }
 0x443   :  { %v8257_v60 = vpop.f32.mrb[31].mxu1 }
 0x444   :  { %v6685_v35 = vadd.f32 %v8255_v33, %v6644_v21  ;;  %v8258_v41 = vadd.f32 %v8257_v60, %v8256_v34 }
 0x446   :  { %v6688_v36 = vadd.f32 %v8258_v41, %v6647_v23  ;;  %v9653_v23 = vld [vmem:[%s12474_s3 + $0x288] sm:$0xff]  }
 0x451   :  { %v8275_v37 = vpop.f32.mrb[24].mxu0 }
 0x452   :  { %v8276_v49 = vpop.f32.mrb[25].mxu0 }
 0x453   :  { %v8277_v39 = vadd.f32 %v8276_v49, %v8275_v37  ;;  %v8278_v40 = vpop.f32.mrb[26].mxu0 }
 0x454   :  { %v8279_v50 = vpop.f32.mrb[27].mxu0 }
 0x455   :  { %v8280_v16 = vadd.f32 %v8279_v50, %v8278_v40  ;;  %v6726_v43 = vadd.f32 %v8277_v39, %v6685_v35  ;;  %v9658_v40 = vld [vmem:[%s12474_s3 + $0x2b0] sm:$0xff]   ;;  %v9659_v50 = vld [vmem:[%s12474_s3 + $0x2b8] sm:$0xff]  }
 0x457   :  { %v6729_v44 = vadd.f32 %v8280_v16, %v6688_v36  ;;  %v8066_v16 = vld [vmem:[%s12473_s5 + $0xc] ss:$0 sm:$0xff] }
 0x4a3   :  { %v6766_v46 = vpop.f32.mrb[32].mxu1 }
 0x4a4   :  { %v6767_v48 = vadd.f32 %v6766_v46, %v6726_v43  ;;  %v8340_v51 = vpop.f32.mrb[33].mxu1 }
 0x4a5   :  { %v6769_v52 = vpop.f32.mrb[34].mxu1 }
 0x4a6   :  { %v6770_v53 = vadd.f32 %v6769_v52, %v6729_v44  ;;  %v8341_v54 = vpop.f32.mrb[35].mxu1  ;;  %v6773_v55 = vmax.f32 %v6767_v48, 0.0 }
 0x4a8   :  { %v6774_v56 = vmax.f32 %v6770_v53, 0.0 }
 0x4aa   :  { %v6775_v57 = vpack.c.bf16 %v6774_v56, %v6773_v55  ;;  %v8075_v56 = vld [vmem:[%s12473_s5 + $0xd] ss:$0 sm:$0xff] }
 0x4ac   :  { %8351 = vmatmul.mubr.msk.bf16.vlgmr.msra.gmra.mrb[28].mxu0 %vm6815_vm2, %v6775_v57 }
 0x4ad   :  { %8368 = vmatprep.mubr.msk.bf16.mxu0 %vm9690_vm1, %v9689_v26  ;;  %8367 = vmatpush3.bf16.msra.mxu0 %v6930_v2 }
 0x4ae   :  { %8372 = vmatprep.subr.bf16.mxu0 %v9689_v26 }
 0x4b4   :  { %8369 = vmatmul.mubr.msk.bf16.vlgmr.msra.gmra.mrb[32].mxu0 %vm6924_vm4, %v6864_v8 }
 0x4b5   :  { %8373 = vmatpush3.bf16.msra.mxu0 %v9648_v38  ;;  %8388 = vmatprep.mubr.msk.bf16.mxu0 %vm9690_vm1, %v9689_v26 }
 0x4b6   :  { %8374 = vmatprep.subr.bf16.mxu0 %v9689_v26 }
 0x4b9   :  { %8375 = vmatpush3.bf16.msra.mxu0 %v9649_v9 }
 0x4ba   :  { %8376 = vmatprep.subr.bf16.mxu0 %v9689_v26 }
 0x4bd   :  { %8377 = vmatpush3.bf16.msra.mxu0 %v9650_v10 }
 0x4be   :  { %8378 = vmatprep.subr.bf16.mxu0 %v9689_v26 }
 0x4c1   :  { %8379 = vmatpush3.bf16.msra.mxu0 %v9651_v1 }
 0x4c2   :  { %8380 = vmatprep.subr.bf16.mxu0 %v9689_v26 }
 0x4c5   :  { %8381 = vmatpush3.bf16.msra.mxu0 %v9652_v11 }
 0x4c6   :  { %8382 = vmatprep.subr.bf16.mxu0 %v9689_v26 }
 0x4c9   :  { %8383 = vmatpush3.bf16.msra.mxu0 %v9653_v23 }
 0x4ca   :  { %8384 = vmatprep.subr.bf16.mxu0 %v9689_v26 }
 0x4cd   :  { %8385 = vmatpush3.bf16.msra.mxu0 %v9654_v28 }
 0x4ce   :  { %8386 = vmatprep.subr.bf16.mxu0 %v9689_v26 }
 0x4d1   :  { %8387 = vmatpush3.bf16.msra.mxu0 %v9655_v29 }
 0x57f   :  { %v6853_v13 = vpop.f32.mrb[28].mxu0 }
 0x580   :  { %v6854_v15 = vadd.f32 %v8057_v12, %v6853_v13  ;;  %v8352_v14 = vpop.f32.mrb[29].mxu0 }
 0x581   :  { %v6856_v47 = vpop.f32.mrb[30].mxu0 }
 0x582   :  { %v6857_v17 = vadd.f32 %v8057_v12, %v6856_v47  ;;  %v8353_v18 = vpop.f32.mrb[31].mxu0  ;;  %v6860_v19 = vmax.f32 %v6854_v15, 0.0 }
 0x584   :  { %v6861_v20 = vmax.f32 %v6857_v17, 0.0 }
 0x586   :  { %v6867_v21 = vpack.c.bf16 %v6861_v20, %v6860_v19 }
 0x587   :  { %v6966_v22 = vpop.f32.mrb[32].mxu0 }
 0x588   :  { %8363 = vmatmul.mubr.msk.bf16.vlgmr.msra.gmra.mrb[36].mxu1 %vm6815_vm2, %v6867_v21  ;;  %v8370_v24 = vpop.f32.mrb[33].mxu0 }
 0x589   :  { %8400 = vmatprep.mubr.msk.bf16.mxu1 %vm9690_vm1, %v9689_v26  ;;  %v6969_v25 = vpop.f32.mrb[34].mxu0  ;;  %8393 = vmatpush3.bf16.msra.mxu1 %v9656_v45 }
 0x58a   :  { %v8371_v27 = vpop.f32.mrb[35].mxu0  ;;  %8394 = vmatprep.subr.bf16.mxu1 %v9689_v26 }
 0x58d   :  { %8395 = vmatpush3.bf16.msra.mxu1 %v9657_v30 }
 0x58e   :  { %8396 = vmatprep.subr.bf16.mxu1 %v9689_v26 }
 0x591   :  { %8397 = vmatpush3.bf16.msra.mxu1 %v9658_v40 }
 0x592   :  { %8398 = vmatprep.subr.bf16.mxu1 %v9689_v26  ;;  %v7184_v26 = vand.u32 127, %v850_v58 }
 0x594   :  { %vm7185_vm5 = vcmp.lt.s32.totalorder %v7184_v26, 4 }
 0x595   :  { %8399 = vmatpush3.bf16.msra.mxu1 %v9659_v50 }
 0x65b   :  { %v6917_v42 = vpop.f32.mrb[36].mxu1 }
 0x65c   :  { %v6967_v32 = vadd.f32 %v6966_v22, %v6917_v42  ;;  %v8364_v33 = vpop.f32.mrb[37].mxu1 }
 0x65d   :  { %v6920_v34 = vpop.f32.mrb[38].mxu1 }
 0x65e   :  { %v6980_v60 = vadd.f32 %v8065_v31, %v6967_v32  ;;  %v6970_v35 = vadd.f32 %v6969_v25, %v6920_v34  ;;  %v8365_v41 = vpop.f32.mrb[39].mxu1 }
 0x660   :  { %v6981_v36 = vadd.f32 %v8065_v31, %v6970_v35  ;;  %v6982_v37 = vmax.f32 %v6980_v60, 0.0 }
 0x662   :  { %v6983_v49 = vmax.f32 %v6981_v36, 0.0 }
 0x664   :  { %v6984_v39 = vpack.c.bf16 %v6983_v49, %v6982_v37 }
 0x666   :  { %8389 = vmatmul.mubr.bf16.vlgmr.msra.gmra.mrb[36].mxu0 %v6984_v39 }
 0x739   :  { %v7090_v43 = vpop.f32.mrb[36].mxu0 }
 0x73a   :  { %v7091_v44 = vadd.f32 %v8066_v16, %v7090_v43  ;;  %v8390_v46 = vpop.f32.mrb[37].mxu0 }
 0x73b   :  { %v7093_v48 = vpop.f32.mrb[38].mxu0 }
 0x73c   :  { %v7094_v51 = vadd.f32 %v8066_v16, %v7093_v48  ;;  %v8391_v52 = vpop.f32.mrb[39].mxu0  ;;  %v7097_v53 = vmax.f32 %v7091_v44, 0.0 }
 0x73e   :  { %v7098_v54 = vmax.f32 %v7094_v51, 0.0 }
 0x740   :  { %v7099_v55 = vpack.c.bf16 %v7098_v54, %v7097_v53 }
 0x742   :  { %8401 = vmatmul.mubr.msk.bf16.vlgmr.msra.gmra.mrb[40].mxu1 %vm6815_vm2, %v7099_v55 }
 0x815   :  { %v7176_v57 = vpop.f32.mrb[40].mxu1 }
 0x816   :  { %v7177_v59 = vadd.f32 %v8075_v56, %v7176_v57  ;;  %v8402_v61 = vpop.f32.mrb[41].mxu1 }
 0x817   :  { %v7179_v62 = vpop.f32.mrb[42].mxu1 }
 0x818   :  { %v7180_v0 = vadd.f32 %v8075_v56, %v7179_v62  ;;  %v8403_v63 = vpop.f32.mrb[43].mxu1  ;;  %v7194_v2 = vsel %vm7185_vm5, -inf, %v7177_v59  ;;  %v7186_v3 = vsel %vm7185_vm5, %v7177_v59, -inf }
 0x819   :  { %v7196_v4 = vsel %vm6924_vm4, %v7194_v2, -inf  ;;  %v7188_v5 = vsel %vm6924_vm4, %v7186_v3, -inf }
 0x81a   :  { %7197 = vmax.xlane.f32.xlu1 %v7196_v4  ;;  %7189 = vmax.xlane.f32.xlu0 %v7188_v5  ;;  %v7195_v58 = vsel %vm7185_vm5, -inf, %v7180_v0  ;;  %v7187_v6 = vsel %vm7185_vm5, %v7180_v0, -inf }
 0x81b   :  { %v7199_v7 = vsel %vm6924_vm4, %v7195_v58, -inf  ;;  %v7191_v8 = vsel %vm6924_vm4, %v7187_v6, -inf }
 0x81e   :  { %7200 = vmax.xlane.f32.xlu1 %v7199_v7  ;;  %7192 = vmax.xlane.f32.xlu0 %v7191_v8 }
 0x8a7   :  { %v7198_v38 = vpop.xlane.xlu1 %7197  ;;  %v7190_v9 = vpop.xlane.xlu0 %7189 }
 0x8a8   :  { %v7202_v10 = vsel %vm7185_vm5, %v7190_v9, %v7198_v38 }
 0x8a9   :  { %v7204_v1 = vsub.f32 %v7177_v59, %v7202_v10 }
 0x8ab   :  { %v7206_v11 = vmul.f32 1.442695, %v7204_v1  ;;  %v7201_v12 = vpop.xlane.xlu1 %7200  ;;  %v7193_v13 = vpop.xlane.xlu0 %7192 }
 0x8ac   :  { %v7203_v15 = vsel %vm7185_vm5, %v7193_v13, %v7201_v12 }
 0x8ad   :  { %9660 = vpow2.f32 %v7206_v11  ;;  %v7205_v14 = vsub.f32 %v7180_v0, %v7203_v15 }
 0x8af   :  { %v7208_v47 = vmul.f32 1.442695, %v7205_v14 }
 0x8b1   :  { %9662 = vpow2.f32 %v7208_v47 }
 0x8b7   :  { %v9661_v17 = vpop.eup %9660 }
 0x8b8   :  { %v7210_v18 = vsel %vm7185_vm5, %v9661_v17, 0.0  ;;  %v7218_v20 = vsel %vm7185_vm5, 0.0, %v9661_v17 }
 0x8b9   :  { %v7212_v19 = vsel %vm6924_vm4, %v7210_v18, 0.0  ;;  %v7220_v23 = vsel %vm6924_vm4, %v7218_v20, 0.0 }
 0x8ba   :  { %7213 = vadd.xlane.f32.xlu0 %v7212_v19 }
 0x8bb   :  { %v9663_v21 = vpop.eup %9662 }
 0x8bc   :  { %v7211_v22 = vsel %vm7185_vm5, %v9663_v21, 0.0  ;;  %v7219_v25 = vsel %vm7185_vm5, 0.0, %v9663_v21 }
 0x8bd   :  { %v7215_v24 = vsel %vm6924_vm4, %v7211_v22, 0.0  ;;  %v7223_v27 = vsel %vm6924_vm4, %v7219_v25, 0.0 }
 0x8be   :  { %7221 = vadd.xlane.f32.xlu0 %v7220_v23  ;;  %7216 = vadd.xlane.f32.xlu1 %v7215_v24 }
 0x8c2   :  { %7224 = vadd.xlane.f32.xlu1 %v7223_v27 }
 0x947   :  { %v7214_v28 = vpop.xlane.xlu0 %7213 }
 0x94b   :  { %v7217_v29 = vpop.xlane.xlu1 %7216  ;;  %v7222_v45 = vpop.xlane.xlu0 %7221 }
 0x94c   :  { %v7226_v30 = vsel %vm7185_vm5, %v7214_v28, %v7222_v45 }
 0x94d   :  { %9664 = vrcp.f32 %v7226_v30 }
 0x94f   :  { %v7225_v42 = vpop.xlane.xlu1 %7224 }
 0x950   :  { %v7227_v31 = vsel %vm7185_vm5, %v7217_v29, %v7225_v42 }
 0x951   :  { %9666 = vrcp.f32 %v7227_v31 }
 0x957   :  { %v9665_v32 = vpop.eup %9664 }
 0x958   :  { %v7229_v33 = vmul.f32 %v9665_v32, %v9661_v17 }
 0x95a   :  { %7232 = vst.msk [vmem:[%s12477_s6] sm:$0xff] %vm6924_vm4, %v7229_v33 }
 0x95b   :  { %v9667_v34 = vpop.eup %9666 }
 0x95c   :  { %v7231_v60 = vmul.f32 %v9667_v34, %v9663_v21 }
 0x95e   :  { %7233 = vst.msk [vmem:[%s12477_s6 + $0x8] sm:$0xff] %vm6924_vm4, %v7231_v60 }

</bundles_post_ra>
